<compile_context>
chip_gen: v7x
topology: tpu7x:2x2x1
jax: 0.10.0
libtpu: 0.0.40
codegen_flags: <defaults>
</compile_context>

<pallas_src>
import functools

import jax
import jax.numpy as jnp
from jax.experimental import pallas as pl
from jax.experimental.pallas import tpu as pltpu

# MXU operand dtype (f32 accumulation everywhere; norms / softmax / masks f32).
MXU_DTYPE = jnp.bfloat16

TM_TARGET = 256        # generic matmul row tile
TM_VOCAB_TARGET = 1024  # vocab projection row tile (stream dense_w rarely)
TN_TARGET = 768        # 3x256 MXU passes, divides E / 3E / 2E / 19200


def _vmem_limit_bytes():
    # v7x has only 64 MiB physical VMEM per TC -> leave headroom; v5e/v6e have
    # 128 MiB -> allow bigger limits.
    try:
        cap = int(getattr(pltpu.get_tpu_info(), "vmem_capacity_bytes",
                          64 * 1024 * 1024))
    except Exception:
        cap = 64 * 1024 * 1024
    return max(32 * 1024 * 1024, min(cap * 3 // 4, 100 * 1024 * 1024))


VMEM_LIMIT = _vmem_limit_bytes()


def _pick_tile(dim, target, align):
    """Largest multiple of `align` <= target that divides dim, else full dim."""
    if dim <= target:
        return dim
    t = (target // align) * align
    while t >= align:
        if dim % t == 0:
            return t
        t -= align
    return dim


# ----------------------------- fused linear -----------------------------

def _fused_linear_kernel(*refs, has_norm, has_bias, has_res, activation, eps):
    idx = 0
    x_ref = refs[idx]; idx += 1
    w_ref = refs[idx]; idx += 1
    nw_ref = b_ref = r_ref = None
    if has_norm:
        nw_ref = refs[idx]; idx += 1
    if has_bias:
        b_ref = refs[idx]; idx += 1
    if has_res:
        r_ref = refs[idx]; idx += 1
    o_ref = refs[idx]; idx += 1

    if has_norm:
        xn_ref = refs[idx]  # VMEM scratch (tm, K) bf16, persists across j

        @pl.when(pl.program_id(1) == 0)
        def _():
            x = x_ref[...].astype(jnp.float32)
            ms = jnp.mean(x * x, axis=-1, keepdims=True)
            xn_ref[...] = (x * jax.lax.rsqrt(ms + eps)
                           * nw_ref[...].astype(jnp.float32)).astype(MXU_DTYPE)

        xb = xn_ref[...]
    else:
        xb = x_ref[...].astype(MXU_DTYPE)

    acc = jnp.dot(xb, w_ref[...].astype(MXU_DTYPE),
                  preferred_element_type=jnp.float32)
    if has_bias:
        acc = acc + b_ref[...].astype(jnp.float32)
    if activation == "silu":
        acc = acc * jax.nn.sigmoid(acc)
    if has_res:
        acc = acc + r_ref[...].astype(jnp.float32)
    o_ref[...] = acc.astype(o_ref.dtype)


def fused_linear(x2d, w_kn, b=None, *, norm_w=None, residual=None,
                 activation="none", eps=1e-6, out_dtype=jnp.float32,
                 tm_target=TM_TARGET):
    """(M, K) @ (K, N) [+bias] with optional fused pre-RMSNorm / SiLU / residual."""
    M, K = x2d.shape
    Kw, N = w_kn.shape
    assert K == Kw
    tm = _pick_tile(M, tm_target, 8)
    tn = _pick_tile(N, TN_TARGET, 128)
    grid = (M // tm, N // tn)
    has_norm = norm_w is not None

    in_specs = [pl.BlockSpec((tm, K), lambda i, j: (i, 0)),
                pl.BlockSpec((K, tn), lambda i, j: (0, j))]
    args = [x2d, w_kn]
    if has_norm:
        in_specs.append(pl.BlockSpec((1, K), lambda i, j: (0, 0)))
        args.append(norm_w.reshape(1, K).astype(jnp.float32))
    if b is not None:
        in_specs.append(pl.BlockSpec((1, tn), lambda i, j: (0, j)))
        args.append(b.reshape(1, N).astype(jnp.float32))
    if residual is not None:
        in_specs.append(pl.BlockSpec((tm, tn), lambda i, j: (i, j)))
        args.append(residual)

    kernel = functools.partial(
        _fused_linear_kernel, has_norm=has_norm, has_bias=b is not None,
        has_res=residual is not None, activation=activation, eps=eps)
    return pl.pallas_call(
        kernel,
        out_shape=jax.ShapeDtypeStruct((M, N), out_dtype),
        grid=grid,
        in_specs=in_specs,
        out_specs=pl.BlockSpec((tm, tn), lambda i, j: (i, j)),
        scratch_shapes=[pltpu.VMEM((tm, K), MXU_DTYPE)] if has_norm else [],
        compiler_params=pltpu.CompilerParams(
            # j carries the cached normed-x scratch -> "arbitrary" when fused.
            dimension_semantics=("parallel", "arbitrary" if has_norm else "parallel"),
            vmem_limit_bytes=VMEM_LIMIT),
    )(*args)


# ----------------------------- vocab head: matmul + fused softmax -----------------------------

def _logits_lse_kernel(x_ref, w_ref, c_ref, m_ref, l_ref):
    j = pl.program_id(1)

    @pl.when(j == 0)
    def _():
        m_ref[...] = jnp.full(m_ref.shape, -jnp.inf, m_ref.dtype)
        l_ref[...] = jnp.zeros(l_ref.shape, l_ref.dtype)

    acc = jnp.dot(x_ref[...].astype(MXU_DTYPE), w_ref[...].astype(MXU_DTYPE),
                  preferred_element_type=jnp.float32)        # (tm, tn)
    m_prev = m_ref[...]
    m_new = jnp.maximum(m_prev, jnp.max(acc, axis=-1, keepdims=True))
    l_ref[...] = (l_ref[...] * jnp.exp(m_prev - m_new)
                  + jnp.sum(jnp.exp(acc - m_new), axis=-1, keepdims=True))
    m_ref[...] = m_new

    @pl.when(j == pl.num_programs(1) - 1)
    def _():
        c_ref[...] = m_ref[...] + jnp.log(l_ref[...])


def logits_logsumexp(x2d, w_kn):
    """Per-row logsumexp of x2d @ w_kn, streaming the vocab weight (no logits in HBM)."""
    M, K = x2d.shape
    _, N = w_kn.shape
    tm = _pick_tile(M, TM_VOCAB_TARGET, 8)
    tn = _pick_tile(N, TN_TARGET, 128)
    grid = (M // tm, N // tn)
    return pl.pallas_call(
        _logits_lse_kernel,
        out_shape=jax.ShapeDtypeStruct((M, 1), jnp.float32),
        grid=grid,
        in_specs=[pl.BlockSpec((tm, K), lambda i, j: (i, 0)),
                  pl.BlockSpec((K, tn), lambda i, j: (0, j))],
        out_specs=pl.BlockSpec((tm, 1), lambda i, j: (i, 0)),
        scratch_shapes=[pltpu.VMEM((tm, 1), jnp.float32),
                        pltpu.VMEM((tm, 1), jnp.float32)],
        compiler_params=pltpu.CompilerParams(
            dimension_semantics=("parallel", "arbitrary"),
            vmem_limit_bytes=VMEM_LIMIT),
    )(x2d, w_kn)


def _vocab_probs_kernel(x_ref, w_ref, c_ref, o_ref):
    acc = jnp.dot(x_ref[...].astype(MXU_DTYPE), w_ref[...].astype(MXU_DTYPE),
                  preferred_element_type=jnp.float32)
    o_ref[...] = jnp.exp(acc - c_ref[...])    # exact softmax: exp(logit - lse)


def vocab_probs(x2d, w_kn, lse):
    M, K = x2d.shape
    _, N = w_kn.shape
    tm = _pick_tile(M, TM_VOCAB_TARGET, 8)
    tn = _pick_tile(N, TN_TARGET, 128)
    grid = (M // tm, N // tn)
    return pl.pallas_call(
        _vocab_probs_kernel,
        out_shape=jax.ShapeDtypeStruct((M, N), jnp.float32),
        grid=grid,
        in_specs=[pl.BlockSpec((tm, K), lambda i, j: (i, 0)),
                  pl.BlockSpec((K, tn), lambda i, j: (0, j)),
                  pl.BlockSpec((tm, 1), lambda i, j: (i, 0))],
        out_specs=pl.BlockSpec((tm, tn), lambda i, j: (i, j)),
        compiler_params=pltpu.CompilerParams(
            dimension_semantics=("parallel", "parallel"),
            vmem_limit_bytes=VMEM_LIMIT),
    )(x2d, w_kn, lse)


# ----------------------------- attention (RoPE fused) -----------------------------

def rope_tables(L, C):
    """cos expanded to full C (pairs repeated) and sin with the (-,+) pair signs."""
    half = C // 2
    inv = 1.0 / (10000.0 ** (jnp.arange(0, C, 2, dtype=jnp.float32)[:half] / C))
    t = jnp.arange(L, dtype=jnp.float32)
    freqs = jnp.outer(t, inv)                                   # (L, C/2)
    cos = jnp.cos(freqs)
    sin = jnp.sin(freqs)
    cos_full = jnp.repeat(cos, 2, axis=-1)                      # [c0,c0,c1,c1,...]
    sin_signed = jnp.stack([-sin, sin], axis=-1).reshape(L, C)  # [-s0,+s0,-s1,+s1,...]
    return cos_full, sin_signed


def _rope_rotate(x, cos_full, sin_signed):
    # Interleaved-pair rotation (matches torch apply_rotary_emb):
    #   out[:,2i]   = x[:,2i]*cos_i - x[:,2i+1]*sin_i
    #   out[:,2i+1] = x[:,2i+1]*cos_i + x[:,2i]*sin_i
    L, C = x.shape
    lane = jax.lax.broadcasted_iota(jnp.int32, (L, C), 1)
    even = (lane % 2) == 0
    # Static-shift rolls (jnp.roll lowers to lane slice+concat; valid everywhere).
    swapped = jnp.where(even, jnp.roll(x, -1, axis=1), jnp.roll(x, 1, axis=1))
    return x * cos_full + swapped * sin_signed


def _attn_kernel(*refs, num_heads, causal, scale, tq, same_rope):
    q_ref, k_ref, v_ref, cq_ref, sq_ref = refs[:5]
    idx = 5
    if same_rope:
        ck_ref, sk_ref = cq_ref, sq_ref
    else:
        ck_ref, sk_ref = refs[5], refs[6]
        idx = 7
    o_ref = refs[idx]

    t = pl.program_id(1)
    q0 = t * tq
    if tq % 8 == 0:
        q0 = pl.multiple_of(q0, 8)
    cq = cq_ref[pl.ds(q0, tq), :]
    sq = sq_ref[pl.ds(q0, tq), :]

    q = _rope_rotate(q_ref[0].astype(jnp.float32), cq, sq) * scale        # (tq, E)
    k = _rope_rotate(k_ref[0].astype(jnp.float32), ck_ref[...], sk_ref[...])  # (S, E)

    E = q.shape[1]
    S = k.shape[0]
    Dh = E // num_heads

    # Single casts, hoisted out of the per-head loop.
    qb = q.astype(MXU_DTYPE)
    kb = k.astype(MXU_DTYPE)
    vb = v_ref[0].astype(MXU_DTYPE)

    nmask = None
    if causal:  # iota/mask computed once (JAX does not CSE broadcast_in_dim)
        row = q0 + jax.lax.broadcasted_iota(jnp.int32, (tq, S), 0)
        col = jax.lax.broadcasted_iota(jnp.int32, (tq, S), 1)
        nmask = jnp.where(row >= col, 0.0, -1e30).astype(jnp.float32)

    def head_out(h):
        s = jax.lax.dot_general(qb[:, h * Dh:(h + 1) * Dh],
                                kb[:, h * Dh:(h + 1) * Dh],
                                (((1,), (1,)), ((), ())),
                                preferred_element_type=jnp.float32)
        if causal:
            s = s + nmask
        m = jnp.max(s, axis=-1, keepdims=True)
        e = jnp.exp(s - m)
        p = e * pl.reciprocal(jnp.sum(e, axis=-1, keepdims=True), approx=True)
        return jnp.dot(p.astype(MXU_DTYPE), vb[:, h * Dh:(h + 1) * Dh],
                       preferred_element_type=jnp.float32)

    # Write per head-pair (128-lane stores at Dh=64) to bound live ranges;
    # fall back to single-head writes when num_heads is odd.
    if num_heads % 2 == 0:
        for h in range(0, num_heads, 2):
            o_ref[0, :, h * Dh:(h + 2) * Dh] = jnp.concatenate(
                [head_out(h), head_out(h + 1)], axis=-1).astype(o_ref.dtype)
    else:
        for h in range(num_heads):
            o_ref[0, :, h * Dh:(h + 1) * Dh] = head_out(h).astype(o_ref.dtype)


def attention(q, k, v, cos_q, sin_q, cos_k=None, sin_k=None, *, num_heads, causal):
    """SDPA with fused RoPE; q/k/v packed (B, T, H*Dh); grid over (batch, q tiles)."""
    B, T, E = q.shape
    S = k.shape[1]
    same_rope = cos_k is None
    if same_rope:
        assert S == T
    scale = 1.0 / float(E // num_heads) ** 0.5
    tq = _pick_tile(T, 256, 8)
    grid = (B, T // tq)

    in_specs = [pl.BlockSpec((1, tq, E), lambda b, t: (b, t, 0)),
                pl.BlockSpec((1, S, E), lambda b, t: (b, 0, 0)),
                pl.BlockSpec((1, S, E), lambda b, t: (b, 0, 0)),
                pl.BlockSpec((T, E), lambda b, t: (0, 0)),
                pl.BlockSpec((T, E), lambda b, t: (0, 0))]
    args = [q, k, v, cos_q, sin_q]
    if not same_rope:
        in_specs += [pl.BlockSpec((S, E), lambda b, t: (0, 0)),
                     pl.BlockSpec((S, E), lambda b, t: (0, 0))]
        args += [cos_k, sin_k]

    kernel = functools.partial(_attn_kernel, num_heads=num_heads, causal=causal,
                               scale=scale, tq=tq, same_rope=same_rope)
    return pl.pallas_call(
        kernel,
        out_shape=jax.ShapeDtypeStruct((B, T, E), MXU_DTYPE),
        grid=grid,
        in_specs=in_specs,
        out_specs=pl.BlockSpec((1, tq, E), lambda b, t: (b, t, 0)),
        compiler_params=pltpu.CompilerParams(
            dimension_semantics=("parallel", "parallel"),
            vmem_limit_bytes=VMEM_LIMIT),
    )(*args)


# ----------------------------- model glue -----------------------------

def decoder_block(x_flat, feat_flat, blk, num_heads, B, T, S,
                  cos_t, sin_t, cos_s, sin_s):
    E = x_flat.shape[-1]

    # --- self attention: ln1 fused into c_attn (bf16 out), residual fused into proj ---
    qkv = fused_linear(x_flat, blk["c_attn_w"], norm_w=blk["ln1"], out_dtype=MXU_DTYPE)
    q = qkv[:, :E].reshape(B, T, E)
    k = qkv[:, E:2 * E].reshape(B, T, E)
    v = qkv[:, 2 * E:].reshape(B, T, E)
    y = attention(q, k, v, cos_t, sin_t, num_heads=num_heads, causal=True)
    x_flat = fused_linear(y.reshape(B * T, E), blk["sa_proj_w"], residual=x_flat)

    # --- cross attention: ln2 fused into q proj, residual fused into proj ---
    q = fused_linear(x_flat, blk["ca_q_w"], norm_w=blk["ln2"],
                     out_dtype=MXU_DTYPE).reshape(B, T, E)
    k = fused_linear(feat_flat, blk["ca_k_w"], out_dtype=MXU_DTYPE).reshape(B, S, E)
    v = fused_linear(feat_flat, blk["ca_v_w"], out_dtype=MXU_DTYPE).reshape(B, S, E)
    y = attention(q, k, v, cos_t, sin_t, cos_s, sin_s,
                  num_heads=num_heads, causal=False)
    x_flat = fused_linear(y.reshape(B * T, E), blk["ca_proj_w"], residual=x_flat)

    # --- feed forward: ln3 fused into w1 (bf16 hidden), residual fused into w2 ---
    # (torch Sequential applies SiLU after BOTH linears; reproduced faithfully.)
    h = fused_linear(x_flat, blk["ff_w1"], norm_w=blk["ln3"],
                     activation="silu", out_dtype=MXU_DTYPE)
    x_flat = fused_linear(h, blk["ff_w2"], activation="silu", residual=x_flat)
    return x_flat


def foundation_forward(params, tokens, image_feat, num_heads, embd_size):
    # TODO(synk): MobileViT backbone (self.feature_encoder) is an external module
    # not reproduced here; `image_feat` stands in for its NCHW output.
    B, Cimg, Hp, Wp = image_feat.shape
    E = embd_size
    T = tokens.shape[1]
    S = E

    # image feature projections (torch .view between them is a raw reinterpret)
    img = fused_linear(image_feat.reshape(B * Cimg, Hp * Wp),
                       params["fv_w"], params["fv_b"], out_dtype=MXU_DTYPE)
    img = img.reshape(B, E, Cimg)                               # raw view, as in torch
    feat_flat = fused_linear(img.reshape(B * E, Cimg),
                             params["fv2_w"], params["fv2_b"],
                             out_dtype=MXU_DTYPE)               # (B*S, E)

    # RoPE tables computed once per forward, reused by every block
    cos_t, sin_t = rope_tables(T, E)
    cos_s, sin_s = rope_tables(S, E)

    # TODO(synk): embedding gather kept as jnp.take glue (no Pallas gather here).
    x_flat = jnp.take(params["emb"], tokens, axis=0).reshape(B * T, E)
    for blk in params["blocks"]:
        x_flat = decoder_block(x_flat, feat_flat, blk, num_heads, B, T, S,
                               cos_t, sin_t, cos_s, sin_s)

    # vocab projection with fused softmax: pass 1 = online logsumexp while
    # streaming dense_w; pass 2 = exp(logit - lse).  No f32 logits in HBM.
    lse = logits_logsumexp(x_flat, params["dense_w"])
    probs = vocab_probs(x_flat, params["dense_w"], lse)
    # TODO(synk): return_loss=True branch (masked cross-entropy + accuracy) not implemented.
    return probs.reshape(B, T, -1)


def init_params(key, *, vocab_size, embd_size, num_blocks, cimg, patch):
    """Weights pre-transposed (K, N) in bf16; norms/biases/embedding f32."""
    def w(k, kdim, ndim, scale=0.02):
        return (scale * jax.random.normal(k, (kdim, ndim), jnp.float32)).astype(MXU_DTYPE)

    def vec(k, n, scale=0.02):
        return scale * jax.random.normal(k, (n,), jnp.float32)

    keys = iter(jax.random.split(key, 16 + 16 * num_blocks))
    E = embd_size
    params = {
        "emb": 0.02 * jax.random.normal(next(keys), (vocab_size, E), jnp.float32),
        "fv_w": w(next(keys), patch * patch, E),
        "fv_b": vec(next(keys), E),
        "fv2_w": w(next(keys), cimg, E),
        "fv2_b": vec(next(keys), E),
        "dense_w": w(next(keys), E, vocab_size),
        "blocks": [],
    }
    for _ in range(num_blocks):
        params["blocks"].append({
            "ln1": jnp.ones((E,), jnp.float32),
            "ln2": jnp.ones((E,), jnp.float32),
            "ln3": jnp.ones((E,), jnp.float32),
            "c_attn_w": w(next(keys), E, 3 * E),
            "sa_proj_w": w(next(keys), E, E),
            "ca_q_w": w(next(keys), E, E),
            "ca_k_w": w(next(keys), E, E),
            "ca_v_w": w(next(keys), E, E),
            "ca_proj_w": w(next(keys), E, E),
            "ff_w1": w(next(keys), E, 2 * E),
            "ff_w2": w(next(keys), 2 * E, E),
        })
    return params


if __name__ == "__main__":
    # Small shapes consistent with the module (scaled down from
    # vocab=19200, E=768, Cimg=320, 8x8 patches, 12 heads).
    B, T = 2, 8
    E = 32
    H = 4
    V = 128
    Cimg = 16
    PATCH = 8
    NUM_BLOCKS = 2

    key = jax.random.PRNGKey(0)
    kp, kt, ki = jax.random.split(key, 3)
    params = init_params(kp, vocab_size=V, embd_size=E,
                         num_blocks=NUM_BLOCKS, cimg=Cimg, patch=PATCH)
    tokens = jax.random.randint(kt, (B, T), 0, V, dtype=jnp.int32)
    image_feat = jax.random.normal(ki, (B, Cimg, PATCH, PATCH), jnp.float32)

    fwd = jax.jit(functools.partial(foundation_forward, num_heads=H, embd_size=E))
    out = jax.block_until_ready(fwd(params, tokens, image_feat))
    assert out.shape == (B, T, V)
    assert bool(jnp.all(jnp.isfinite(out)))
    # fused softmax sanity: rows sum to ~1
    assert bool(jnp.allclose(jnp.sum(out, axis=-1), 1.0, atol=1e-3))
    print("KERNEL_OK")
</pallas_src>

<mosaic_0001>
module attributes {stable_mosaic.version = 11 : i64} {
  func.func @_fused_linear_kernel(%arg0: i32, %arg1: i32, %arg2: memref<16x32xf32, #tpu.memory_space<vmem>>, %arg3: memref<32x96xbf16, #tpu.memory_space<vmem>>, %arg4: memref<1x32xf32, #tpu.memory_space<vmem>>, %arg5: memref<16x96xbf16, #tpu.memory_space<vmem>>, %arg6: memref<16x32xbf16, #tpu.memory_space<vmem>>) attributes {dimension_semantics = [#tpu.dimension_semantics<parallel>, #tpu.dimension_semantics<arbitrary>], iteration_bounds = array<i64: 1, 1>, scalar_prefetch = 0 : i64, scratch_operands = 1 : i64, tpu.core_type = #tpu.core_type<tc>, window_params = [{transform_indices = @transform_0, window_bounds = array<i64: 16, 32>}, {transform_indices = @transform_1, window_bounds = array<i64: 32, 96>}, {pipeline_mode = #tpu.pipeline_mode<synchronous>, transform_indices = @transform_2, window_bounds = array<i64: 1, 32>}, {transform_indices = @transform_3, window_bounds = array<i64: 16, 96>}]} {
    %c0_i32 = arith.constant 0 : i32
    %0 = arith.cmpi eq, %arg1, %c0_i32 : i32
    %1 = arith.extui %0 : i1 to i32
    %c0_i32_0 = arith.constant 0 : i32
    %2 = arith.cmpi ne, %1, %c0_i32_0 : i32
    scf.if %2 {
      %c0_6 = arith.constant 0 : index
      %c0_7 = arith.constant 0 : index
      %8 = vector.load %arg2[%c0_6, %c0_7] : memref<16x32xf32, #tpu.memory_space<vmem>>, vector<16x32xf32>
      %9 = arith.mulf %8, %8 : vector<16x32xf32>
      %cst_8 = arith.constant dense<0.000000e+00> : vector<16xf32>
      %10 = vector.multi_reduction <add>, %9, %cst_8 [1] : vector<16x32xf32> to vector<16xf32>
      %11 = vector.shape_cast %10 : vector<16xf32> to vector<16x1xf32>
      %cst_9 = arith.constant 3.200000e+01 : f32
      %12 = vector.broadcast %cst_9 : f32 to vector<16x1xf32>
      %13 = arith.divf %11, %12 : vector<16x1xf32>
      %cst_10 = arith.constant 9.99999997E-7 : f32
      %14 = vector.broadcast %cst_10 : f32 to vector<16x1xf32>
      %15 = arith.addf %13, %14 : vector<16x1xf32>
      %16 = math.rsqrt %15 : vector<16x1xf32>
      %17 = vector.broadcast %16 : vector<16x1xf32> to vector<16x32xf32>
      %18 = arith.mulf %8, %17 : vector<16x32xf32>
      %c0_11 = arith.constant 0 : index
      %c0_12 = arith.constant 0 : index
      %19 = vector.load %arg4[%c0_11, %c0_12] : memref<1x32xf32, #tpu.memory_space<vmem>>, vector<1x32xf32>
      %20 = vector.broadcast %19 : vector<1x32xf32> to vector<16x32xf32>
      %21 = arith.mulf %18, %20 : vector<16x32xf32>
      %22 = arith.truncf %21 : vector<16x32xf32> to vector<16x32xbf16>
      %c0_13 = arith.constant 0 : index
      %c0_14 = arith.constant 0 : index
      %23 = vector.load %arg6[%c0_13, %c0_14] : memref<16x32xbf16, #tpu.memory_space<vmem>>, vector<16x32xbf16>
      tpu.vector_store %arg6[%c0_13, %c0_14], %22 {strides = array<i32>} : memref<16x32xbf16, #tpu.memory_space<vmem>>, vector<16x32xbf16>,
    } else {
    }
    %c0 = arith.constant 0 : index
    %c0_1 = arith.constant 0 : index
    %3 = vector.load %arg6[%c0, %c0_1] : memref<16x32xbf16, #tpu.memory_space<vmem>>, vector<16x32xbf16>
    %c0_2 = arith.constant 0 : index
    %c0_3 = arith.constant 0 : index
    %4 = vector.load %arg3[%c0_2, %c0_3] : memref<32x96xbf16, #tpu.memory_space<vmem>>, vector<32x96xbf16>
    %cst = arith.constant dense<0.000000e+00> : vector<16x96xf32>
    %5 = tpu.matmul %3, %4, %cst {dimension_numbers = #tpu.dot_dimension_numbers<[1], [0], [0], [1], [0, 0, 1, 1], [], []>} : vector<16x32xbf16>, vector<32x96xbf16>, vector<16x96xf32> -> vector<16x96xf32>
    %6 = arith.truncf %5 : vector<16x96xf32> to vector<16x96xbf16>
    %c0_4 = arith.constant 0 : index
    %c0_5 = arith.constant 0 : index
    %7 = vector.load %arg5[%c0_4, %c0_5] : memref<16x96xbf16, #tpu.memory_space<vmem>>, vector<16x96xbf16>
    tpu.vector_store %arg5[%c0_4, %c0_5], %6 {strides = array<i32>} : memref<16x96xbf16, #tpu.memory_space<vmem>>, vector<16x96xbf16>,
    return
  }
  func.func @transform_0(%arg0: i32, %arg1: i32) -> (i32, i32) {
    %c0_i32 = arith.constant 0 : i32
    %c0_i32_0 = arith.constant 0 : i32
    return %arg0, %c0_i32 : i32, i32
  }
  func.func @transform_1(%arg0: i32, %arg1: i32) -> (i32, i32) {
    %c0_i32 = arith.constant 0 : i32
    %c0_i32_0 = arith.constant 0 : i32
    return %c0_i32, %arg1 : i32, i32
  }
  func.func @transform_2(%arg0: i32, %arg1: i32) -> (i32, i32) {
    %c0_i32 = arith.constant 0 : i32
    %c0_i32_0 = arith.constant 0 : i32
    %c0_i32_1 = arith.constant 0 : i32
    return %c0_i32, %c0_i32_0 : i32, i32
  }
  func.func @transform_3(%arg0: i32, %arg1: i32) -> (i32, i32) {
    %c0_i32 = arith.constant 0 : i32
    return %arg0, %arg1 : i32, i32
  }
}

module attributes {stable_mosaic.version = 11 : i64} {
  func.func @_fused_linear_kernel(%arg0: i32, %arg1: i32, %arg2: memref<16x32xbf16, #tpu.memory_space<vmem>>, %arg3: memref<32x32xbf16, #tpu.memory_space<vmem>>, %arg4: memref<16x32xf32, #tpu.memory_space<vmem>>, %arg5: memref<16x32xf32, #tpu.memory_space<vmem>>) attributes {dimension_semantics = [#tpu.dimension_semantics<parallel>, #tpu.dimension_semantics<parallel>], iteration_bounds = array<i64: 1, 1>, scalar_prefetch = 0 : i64, scratch_operands = 0 : i64, tpu.core_type = #tpu.core_type<tc>, window_params = [{transform_indices = @transform_0, window_bounds = array<i64: 16, 32>}, {transform_indices = @transform_1, window_bounds = array<i64: 32, 32>}, {transform_indices = @transform_2, window_bounds = array<i64: 16, 32>}, {transform_indices = @transform_3, window_bounds = array<i64: 16, 32>}]} {
    %c0 = arith.constant 0 : index
    %c0_0 = arith.constant 0 : index
    %0 = vector.load %arg2[%c0, %c0_0] : memref<16x32xbf16, #tpu.memory_space<vmem>>, vector<16x32xbf16>
    %c0_1 = arith.constant 0 : index
    %c0_2 = arith.constant 0 : index
    %1 = vector.load %arg3[%c0_1, %c0_2] : memref<32x32xbf16, #tpu.memory_space<vmem>>, vector<32x32xbf16>
    %cst = arith.constant dense<0.000000e+00> : vector<16x32xf32>
    %2 = tpu.matmul %0, %1, %cst {dimension_numbers = #tpu.dot_dimension_numbers<[1], [0], [0], [1], [0, 0, 1, 1], [], []>} : vector<16x32xbf16>, vector<32x32xbf16>, vector<16x32xf32> -> vector<16x32xf32>
    %c0_3 = arith.constant 0 : index
    %c0_4 = arith.constant 0 : index
    %3 = vector.load %arg4[%c0_3, %c0_4] : memref<16x32xf32, #tpu.memory_space<vmem>>, vector<16x32xf32>
    %4 = arith.addf %2, %3 : vector<16x32xf32>
    %c0_5 = arith.constant 0 : index
    %c0_6 = arith.constant 0 : index
    %5 = vector.load %arg5[%c0_5, %c0_6] : memref<16x32xf32, #tpu.memory_space<vmem>>, vector<16x32xf32>
    tpu.vector_store %arg5[%c0_5, %c0_6], %4 {strides = array<i32>} : memref<16x32xf32, #tpu.memory_space<vmem>>, vector<16x32xf32>,
    return
  }
  func.func @transform_0(%arg0: i32, %arg1: i32) -> (i32, i32) {
    %c0_i32 = arith.constant 0 : i32
    %c0_i32_0 = arith.constant 0 : i32
    return %arg0, %c0_i32 : i32, i32
  }
  func.func @transform_1(%arg0: i32, %arg1: i32) -> (i32, i32) {
    %c0_i32 = arith.constant 0 : i32
    %c0_i32_0 = arith.constant 0 : i32
    return %c0_i32, %arg1 : i32, i32
  }
  func.func @transform_2(%arg0: i32, %arg1: i32) -> (i32, i32) {
    %c0_i32 = arith.constant 0 : i32
    return %arg0, %arg1 : i32, i32
  }
  func.func @transform_3(%arg0: i32, %arg1: i32) -> (i32, i32) {
    %c0_i32 = arith.constant 0 : i32
    return %arg0, %arg1 : i32, i32
  }
}

module attributes {stable_mosaic.version = 11 : i64} {
  func.func @_attn_kernel(%arg0: i32, %arg1: i32, %arg2: memref<1x8x32xbf16, #tpu.memory_space<vmem>>, %arg3: memref<1x8x32xbf16, #tpu.memory_space<vmem>>, %arg4: memref<1x8x32xbf16, #tpu.memory_space<vmem>>, %arg5: memref<8x32xf32, #tpu.memory_space<vmem>>, %arg6: memref<8x32xf32, #tpu.memory_space<vmem>>, %arg7: memref<1x8x32xbf16, #tpu.memory_space<vmem>>) attributes {dimension_semantics = [#tpu.dimension_semantics<parallel>, #tpu.dimension_semantics<parallel>], iteration_bounds = array<i64: 2, 1>, scalar_prefetch = 0 : i64, scratch_operands = 0 : i64, tpu.core_type = #tpu.core_type<tc>, window_params = [{transform_indices = @transform_0, window_bounds = array<i64: 1, 8, 32>}, {transform_indices = @transform_1, window_bounds = array<i64: 1, 8, 32>}, {transform_indices = @transform_2, window_bounds = array<i64: 1, 8, 32>}, {pipeline_mode = #tpu.pipeline_mode<synchronous>, transform_indices = @transform_3, window_bounds = array<i64: 8, 32>}, {pipeline_mode = #tpu.pipeline_mode<synchronous>, transform_indices = @transform_4, window_bounds = array<i64: 8, 32>}, {transform_indices = @transform_5, window_bounds = array<i64: 1, 8, 32>}]} {
    %c8_i32 = arith.constant 8 : i32
    %0 = arith.muli %arg1, %c8_i32 : i32
    %1 = tpu.assume_multiple %0, 8 : i32
    %2 = arith.index_cast %1 : i32 to index
    %c0 = arith.constant 0 : index
    %3 = vector.load %arg5[%2, %c0] : memref<8x32xf32, #tpu.memory_space<vmem>>, vector<8x32xf32>
    %4 = arith.index_cast %1 : i32 to index
    %c0_0 = arith.constant 0 : index
    %5 = vector.load %arg6[%4, %c0_0] : memref<8x32xf32, #tpu.memory_space<vmem>>, vector<8x32xf32>
    %c0_1 = arith.constant 0 : index
    %c0_2 = arith.constant 0 : index
    %c0_3 = arith.constant 0 : index
    %6 = vector.load %arg2[%c0_1, %c0_2, %c0_3] : memref<1x8x32xbf16, #tpu.memory_space<vmem>>, vector<1x8x32xbf16>
    %7 = vector.shape_cast %6 : vector<1x8x32xbf16> to vector<8x32xbf16>
    %8 = arith.extf %7 : vector<8x32xbf16> to vector<8x32xf32>
    %9 = tpu.iota {dimensions = array<i32: 1>} : vector<8x32xi32>
    %c2_i32 = arith.constant 2 : i32
    %c0_i32 = arith.constant 0 : i32
    %10 = arith.cmpi eq, %c2_i32, %c0_i32 : i32
    %c1_i32 = arith.constant 1 : i32
    %11 = arith.select %10, %c1_i32, %c2_i32 : i32
    %12 = vector.broadcast %11 : i32 to vector<8x32xi32>
    %13 = arith.remsi %9, %12 : vector<8x32xi32>
    %c0_i32_4 = arith.constant 0 : i32
    %14 = vector.broadcast %c0_i32_4 : i32 to vector<8x32xi32>
    %15 = arith.cmpi ne, %13, %14 : vector<8x32xi32>
    %c0_i32_5 = arith.constant 0 : i32
    %16 = vector.broadcast %c0_i32_5 : i32 to vector<8x32xi32>
    %17 = arith.cmpi slt, %13, %16 : vector<8x32xi32>
    %c0_i32_6 = arith.constant 0 : i32
    %18 = arith.cmpi slt, %11, %c0_i32_6 : i32
    %19 = vector.broadcast %18 : i1 to vector<8x32xi1>
    %20 = vector.broadcast %19 : vector<8x32xi1> to vector<8x32xi1>
    %21 = arith.xori %17, %20 : vector<8x32xi1>
    %22 = arith.andi %21, %15 : vector<8x32xi1>
    %23 = vector.broadcast %11 : i32 to vector<8x32xi32>
    %24 = arith.addi %13, %23 : vector<8x32xi32>
    %25 = arith.select %22, %24, %13 : vector<8x32xi1>, vector<8x32xi32>
    %c0_i32_7 = arith.constant 0 : i32
    %26 = vector.broadcast %c0_i32_7 : i32 to vector<8x32xi32>
    %27 = arith.cmpi eq, %25, %26 : vector<8x32xi32>
    %28 = vector.extract_strided_slice %8 {offsets = [0, 1], sizes = [8, 31], strides = [1, 1]} : vector<8x32xf32> to vector<8x31xf32>
    %29 = vector.extract_strided_slice %8 {offsets = [0, 0], sizes = [8, 1], strides = [1, 1]} : vector<8x32xf32> to vector<8x1xf32>
    %30 = tpu.concatenate %28, %29 in 1 : vector<8x31xf32>, vector<8x1xf32> -> vector<8x32xf32>
    %31 = vector.extract_strided_slice %8 {offsets = [0, 31], sizes = [8, 1], strides = [1, 1]} : vector<8x32xf32> to vector<8x1xf32>
    %32 = vector.extract_strided_slice %8 {offsets = [0, 0], sizes = [8, 31], strides = [1, 1]} : vector<8x32xf32> to vector<8x31xf32>
    %33 = tpu.concatenate %31, %32 in 1 : vector<8x1xf32>, vector<8x31xf32> -> vector<8x32xf32>
    %34 = arith.select %27, %30, %33 : vector<8x32xi1>, vector<8x32xf32>
    %35 = arith.mulf %8, %3 : vector<8x32xf32>
    %36 = arith.mulf %34, %5 : vector<8x32xf32>
    %37 = arith.addf %35, %36 : vector<8x32xf32>
    %cst = arith.constant 0.353553385 : f32
    %38 = vector.broadcast %cst : f32 to vector<8x32xf32>
    %39 = arith.mulf %37, %38 : vector<8x32xf32>
    %c0_8 = arith.constant 0 : index
    %c0_9 = arith.constant 0 : index
    %c0_10 = arith.constant 0 : index
    %40 = vector.load %arg3[%c0_8, %c0_9, %c0_10] : memref<1x8x32xbf16, #tpu.memory_space<vmem>>, vector<1x8x32xbf16>
    %41 = vector.shape_cast %40 : vector<1x8x32xbf16> to vector<8x32xbf16>
    %42 = arith.extf %41 : vector<8x32xbf16> to vector<8x32xf32>
    %c0_11 = arith.constant 0 : index
    %c0_12 = arith.constant 0 : index
    %43 = vector.load %arg5[%c0_11, %c0_12] : memref<8x32xf32, #tpu.memory_space<vmem>>, vector<8x32xf32>
    %c0_13 = arith.constant 0 : index
    %c0_14 = arith.constant 0 : index
    %44 = vector.load %arg6[%c0_13, %c0_14] : memref<8x32xf32, #tpu.memory_space<vmem>>, vector<8x32xf32>
    %45 = tpu.iota {dimensions = array<i32: 1>} : vector<8x32xi32>
    %c2_i32_15 = arith.constant 2 : i32
    %c0_i32_16 = arith.constant 0 : i32
    %46 = arith.cmpi eq, %c2_i32_15, %c0_i32_16 : i32
    %c1_i32_17 = arith.constant 1 : i32
    %47 = arith.select %46, %c1_i32_17, %c2_i32_15 : i32
    %48 = vector.broadcast %47 : i32 to vector<8x32xi32>
    %49 = arith.remsi %45, %48 : vector<8x32xi32>
    %c0_i32_18 = arith.constant 0 : i32
    %50 = vector.broadcast %c0_i32_18 : i32 to vector<8x32xi32>
    %51 = arith.cmpi ne, %49, %50 : vector<8x32xi32>
    %c0_i32_19 = arith.constant 0 : i32
    %52 = vector.broadcast %c0_i32_19 : i32 to vector<8x32xi32>
    %53 = arith.cmpi slt, %49, %52 : vector<8x32xi32>
    %c0_i32_20 = arith.constant 0 : i32
    %54 = arith.cmpi slt, %47, %c0_i32_20 : i32
    %55 = vector.broadcast %54 : i1 to vector<8x32xi1>
    %56 = vector.broadcast %55 : vector<8x32xi1> to vector<8x32xi1>
    %57 = arith.xori %53, %56 : vector<8x32xi1>
    %58 = arith.andi %57, %51 : vector<8x32xi1>
    %59 = vector.broadcast %47 : i32 to vector<8x32xi32>
    %60 = arith.addi %49, %59 : vector<8x32xi32>
    %61 = arith.select %58, %60, %49 : vector<8x32xi1>, vector<8x32xi32>
    %c0_i32_21 = arith.constant 0 : i32
    %62 = vector.broadcast %c0_i32_21 : i32 to vector<8x32xi32>
    %63 = arith.cmpi eq, %61, %62 : vector<8x32xi32>
    %64 = vector.extract_strided_slice %42 {offsets = [0, 1], sizes = [8, 31], strides = [1, 1]} : vector<8x32xf32> to vector<8x31xf32>
    %65 = vector.extract_strided_slice %42 {offsets = [0, 0], sizes = [8, 1], strides = [1, 1]} : vector<8x32xf32> to vector<8x1xf32>
    %66 = tpu.concatenate %64, %65 in 1 : vector<8x31xf32>, vector<8x1xf32> -> vector<8x32xf32>
    %67 = vector.extract_strided_slice %42 {offsets = [0, 31], sizes = [8, 1], strides = [1, 1]} : vector<8x32xf32> to vector<8x1xf32>
    %68 = vector.extract_strided_slice %42 {offsets = [0, 0], sizes = [8, 31], strides = [1, 1]} : vector<8x32xf32> to vector<8x31xf32>
    %69 = tpu.concatenate %67, %68 in 1 : vector<8x1xf32>, vector<8x31xf32> -> vector<8x32xf32>
    %70 = arith.select %63, %66, %69 : vector<8x32xi1>, vector<8x32xf32>
    %71 = arith.mulf %42, %43 : vector<8x32xf32>
    %72 = arith.mulf %70, %44 : vector<8x32xf32>
    %73 = arith.addf %71, %72 : vector<8x32xf32>
    %74 = arith.truncf %39 : vector<8x32xf32> to vector<8x32xbf16>
    %75 = arith.truncf %73 : vector<8x32xf32> to vector<8x32xbf16>
    %c0_22 = arith.constant 0 : index
    %c0_23 = arith.constant 0 : index
    %c0_24 = arith.constant 0 : index
    %76 = vector.load %arg4[%c0_22, %c0_23, %c0_24] : memref<1x8x32xbf16, #tpu.memory_space<vmem>>, vector<1x8x32xbf16>
    %77 = vector.shape_cast %76 : vector<1x8x32xbf16> to vector<8x32xbf16>
    %78 = tpu.iota {dimensions = array<i32: 0>} : vector<8x8xi32>
    %79 = vector.broadcast %1 : i32 to vector<8x8xi32>
    %80 = arith.addi %79, %78 : vector<8x8xi32>
    %81 = tpu.iota {dimensions = array<i32: 1>} : vector<8x8xi32>
    %82 = arith.cmpi sge, %80, %81 : vector<8x8xi32>
    %cst_25 = arith.constant 0.000000e+00 : f32
    %cst_26 = arith.constant -1.000000e+30 : f32
    %83 = vector.broadcast %cst_25 : f32 to vector<8x8xf32>
    %84 = vector.broadcast %cst_26 : f32 to vector<8x8xf32>
    %85 = arith.select %82, %83, %84 : vector<8x8xi1>, vector<8x8xf32>
    %86 = vector.extract_strided_slice %74 {offsets = [0, 0], sizes = [8, 8], strides = [1, 1]} : vector<8x32xbf16> to vector<8x8xbf16>
    %87 = vector.extract_strided_slice %75 {offsets = [0, 0], sizes = [8, 8], strides = [1, 1]} : vector<8x32xbf16> to vector<8x8xbf16>
    %cst_27 = arith.constant dense<0.000000e+00> : vector<8x8xf32>
    %88 = tpu.matmul %86, %87, %cst_27 {dimension_numbers = #tpu.dot_dimension_numbers<[1], [1], [0], [0], [0, 0, 1, 0], [], []>} : vector<8x8xbf16>, vector<8x8xbf16>, vector<8x8xf32> -> vector<8x8xf32>
    %89 = arith.addf %88, %85 : vector<8x8xf32>
    %cst_28 = arith.constant dense<0xFF800000> : vector<8xf32>
    %90 = vector.multi_reduction <maximumf>, %89, %cst_28 [1] : vector<8x8xf32> to vector<8xf32>
    %91 = vector.shape_cast %90 : vector<8xf32> to vector<8x1xf32>
    %92 = vector.broadcast %91 : vector<8x1xf32> to vector<8x8xf32>
    %93 = arith.subf %89, %92 : vector<8x8xf32>
    %94 = math.exp %93 : vector<8x8xf32>
    %cst_29 = arith.constant dense<0.000000e+00> : vector<8xf32>
    %95 = vector.multi_reduction <add>, %94, %cst_29 [1] : vector<8x8xf32> to vector<8xf32>
    %96 = vector.shape_cast %95 : vector<8xf32> to vector<8x1xf32>
    %97 = tpu.reciprocal %96 {approx = true} : vector<8x1xf32> -> vector<8x1xf32>
    %98 = vector.broadcast %97 : vector<8x1xf32> to vector<8x8xf32>
    %99 = arith.mulf %94, %98 : vector<8x8xf32>
    %100 = arith.truncf %99 : vector<8x8xf32> to vector<8x8xbf16>
    %101 = vector.extract_strided_slice %77 {offsets = [0, 0], sizes = [8, 8], strides = [1, 1]} : vector<8x32xbf16> to vector<8x8xbf16>
    %cst_30 = arith.constant dense<0.000000e+00> : vector<8x8xf32>
    %102 = tpu.matmul %100, %101, %cst_30 {dimension_numbers = #tpu.dot_dimension_numbers<[1], [0], [0], [1], [0, 0, 1, 1], [], []>} : vector<8x8xbf16>, vector<8x8xbf16>, vector<8x8xf32> -> vector<8x8xf32>
    %103 = vector.extract_strided_slice %74 {offsets = [0, 8], sizes = [8, 8], strides = [1, 1]} : vector<8x32xbf16> to vector<8x8xbf16>
    %104 = vector.extract_strided_slice %75 {offsets = [0, 8], sizes = [8, 8], strides = [1, 1]} : vector<8x32xbf16> to vector<8x8xbf16>
    %cst_31 = arith.constant dense<0.000000e+00> : vector<8x8xf32>
    %105 = tpu.matmul %103, %104, %cst_31 {dimension_numbers = #tpu.dot_dimension_numbers<[1], [1], [0], [0], [0, 0, 1, 0], [], []>} : vector<8x8xbf16>, vector<8x8xbf16>, vector<8x8xf32> -> vector<8x8xf32>
    %106 = arith.addf %105, %85 : vector<8x8xf32>
    %cst_32 = arith.constant dense<0xFF800000> : vector<8xf32>
    %107 = vector.multi_reduction <maximumf>, %106, %cst_32 [1] : vector<8x8xf32> to vector<8xf32>
    %108 = vector.shape_cast %107 : vector<8xf32> to vector<8x1xf32>
    %109 = vector.broadcast %108 : vector<8x1xf32> to vector<8x8xf32>
    %110 = arith.subf %106, %109 : vector<8x8xf32>
    %111 = math.exp %110 : vector<8x8xf32>
    %cst_33 = arith.constant dense<0.000000e+00> : vector<8xf32>
    %112 = vector.multi_reduction <add>, %111, %cst_33 [1] : vector<8x8xf32> to vector<8xf32>
    %113 = vector.shape_cast %112 : vector<8xf32> to vector<8x1xf32>
    %114 = tpu.reciprocal %113 {approx = true} : vector<8x1xf32> -> vector<8x1xf32>
    %115 = vector.broadcast %114 : vector<8x1xf32> to vector<8x8xf32>
    %116 = arith.mulf %111, %115 : vector<8x8xf32>
    %117 = arith.truncf %116 : vector<8x8xf32> to vector<8x8xbf16>
    %118 = vector.extract_strided_slice %77 {offsets = [0, 8], sizes = [8, 8], strides = [1, 1]} : vector<8x32xbf16> to vector<8x8xbf16>
    %cst_34 = arith.constant dense<0.000000e+00> : vector<8x8xf32>
    %119 = tpu.matmul %117, %118, %cst_34 {dimension_numbers = #tpu.dot_dimension_numbers<[1], [0], [0], [1], [0, 0, 1, 1], [], []>} : vector<8x8xbf16>, vector<8x8xbf16>, vector<8x8xf32> -> vector<8x8xf32>
    %120 = tpu.concatenate %102, %119 in 1 : vector<8x8xf32>, vector<8x8xf32> -> vector<8x16xf32>
    %121 = arith.truncf %120 : vector<8x16xf32> to vector<8x16xbf16>
    %c0_35 = arith.constant 0 : index
    %c0_36 = arith.constant 0 : index
    %c0_37 = arith.constant 0 : index
    %122 = vector.load %arg7[%c0_35, %c0_36, %c0_37] : memref<1x8x32xbf16, #tpu.memory_space<vmem>>, vector<1x8x16xbf16>
    %123 = vector.shape_cast %122 : vector<1x8x16xbf16> to vector<8x16xbf16>
    %124 = vector.shape_cast %121 : vector<8x16xbf16> to vector<1x8x16xbf16>
    tpu.vector_store %arg7[%c0_35, %c0_36, %c0_37], %124 {strides = array<i32>} : memref<1x8x32xbf16, #tpu.memory_space<vmem>>, vector<1x8x16xbf16>,
    %125 = vector.extract_strided_slice %74 {offsets = [0, 16], sizes = [8, 8], strides = [1, 1]} : vector<8x32xbf16> to vector<8x8xbf16>
    %126 = vector.extract_strided_slice %75 {offsets = [0, 16], sizes = [8, 8], strides = [1, 1]} : vector<8x32xbf16> to vector<8x8xbf16>
    %cst_38 = arith.constant dense<0.000000e+00> : vector<8x8xf32>
    %127 = tpu.matmul %125, %126, %cst_38 {dimension_numbers = #tpu.dot_dimension_numbers<[1], [1], [0], [0], [0, 0, 1, 0], [], []>} : vector<8x8xbf16>, vector<8x8xbf16>, vector<8x8xf32> -> vector<8x8xf32>
    %128 = arith.addf %127, %85 : vector<8x8xf32>
    %cst_39 = arith.constant dense<0xFF800000> : vector<8xf32>
    %129 = vector.multi_reduction <maximumf>, %128, %cst_39 [1] : vector<8x8xf32> to vector<8xf32>
    %130 = vector.shape_cast %129 : vector<8xf32> to vector<8x1xf32>
    %131 = vector.broadcast %130 : vector<8x1xf32> to vector<8x8xf32>
    %132 = arith.subf %128, %131 : vector<8x8xf32>
    %133 = math.exp %132 : vector<8x8xf32>
    %cst_40 = arith.constant dense<0.000000e+00> : vector<8xf32>
    %134 = vector.multi_reduction <add>, %133, %cst_40 [1] : vector<8x8xf32> to vector<8xf32>
    %135 = vector.shape_cast %134 : vector<8xf32> to vector<8x1xf32>
    %136 = tpu.reciprocal %135 {approx = true} : vector<8x1xf32> -> vector<8x1xf32>
    %137 = vector.broadcast %136 : vector<8x1xf32> to vector<8x8xf32>
    %138 = arith.mulf %133, %137 : vector<8x8xf32>
    %139 = arith.truncf %138 : vector<8x8xf32> to vector<8x8xbf16>
    %140 = vector.extract_strided_slice %77 {offsets = [0, 16], sizes = [8, 8], strides = [1, 1]} : vector<8x32xbf16> to vector<8x8xbf16>
    %cst_41 = arith.constant dense<0.000000e+00> : vector<8x8xf32>
    %141 = tpu.matmul %139, %140, %cst_41 {dimension_numbers = #tpu.dot_dimension_numbers<[1], [0], [0], [1], [0, 0, 1, 1], [], []>} : vector<8x8xbf16>, vector<8x8xbf16>, vector<8x8xf32> -> vector<8x8xf32>
    %142 = vector.extract_strided_slice %74 {offsets = [0, 24], sizes = [8, 8], strides = [1, 1]} : vector<8x32xbf16> to vector<8x8xbf16>
    %143 = vector.extract_strided_slice %75 {offsets = [0, 24], sizes = [8, 8], strides = [1, 1]} : vector<8x32xbf16> to vector<8x8xbf16>
    %cst_42 = arith.constant dense<0.000000e+00> : vector<8x8xf32>
    %144 = tpu.matmul %142, %143, %cst_42 {dimension_numbers = #tpu.dot_dimension_numbers<[1], [1], [0], [0], [0, 0, 1, 0], [], []>} : vector<8x8xbf16>, vector<8x8xbf16>, vector<8x8xf32> -> vector<8x8xf32>
    %145 = arith.addf %144, %85 : vector<8x8xf32>
    %cst_43 = arith.constant dense<0xFF800000> : vector<8xf32>
    %146 = vector.multi_reduction <maximumf>, %145, %cst_43 [1] : vector<8x8xf32> to vector<8xf32>
    %147 = vector.shape_cast %146 : vector<8xf32> to vector<8x1xf32>
    %148 = vector.broadcast %147 : vector<8x1xf32> to vector<8x8xf32>
    %149 = arith.subf %145, %148 : vector<8x8xf32>
    %150 = math.exp %149 : vector<8x8xf32>
    %cst_44 = arith.constant dense<0.000000e+00> : vector<8xf32>
    %151 = vector.multi_reduction <add>, %150, %cst_44 [1] : vector<8x8xf32> to vector<8xf32>
    %152 = vector.shape_cast %151 : vector<8xf32> to vector<8x1xf32>
    %153 = tpu.reciprocal %152 {approx = true} : vector<8x1xf32> -> vector<8x1xf32>
    %154 = vector.broadcast %153 : vector<8x1xf32> to vector<8x8xf32>
    %155 = arith.mulf %150, %154 : vector<8x8xf32>
    %156 = arith.truncf %155 : vector<8x8xf32> to vector<8x8xbf16>
    %157 = vector.extract_strided_slice %77 {offsets = [0, 24], sizes = [8, 8], strides = [1, 1]} : vector<8x32xbf16> to vector<8x8xbf16>
    %cst_45 = arith.constant dense<0.000000e+00> : vector<8x8xf32>
    %158 = tpu.matmul %156, %157, %cst_45 {dimension_numbers = #tpu.dot_dimension_numbers<[1], [0], [0], [1], [0, 0, 1, 1], [], []>} : vector<8x8xbf16>, vector<8x8xbf16>, vector<8x8xf32> -> vector<8x8xf32>
    %159 = tpu.concatenate %141, %158 in 1 : vector<8x8xf32>, vector<8x8xf32> -> vector<8x16xf32>
    %160 = arith.truncf %159 : vector<8x16xf32> to vector<8x16xbf16>
    %c0_46 = arith.constant 0 : index
    %c0_47 = arith.constant 0 : index
    %c16 = arith.constant 16 : index
    %161 = vector.load %arg7[%c0_46, %c0_47, %c16] : memref<1x8x32xbf16, #tpu.memory_space<vmem>>, vector<1x8x16xbf16>
    %162 = vector.shape_cast %161 : vector<1x8x16xbf16> to vector<8x16xbf16>
    %163 = vector.shape_cast %160 : vector<8x16xbf16> to vector<1x8x16xbf16>
    tpu.vector_store %arg7[%c0_46, %c0_47, %c16], %163 {strides = array<i32>} : memref<1x8x32xbf16, #tpu.memory_space<vmem>>, vector<1x8x16xbf16>,
    return
  }
  func.func @transform_0(%arg0: i32, %arg1: i32) -> (i32, i32, i32) {
    %c0_i32 = arith.constant 0 : i32
    %c0_i32_0 = arith.constant 0 : i32
    return %arg0, %arg1, %c0_i32 : i32, i32, i32
  }
  func.func @transform_1(%arg0: i32, %arg1: i32) -> (i32, i32, i32) {
    %c0_i32 = arith.constant 0 : i32
    %c0_i32_0 = arith.constant 0 : i32
    %c0_i32_1 = arith.constant 0 : i32
    return %arg0, %c0_i32, %c0_i32_0 : i32, i32, i32
  }
  func.func @transform_2(%arg0: i32, %arg1: i32) -> (i32, i32, i32) {
    %c0_i32 = arith.constant 0 : i32
    %c0_i32_0 = arith.constant 0 : i32
    %c0_i32_1 = arith.constant 0 : i32
    return %arg0, %c0_i32, %c0_i32_0 : i32, i32, i32
  }
  func.func @transform_3(%arg0: i32, %arg1: i32) -> (i32, i32) {
    %c0_i32 = arith.constant 0 : i32
    %c0_i32_0 = arith.constant 0 : i32
    %c0_i32_1 = arith.constant 0 : i32
    return %c0_i32, %c0_i32_0 : i32, i32
  }
  func.func @transform_4(%arg0: i32, %arg1: i32) -> (i32, i32) {
    %c0_i32 = arith.constant 0 : i32
    %c0_i32_0 = arith.constant 0 : i32
    %c0_i32_1 = arith.constant 0 : i32
    return %c0_i32, %c0_i32_0 : i32, i32
  }
  func.func @transform_5(%arg0: i32, %arg1: i32) -> (i32, i32, i32) {
    %c0_i32 = arith.constant 0 : i32
    %c0_i32_0 = arith.constant 0 : i32
    return %arg0, %arg1, %c0_i32 : i32, i32, i32
  }
}

module attributes {stable_mosaic.version = 11 : i64} {
  func.func @_fused_linear_kernel(%arg0: i32, %arg1: i32, %arg2: memref<16x32xf32, #tpu.memory_space<vmem>>, %arg3: memref<32x32xbf16, #tpu.memory_space<vmem>>, %arg4: memref<1x32xf32, #tpu.memory_space<vmem>>, %arg5: memref<16x32xbf16, #tpu.memory_space<vmem>>, %arg6: memref<16x32xbf16, #tpu.memory_space<vmem>>) attributes {dimension_semantics = [#tpu.dimension_semantics<parallel>, #tpu.dimension_semantics<arbitrary>], iteration_bounds = array<i64: 1, 1>, scalar_prefetch = 0 : i64, scratch_operands = 1 : i64, tpu.core_type = #tpu.core_type<tc>, window_params = [{transform_indices = @transform_0, window_bounds = array<i64: 16, 32>}, {transform_indices = @transform_1, window_bounds = array<i64: 32, 32>}, {pipeline_mode = #tpu.pipeline_mode<synchronous>, transform_indices = @transform_2, window_bounds = array<i64: 1, 32>}, {transform_indices = @transform_3, window_bounds = array<i64: 16, 32>}]} {
    %c0_i32 = arith.constant 0 : i32
    %0 = arith.cmpi eq, %arg1, %c0_i32 : i32
    %1 = arith.extui %0 : i1 to i32
    %c0_i32_0 = arith.constant 0 : i32
    %2 = arith.cmpi ne, %1, %c0_i32_0 : i32
    scf.if %2 {
      %c0_6 = arith.constant 0 : index
      %c0_7 = arith.constant 0 : index
      %8 = vector.load %arg2[%c0_6, %c0_7] : memref<16x32xf32, #tpu.memory_space<vmem>>, vector<16x32xf32>
      %9 = arith.mulf %8, %8 : vector<16x32xf32>
      %cst_8 = arith.constant dense<0.000000e+00> : vector<16xf32>
      %10 = vector.multi_reduction <add>, %9, %cst_8 [1] : vector<16x32xf32> to vector<16xf32>
      %11 = vector.shape_cast %10 : vector<16xf32> to vector<16x1xf32>
      %cst_9 = arith.constant 3.200000e+01 : f32
      %12 = vector.broadcast %cst_9 : f32 to vector<16x1xf32>
      %13 = arith.divf %11, %12 : vector<16x1xf32>
      %cst_10 = arith.constant 9.99999997E-7 : f32
      %14 = vector.broadcast %cst_10 : f32 to vector<16x1xf32>
      %15 = arith.addf %13, %14 : vector<16x1xf32>
      %16 = math.rsqrt %15 : vector<16x1xf32>
      %17 = vector.broadcast %16 : vector<16x1xf32> to vector<16x32xf32>
      %18 = arith.mulf %8, %17 : vector<16x32xf32>
      %c0_11 = arith.constant 0 : index
      %c0_12 = arith.constant 0 : index
      %19 = vector.load %arg4[%c0_11, %c0_12] : memref<1x32xf32, #tpu.memory_space<vmem>>, vector<1x32xf32>
      %20 = vector.broadcast %19 : vector<1x32xf32> to vector<16x32xf32>
      %21 = arith.mulf %18, %20 : vector<16x32xf32>
      %22 = arith.truncf %21 : vector<16x32xf32> to vector<16x32xbf16>
      %c0_13 = arith.constant 0 : index
      %c0_14 = arith.constant 0 : index
      %23 = vector.load %arg6[%c0_13, %c0_14] : memref<16x32xbf16, #tpu.memory_space<vmem>>, vector<16x32xbf16>
      tpu.vector_store %arg6[%c0_13, %c0_14], %22 {strides = array<i32>} : memref<16x32xbf16, #tpu.memory_space<vmem>>, vector<16x32xbf16>,
    } else {
    }
    %c0 = arith.constant 0 : index
    %c0_1 = arith.constant 0 : index
    %3 = vector.load %arg6[%c0, %c0_1] : memref<16x32xbf16, #tpu.memory_space<vmem>>, vector<16x32xbf16>
    %c0_2 = arith.constant 0 : index
    %c0_3 = arith.constant 0 : index
    %4 = vector.load %arg3[%c0_2, %c0_3] : memref<32x32xbf16, #tpu.memory_space<vmem>>, vector<32x32xbf16>
    %cst = arith.constant dense<0.000000e+00> : vector<16x32xf32>
    %5 = tpu.matmul %3, %4, %cst {dimension_numbers = #tpu.dot_dimension_numbers<[1], [0], [0], [1], [0, 0, 1, 1], [], []>} : vector<16x32xbf16>, vector<32x32xbf16>, vector<16x32xf32> -> vector<16x32xf32>
    %6 = arith.truncf %5 : vector<16x32xf32> to vector<16x32xbf16>
    %c0_4 = arith.constant 0 : index
    %c0_5 = arith.constant 0 : index
    %7 = vector.load %arg5[%c0_4, %c0_5] : memref<16x32xbf16, #tpu.memory_space<vmem>>, vector<16x32xbf16>
    tpu.vector_store %arg5[%c0_4, %c0_5], %6 {strides = array<i32>} : memref<16x32xbf16, #tpu.memory_space<vmem>>, vector<16x32xbf16>,
    return
  }
  func.func @transform_0(%arg0: i32, %arg1: i32) -> (i32, i32) {
    %c0_i32 = arith.constant 0 : i32
    %c0_i32_0 = arith.constant 0 : i32
    return %arg0, %c0_i32 : i32, i32
  }
  func.func @transform_1(%arg0: i32, %arg1: i32) -> (i32, i32) {
    %c0_i32 = arith.constant 0 : i32
    %c0_i32_0 = arith.constant 0 : i32
    return %c0_i32, %arg1 : i32, i32
  }
  func.func @transform_2(%arg0: i32, %arg1: i32) -> (i32, i32) {
    %c0_i32 = arith.constant 0 : i32
    %c0_i32_0 = arith.constant 0 : i32
    %c0_i32_1 = arith.constant 0 : i32
    return %c0_i32, %c0_i32_0 : i32, i32
  }
  func.func @transform_3(%arg0: i32, %arg1: i32) -> (i32, i32) {
    %c0_i32 = arith.constant 0 : i32
    return %arg0, %arg1 : i32, i32
  }
}

module attributes {stable_mosaic.version = 11 : i64} {
  func.func @_fused_linear_kernel(%arg0: i32, %arg1: i32, %arg2: memref<32x64xf32, #tpu.memory_space<vmem>>, %arg3: memref<64x32xbf16, #tpu.memory_space<vmem>>, %arg4: memref<1x32xf32, #tpu.memory_space<vmem>>, %arg5: memref<32x32xbf16, #tpu.memory_space<vmem>>) attributes {dimension_semantics = [#tpu.dimension_semantics<parallel>, #tpu.dimension_semantics<parallel>], iteration_bounds = array<i64: 1, 1>, scalar_prefetch = 0 : i64, scratch_operands = 0 : i64, tpu.core_type = #tpu.core_type<tc>, window_params = [{transform_indices = @transform_0, window_bounds = array<i64: 32, 64>}, {transform_indices = @transform_1, window_bounds = array<i64: 64, 32>}, {transform_indices = @transform_2, window_bounds = array<i64: 1, 32>}, {transform_indices = @transform_3, window_bounds = array<i64: 32, 32>}]} {
    %c0 = arith.constant 0 : index
    %c0_0 = arith.constant 0 : index
    %0 = vector.load %arg2[%c0, %c0_0] : memref<32x64xf32, #tpu.memory_space<vmem>>, vector<32x64xf32>
    %1 = arith.truncf %0 : vector<32x64xf32> to vector<32x64xbf16>
    %c0_1 = arith.constant 0 : index
    %c0_2 = arith.constant 0 : index
    %2 = vector.load %arg3[%c0_1, %c0_2] : memref<64x32xbf16, #tpu.memory_space<vmem>>, vector<64x32xbf16>
    %cst = arith.constant dense<0.000000e+00> : vector<32x32xf32>
    %3 = tpu.matmul %1, %2, %cst {dimension_numbers = #tpu.dot_dimension_numbers<[1], [0], [0], [1], [0, 0, 1, 1], [], []>} : vector<32x64xbf16>, vector<64x32xbf16>, vector<32x32xf32> -> vector<32x32xf32>
    %c0_3 = arith.constant 0 : index
    %c0_4 = arith.constant 0 : index
    %4 = vector.load %arg4[%c0_3, %c0_4] : memref<1x32xf32, #tpu.memory_space<vmem>>, vector<1x32xf32>
    %5 = vector.broadcast %4 : vector<1x32xf32> to vector<32x32xf32>
    %6 = arith.addf %3, %5 : vector<32x32xf32>
    %7 = arith.truncf %6 : vector<32x32xf32> to vector<32x32xbf16>
    %c0_5 = arith.constant 0 : index
    %c0_6 = arith.constant 0 : index
    %8 = vector.load %arg5[%c0_5, %c0_6] : memref<32x32xbf16, #tpu.memory_space<vmem>>, vector<32x32xbf16>
    tpu.vector_store %arg5[%c0_5, %c0_6], %7 {strides = array<i32>} : memref<32x32xbf16, #tpu.memory_space<vmem>>, vector<32x32xbf16>,
    return
  }
  func.func @transform_0(%arg0: i32, %arg1: i32) -> (i32, i32) {
    %c0_i32 = arith.constant 0 : i32
    %c0_i32_0 = arith.constant 0 : i32
    return %arg0, %c0_i32 : i32, i32
  }
  func.func @transform_1(%arg0: i32, %arg1: i32) -> (i32, i32) {
    %c0_i32 = arith.constant 0 : i32
    %c0_i32_0 = arith.constant 0 : i32
    return %c0_i32, %arg1 : i32, i32
  }
  func.func @transform_2(%arg0: i32, %arg1: i32) -> (i32, i32) {
    %c0_i32 = arith.constant 0 : i32
    %c0_i32_0 = arith.constant 0 : i32
    return %c0_i32, %arg1 : i32, i32
  }
  func.func @transform_3(%arg0: i32, %arg1: i32) -> (i32, i32) {
    %c0_i32 = arith.constant 0 : i32
    return %arg0, %arg1 : i32, i32
  }
}

module attributes {stable_mosaic.version = 11 : i64} {
  func.func @_fused_linear_kernel(%arg0: i32, %arg1: i32, %arg2: memref<64x32xbf16, #tpu.memory_space<vmem>>, %arg3: memref<32x32xbf16, #tpu.memory_space<vmem>>, %arg4: memref<64x32xbf16, #tpu.memory_space<vmem>>) attributes {dimension_semantics = [#tpu.dimension_semantics<parallel>, #tpu.dimension_semantics<parallel>], iteration_bounds = array<i64: 1, 1>, scalar_prefetch = 0 : i64, scratch_operands = 0 : i64, tpu.core_type = #tpu.core_type<tc>, window_params = [{transform_indices = @transform_0, window_bounds = array<i64: 64, 32>}, {transform_indices = @transform_1, window_bounds = array<i64: 32, 32>}, {transform_indices = @transform_2, window_bounds = array<i64: 64, 32>}]} {
    %c0 = arith.constant 0 : index
    %c0_0 = arith.constant 0 : index
    %0 = vector.load %arg2[%c0, %c0_0] : memref<64x32xbf16, #tpu.memory_space<vmem>>, vector<64x32xbf16>
    %c0_1 = arith.constant 0 : index
    %c0_2 = arith.constant 0 : index
    %1 = vector.load %arg3[%c0_1, %c0_2] : memref<32x32xbf16, #tpu.memory_space<vmem>>, vector<32x32xbf16>
    %cst = arith.constant dense<0.000000e+00> : vector<64x32xf32>
    %2 = tpu.matmul %0, %1, %cst {dimension_numbers = #tpu.dot_dimension_numbers<[1], [0], [0], [1], [0, 0, 1, 1], [], []>} : vector<64x32xbf16>, vector<32x32xbf16>, vector<64x32xf32> -> vector<64x32xf32>
    %3 = arith.truncf %2 : vector<64x32xf32> to vector<64x32xbf16>
    %c0_3 = arith.constant 0 : index
    %c0_4 = arith.constant 0 : index
    %4 = vector.load %arg4[%c0_3, %c0_4] : memref<64x32xbf16, #tpu.memory_space<vmem>>, vector<64x32xbf16>
    tpu.vector_store %arg4[%c0_3, %c0_4], %3 {strides = array<i32>} : memref<64x32xbf16, #tpu.memory_space<vmem>>, vector<64x32xbf16>,
    return
  }
  func.func @transform_0(%arg0: i32, %arg1: i32) -> (i32, i32) {
    %c0_i32 = arith.constant 0 : i32
    %c0_i32_0 = arith.constant 0 : i32
    return %arg0, %c0_i32 : i32, i32
  }
  func.func @transform_1(%arg0: i32, %arg1: i32) -> (i32, i32) {
    %c0_i32 = arith.constant 0 : i32
    %c0_i32_0 = arith.constant 0 : i32
    return %c0_i32, %arg1 : i32, i32
  }
  func.func @transform_2(%arg0: i32, %arg1: i32) -> (i32, i32) {
    %c0_i32 = arith.constant 0 : i32
    return %arg0, %arg1 : i32, i32
  }
}

module attributes {stable_mosaic.version = 11 : i64} {
  func.func @_fused_linear_kernel(%arg0: i32, %arg1: i32, %arg2: memref<64x16xbf16, #tpu.memory_space<vmem>>, %arg3: memref<16x32xbf16, #tpu.memory_space<vmem>>, %arg4: memref<1x32xf32, #tpu.memory_space<vmem>>, %arg5: memref<64x32xbf16, #tpu.memory_space<vmem>>) attributes {dimension_semantics = [#tpu.dimension_semantics<parallel>, #tpu.dimension_semantics<parallel>], iteration_bounds = array<i64: 1, 1>, scalar_prefetch = 0 : i64, scratch_operands = 0 : i64, tpu.core_type = #tpu.core_type<tc>, window_params = [{transform_indices = @transform_0, window_bounds = array<i64: 64, 16>}, {transform_indices = @transform_1, window_bounds = array<i64: 16, 32>}, {transform_indices = @transform_2, window_bounds = array<i64: 1, 32>}, {transform_indices = @transform_3, window_bounds = array<i64: 64, 32>}]} {
    %c0 = arith.constant 0 : index
    %c0_0 = arith.constant 0 : index
    %0 = vector.load %arg2[%c0, %c0_0] : memref<64x16xbf16, #tpu.memory_space<vmem>>, vector<64x16xbf16>
    %c0_1 = arith.constant 0 : index
    %c0_2 = arith.constant 0 : index
    %1 = vector.load %arg3[%c0_1, %c0_2] : memref<16x32xbf16, #tpu.memory_space<vmem>>, vector<16x32xbf16>
    %cst = arith.constant dense<0.000000e+00> : vector<64x32xf32>
    %2 = tpu.matmul %0, %1, %cst {dimension_numbers = #tpu.dot_dimension_numbers<[1], [0], [0], [1], [0, 0, 1, 1], [], []>} : vector<64x16xbf16>, vector<16x32xbf16>, vector<64x32xf32> -> vector<64x32xf32>
    %c0_3 = arith.constant 0 : index
    %c0_4 = arith.constant 0 : index
    %3 = vector.load %arg4[%c0_3, %c0_4] : memref<1x32xf32, #tpu.memory_space<vmem>>, vector<1x32xf32>
    %4 = vector.broadcast %3 : vector<1x32xf32> to vector<64x32xf32>
    %5 = arith.addf %2, %4 : vector<64x32xf32>
    %6 = arith.truncf %5 : vector<64x32xf32> to vector<64x32xbf16>
    %c0_5 = arith.constant 0 : index
    %c0_6 = arith.constant 0 : index
    %7 = vector.load %arg5[%c0_5, %c0_6] : memref<64x32xbf16, #tpu.memory_space<vmem>>, vector<64x32xbf16>
    tpu.vector_store %arg5[%c0_5, %c0_6], %6 {strides = array<i32>} : memref<64x32xbf16, #tpu.memory_space<vmem>>, vector<64x32xbf16>,
    return
  }
  func.func @transform_0(%arg0: i32, %arg1: i32) -> (i32, i32) {
    %c0_i32 = arith.constant 0 : i32
    %c0_i32_0 = arith.constant 0 : i32
    return %arg0, %c0_i32 : i32, i32
  }
  func.func @transform_1(%arg0: i32, %arg1: i32) -> (i32, i32) {
    %c0_i32 = arith.constant 0 : i32
    %c0_i32_0 = arith.constant 0 : i32
    return %c0_i32, %arg1 : i32, i32
  }
  func.func @transform_2(%arg0: i32, %arg1: i32) -> (i32, i32) {
    %c0_i32 = arith.constant 0 : i32
    %c0_i32_0 = arith.constant 0 : i32
    return %c0_i32, %arg1 : i32, i32
  }
  func.func @transform_3(%arg0: i32, %arg1: i32) -> (i32, i32) {
    %c0_i32 = arith.constant 0 : i32
    return %arg0, %arg1 : i32, i32
  }
}

module attributes {stable_mosaic.version = 11 : i64} {
  func.func @_fused_linear_kernel(%arg0: i32, %arg1: i32, %arg2: memref<16x64xbf16, #tpu.memory_space<vmem>>, %arg3: memref<64x32xbf16, #tpu.memory_space<vmem>>, %arg4: memref<16x32xf32, #tpu.memory_space<vmem>>, %arg5: memref<16x32xf32, #tpu.memory_space<vmem>>) attributes {dimension_semantics = [#tpu.dimension_semantics<parallel>, #tpu.dimension_semantics<parallel>], iteration_bounds = array<i64: 1, 1>, scalar_prefetch = 0 : i64, scratch_operands = 0 : i64, tpu.core_type = #tpu.core_type<tc>, window_params = [{transform_indices = @transform_0, window_bounds = array<i64: 16, 64>}, {transform_indices = @transform_1, window_bounds = array<i64: 64, 32>}, {transform_indices = @transform_2, window_bounds = array<i64: 16, 32>}, {transform_indices = @transform_3, window_bounds = array<i64: 16, 32>}]} {
    %c0 = arith.constant 0 : index
    %c0_0 = arith.constant 0 : index
    %0 = vector.load %arg2[%c0, %c0_0] : memref<16x64xbf16, #tpu.memory_space<vmem>>, vector<16x64xbf16>
    %c0_1 = arith.constant 0 : index
    %c0_2 = arith.constant 0 : index
    %1 = vector.load %arg3[%c0_1, %c0_2] : memref<64x32xbf16, #tpu.memory_space<vmem>>, vector<64x32xbf16>
    %cst = arith.constant dense<0.000000e+00> : vector<16x32xf32>
    %2 = tpu.matmul %0, %1, %cst {dimension_numbers = #tpu.dot_dimension_numbers<[1], [0], [0], [1], [0, 0, 1, 1], [], []>} : vector<16x64xbf16>, vector<64x32xbf16>, vector<16x32xf32> -> vector<16x32xf32>
    %3 = arith.negf %2 : vector<16x32xf32>
    %4 = math.exp %3 : vector<16x32xf32>
    %cst_3 = arith.constant 1.000000e+00 : f32
    %5 = vector.broadcast %cst_3 : f32 to vector<16x32xf32>
    %6 = arith.addf %5, %4 : vector<16x32xf32>
    %7 = arith.divf %5, %6 : vector<16x32xf32>
    %8 = arith.mulf %2, %7 : vector<16x32xf32>
    %c0_4 = arith.constant 0 : index
    %c0_5 = arith.constant 0 : index
    %9 = vector.load %arg4[%c0_4, %c0_5] : memref<16x32xf32, #tpu.memory_space<vmem>>, vector<16x32xf32>
    %10 = arith.addf %8, %9 : vector<16x32xf32>
    %c0_6 = arith.constant 0 : index
    %c0_7 = arith.constant 0 : index
    %11 = vector.load %arg5[%c0_6, %c0_7] : memref<16x32xf32, #tpu.memory_space<vmem>>, vector<16x32xf32>
    tpu.vector_store %arg5[%c0_6, %c0_7], %10 {strides = array<i32>} : memref<16x32xf32, #tpu.memory_space<vmem>>, vector<16x32xf32>,
    return
  }
  func.func @transform_0(%arg0: i32, %arg1: i32) -> (i32, i32) {
    %c0_i32 = arith.constant 0 : i32
    %c0_i32_0 = arith.constant 0 : i32
    return %arg0, %c0_i32 : i32, i32
  }
  func.func @transform_1(%arg0: i32, %arg1: i32) -> (i32, i32) {
    %c0_i32 = arith.constant 0 : i32
    %c0_i32_0 = arith.constant 0 : i32
    return %c0_i32, %arg1 : i32, i32
  }
  func.func @transform_2(%arg0: i32, %arg1: i32) -> (i32, i32) {
    %c0_i32 = arith.constant 0 : i32
    return %arg0, %arg1 : i32, i32
  }
  func.func @transform_3(%arg0: i32, %arg1: i32) -> (i32, i32) {
    %c0_i32 = arith.constant 0 : i32
    return %arg0, %arg1 : i32, i32
  }
}

module attributes {stable_mosaic.version = 11 : i64} {
  func.func @_fused_linear_kernel(%arg0: i32, %arg1: i32, %arg2: memref<16x32xf32, #tpu.memory_space<vmem>>, %arg3: memref<32x64xbf16, #tpu.memory_space<vmem>>, %arg4: memref<1x32xf32, #tpu.memory_space<vmem>>, %arg5: memref<16x64xbf16, #tpu.memory_space<vmem>>, %arg6: memref<16x32xbf16, #tpu.memory_space<vmem>>) attributes {dimension_semantics = [#tpu.dimension_semantics<parallel>, #tpu.dimension_semantics<arbitrary>], iteration_bounds = array<i64: 1, 1>, scalar_prefetch = 0 : i64, scratch_operands = 1 : i64, tpu.core_type = #tpu.core_type<tc>, window_params = [{transform_indices = @transform_0, window_bounds = array<i64: 16, 32>}, {transform_indices = @transform_1, window_bounds = array<i64: 32, 64>}, {pipeline_mode = #tpu.pipeline_mode<synchronous>, transform_indices = @transform_2, window_bounds = array<i64: 1, 32>}, {transform_indices = @transform_3, window_bounds = array<i64: 16, 64>}]} {
    %c0_i32 = arith.constant 0 : i32
    %0 = arith.cmpi eq, %arg1, %c0_i32 : i32
    %1 = arith.extui %0 : i1 to i32
    %c0_i32_0 = arith.constant 0 : i32
    %2 = arith.cmpi ne, %1, %c0_i32_0 : i32
    scf.if %2 {
      %c0_7 = arith.constant 0 : index
      %c0_8 = arith.constant 0 : index
      %14 = vector.load %arg2[%c0_7, %c0_8] : memref<16x32xf32, #tpu.memory_space<vmem>>, vector<16x32xf32>
      %15 = arith.mulf %14, %14 : vector<16x32xf32>
      %cst_9 = arith.constant dense<0.000000e+00> : vector<16xf32>
      %16 = vector.multi_reduction <add>, %15, %cst_9 [1] : vector<16x32xf32> to vector<16xf32>
      %17 = vector.shape_cast %16 : vector<16xf32> to vector<16x1xf32>
      %cst_10 = arith.constant 3.200000e+01 : f32
      %18 = vector.broadcast %cst_10 : f32 to vector<16x1xf32>
      %19 = arith.divf %17, %18 : vector<16x1xf32>
      %cst_11 = arith.constant 9.99999997E-7 : f32
      %20 = vector.broadcast %cst_11 : f32 to vector<16x1xf32>
      %21 = arith.addf %19, %20 : vector<16x1xf32>
      %22 = math.rsqrt %21 : vector<16x1xf32>
      %23 = vector.broadcast %22 : vector<16x1xf32> to vector<16x32xf32>
      %24 = arith.mulf %14, %23 : vector<16x32xf32>
      %c0_12 = arith.constant 0 : index
      %c0_13 = arith.constant 0 : index
      %25 = vector.load %arg4[%c0_12, %c0_13] : memref<1x32xf32, #tpu.memory_space<vmem>>, vector<1x32xf32>
      %26 = vector.broadcast %25 : vector<1x32xf32> to vector<16x32xf32>
      %27 = arith.mulf %24, %26 : vector<16x32xf32>
      %28 = arith.truncf %27 : vector<16x32xf32> to vector<16x32xbf16>
      %c0_14 = arith.constant 0 : index
      %c0_15 = arith.constant 0 : index
      %29 = vector.load %arg6[%c0_14, %c0_15] : memref<16x32xbf16, #tpu.memory_space<vmem>>, vector<16x32xbf16>
      tpu.vector_store %arg6[%c0_14, %c0_15], %28 {strides = array<i32>} : memref<16x32xbf16, #tpu.memory_space<vmem>>, vector<16x32xbf16>,
    } else {
    }
    %c0 = arith.constant 0 : index
    %c0_1 = arith.constant 0 : index
    %3 = vector.load %arg6[%c0, %c0_1] : memref<16x32xbf16, #tpu.memory_space<vmem>>, vector<16x32xbf16>
    %c0_2 = arith.constant 0 : index
    %c0_3 = arith.constant 0 : index
    %4 = vector.load %arg3[%c0_2, %c0_3] : memref<32x64xbf16, #tpu.memory_space<vmem>>, vector<32x64xbf16>
    %cst = arith.constant dense<0.000000e+00> : vector<16x64xf32>
    %5 = tpu.matmul %3, %4, %cst {dimension_numbers = #tpu.dot_dimension_numbers<[1], [0], [0], [1], [0, 0, 1, 1], [], []>} : vector<16x32xbf16>, vector<32x64xbf16>, vector<16x64xf32> -> vector<16x64xf32>
    %6 = arith.negf %5 : vector<16x64xf32>
    %7 = math.exp %6 : vector<16x64xf32>
    %cst_4 = arith.constant 1.000000e+00 : f32
    %8 = vector.broadcast %cst_4 : f32 to vector<16x64xf32>
    %9 = arith.addf %8, %7 : vector<16x64xf32>
    %10 = arith.divf %8, %9 : vector<16x64xf32>
    %11 = arith.mulf %5, %10 : vector<16x64xf32>
    %12 = arith.truncf %11 : vector<16x64xf32> to vector<16x64xbf16>
    %c0_5 = arith.constant 0 : index
    %c0_6 = arith.constant 0 : index
    %13 = vector.load %arg5[%c0_5, %c0_6] : memref<16x64xbf16, #tpu.memory_space<vmem>>, vector<16x64xbf16>
    tpu.vector_store %arg5[%c0_5, %c0_6], %12 {strides = array<i32>} : memref<16x64xbf16, #tpu.memory_space<vmem>>, vector<16x64xbf16>,
    return
  }
  func.func @transform_0(%arg0: i32, %arg1: i32) -> (i32, i32) {
    %c0_i32 = arith.constant 0 : i32
    %c0_i32_0 = arith.constant 0 : i32
    return %arg0, %c0_i32 : i32, i32
  }
  func.func @transform_1(%arg0: i32, %arg1: i32) -> (i32, i32) {
    %c0_i32 = arith.constant 0 : i32
    %c0_i32_0 = arith.constant 0 : i32
    return %c0_i32, %arg1 : i32, i32
  }
  func.func @transform_2(%arg0: i32, %arg1: i32) -> (i32, i32) {
    %c0_i32 = arith.constant 0 : i32
    %c0_i32_0 = arith.constant 0 : i32
    %c0_i32_1 = arith.constant 0 : i32
    return %c0_i32, %c0_i32_0 : i32, i32
  }
  func.func @transform_3(%arg0: i32, %arg1: i32) -> (i32, i32) {
    %c0_i32 = arith.constant 0 : i32
    return %arg0, %arg1 : i32, i32
  }
}

module attributes {stable_mosaic.version = 11 : i64} {
  func.func @_logits_lse_kernel(%arg0: i32, %arg1: i32, %arg2: memref<16x32xf32, #tpu.memory_space<vmem>>, %arg3: memref<32x128xbf16, #tpu.memory_space<vmem>>, %arg4: memref<16x1xf32, #tpu.memory_space<vmem>>, %arg5: memref<16x1xf32, #tpu.memory_space<vmem>>, %arg6: memref<16x1xf32, #tpu.memory_space<vmem>>) attributes {dimension_semantics = [#tpu.dimension_semantics<parallel>, #tpu.dimension_semantics<arbitrary>], iteration_bounds = array<i64: 1, 1>, scalar_prefetch = 0 : i64, scratch_operands = 2 : i64, tpu.core_type = #tpu.core_type<tc>, window_params = [{transform_indices = @transform_0, window_bounds = array<i64: 16, 32>}, {transform_indices = @transform_1, window_bounds = array<i64: 32, 128>}, {transform_indices = @transform_2, window_bounds = array<i64: 16, 1>}]} {
    %c0_i32 = arith.constant 0 : i32
    %0 = arith.cmpi eq, %arg1, %c0_i32 : i32
    %1 = arith.extui %0 : i1 to i32
    %c0_i32_0 = arith.constant 0 : i32
    %2 = arith.cmpi ne, %1, %c0_i32_0 : i32
    scf.if %2 {
      %cst_16 = arith.constant 0xFF800000 : f32
      %26 = vector.broadcast %cst_16 : f32 to vector<16x1xf32>
      %c0_17 = arith.constant 0 : index
      %c0_18 = arith.constant 0 : index
      %27 = vector.load %arg5[%c0_17, %c0_18] : memref<16x1xf32, #tpu.memory_space<vmem>>, vector<16x1xf32>
      tpu.vector_store %arg5[%c0_17, %c0_18], %26 {strides = array<i32>} : memref<16x1xf32, #tpu.memory_space<vmem>>, vector<16x1xf32>,
      %cst_19 = arith.constant 0.000000e+00 : f32
      %28 = vector.broadcast %cst_19 : f32 to vector<16x1xf32>
      %c0_20 = arith.constant 0 : index
      %c0_21 = arith.constant 0 : index
      %29 = vector.load %arg6[%c0_20, %c0_21] : memref<16x1xf32, #tpu.memory_space<vmem>>, vector<16x1xf32>
      tpu.vector_store %arg6[%c0_20, %c0_21], %28 {strides = array<i32>} : memref<16x1xf32, #tpu.memory_space<vmem>>, vector<16x1xf32>,
    } else {
    }
    %c0 = arith.constant 0 : index
    %c0_1 = arith.constant 0 : index
    %3 = vector.load %arg2[%c0, %c0_1] : memref<16x32xf32, #tpu.memory_space<vmem>>, vector<16x32xf32>
    %4 = arith.truncf %3 : vector<16x32xf32> to vector<16x32xbf16>
    %c0_2 = arith.constant 0 : index
    %c0_3 = arith.constant 0 : index
    %5 = vector.load %arg3[%c0_2, %c0_3] : memref<32x128xbf16, #tpu.memory_space<vmem>>, vector<32x128xbf16>
    %cst = arith.constant dense<0.000000e+00> : vector<16x128xf32>
    %6 = tpu.matmul %4, %5, %cst {dimension_numbers = #tpu.dot_dimension_numbers<[1], [0], [0], [1], [0, 0, 1, 1], [], []>} : vector<16x32xbf16>, vector<32x128xbf16>, vector<16x128xf32> -> vector<16x128xf32>
    %c0_4 = arith.constant 0 : index
    %c0_5 = arith.constant 0 : index
    %7 = vector.load %arg5[%c0_4, %c0_5] : memref<16x1xf32, #tpu.memory_space<vmem>>, vector<16x1xf32>
    %cst_6 = arith.constant dense<0xFF800000> : vector<16xf32>
    %8 = vector.multi_reduction <maximumf>, %6, %cst_6 [1] : vector<16x128xf32> to vector<16xf32>
    %9 = vector.shape_cast %8 : vector<16xf32> to vector<16x1xf32>
    %10 = arith.maximumf %7, %9 : vector<16x1xf32>
    %c0_7 = arith.constant 0 : index
    %c0_8 = arith.constant 0 : index
    %11 = vector.load %arg6[%c0_7, %c0_8] : memref<16x1xf32, #tpu.memory_space<vmem>>, vector<16x1xf32>
    %12 = arith.subf %7, %10 : vector<16x1xf32>
    %13 = math.exp %12 : vector<16x1xf32>
    %14 = arith.mulf %11, %13 : vector<16x1xf32>
    %15 = vector.broadcast %10 : vector<16x1xf32> to vector<16x128xf32>
    %16 = arith.subf %6, %15 : vector<16x128xf32>
    %17 = math.exp %16 : vector<16x128xf32>
    %cst_9 = arith.constant dense<0.000000e+00> : vector<16xf32>
    %18 = vector.multi_reduction <add>, %17, %cst_9 [1] : vector<16x128xf32> to vector<16xf32>
    %19 = vector.shape_cast %18 : vector<16xf32> to vector<16x1xf32>
    %20 = arith.addf %14, %19 : vector<16x1xf32>
    %c0_10 = arith.constant 0 : index
    %c0_11 = arith.constant 0 : index
    %21 = vector.load %arg6[%c0_10, %c0_11] : memref<16x1xf32, #tpu.memory_space<vmem>>, vector<16x1xf32>
    tpu.vector_store %arg6[%c0_10, %c0_11], %20 {strides = array<i32>} : memref<16x1xf32, #tpu.memory_space<vmem>>, vector<16x1xf32>,
    %c0_12 = arith.constant 0 : index
    %c0_13 = arith.constant 0 : index
    %22 = vector.load %arg5[%c0_12, %c0_13] : memref<16x1xf32, #tpu.memory_space<vmem>>, vector<16x1xf32>
    tpu.vector_store %arg5[%c0_12, %c0_13], %10 {strides = array<i32>} : memref<16x1xf32, #tpu.memory_space<vmem>>, vector<16x1xf32>,
    %c0_i32_14 = arith.constant 0 : i32
    %23 = arith.cmpi eq, %arg1, %c0_i32_14 : i32
    %24 = arith.extui %23 : i1 to i32
    %c0_i32_15 = arith.constant 0 : i32
    %25 = arith.cmpi ne, %24, %c0_i32_15 : i32
    scf.if %25 {
      %c0_16 = arith.constant 0 : index
      %c0_17 = arith.constant 0 : index
      %26 = vector.load %arg5[%c0_16, %c0_17] : memref<16x1xf32, #tpu.memory_space<vmem>>, vector<16x1xf32>
      %c0_18 = arith.constant 0 : index
      %c0_19 = arith.constant 0 : index
      %27 = vector.load %arg6[%c0_18, %c0_19] : memref<16x1xf32, #tpu.memory_space<vmem>>, vector<16x1xf32>
      %28 = math.log %27 : vector<16x1xf32>
      %29 = arith.addf %26, %28 : vector<16x1xf32>
      %c0_20 = arith.constant 0 : index
      %c0_21 = arith.constant 0 : index
      %30 = vector.load %arg4[%c0_20, %c0_21] : memref<16x1xf32, #tpu.memory_space<vmem>>, vector<16x1xf32>
      tpu.vector_store %arg4[%c0_20, %c0_21], %29 {strides = array<i32>} : memref<16x1xf32, #tpu.memory_space<vmem>>, vector<16x1xf32>,
    } else {
    }
    return
  }
  func.func @transform_0(%arg0: i32, %arg1: i32) -> (i32, i32) {
    %c0_i32 = arith.constant 0 : i32
    %c0_i32_0 = arith.constant 0 : i32
    return %arg0, %c0_i32 : i32, i32
  }
  func.func @transform_1(%arg0: i32, %arg1: i32) -> (i32, i32) {
    %c0_i32 = arith.constant 0 : i32
    %c0_i32_0 = arith.constant 0 : i32
    return %c0_i32, %arg1 : i32, i32
  }
  func.func @transform_2(%arg0: i32, %arg1: i32) -> (i32, i32) {
    %c0_i32 = arith.constant 0 : i32
    %c0_i32_0 = arith.constant 0 : i32
    return %arg0, %c0_i32 : i32, i32
  }
}

module attributes {stable_mosaic.version = 11 : i64} {
  func.func @_attn_kernel(%arg0: i32, %arg1: i32, %arg2: memref<1x8x32xbf16, #tpu.memory_space<vmem>>, %arg3: memref<1x32x32xbf16, #tpu.memory_space<vmem>>, %arg4: memref<1x32x32xbf16, #tpu.memory_space<vmem>>, %arg5: memref<8x32xf32, #tpu.memory_space<vmem>>, %arg6: memref<8x32xf32, #tpu.memory_space<vmem>>, %arg7: memref<32x32xf32, #tpu.memory_space<vmem>>, %arg8: memref<32x32xf32, #tpu.memory_space<vmem>>, %arg9: memref<1x8x32xbf16, #tpu.memory_space<vmem>>) attributes {dimension_semantics = [#tpu.dimension_semantics<parallel>, #tpu.dimension_semantics<parallel>], iteration_bounds = array<i64: 2, 1>, scalar_prefetch = 0 : i64, scratch_operands = 0 : i64, tpu.core_type = #tpu.core_type<tc>, window_params = [{transform_indices = @transform_0, window_bounds = array<i64: 1, 8, 32>}, {transform_indices = @transform_1, window_bounds = array<i64: 1, 32, 32>}, {transform_indices = @transform_2, window_bounds = array<i64: 1, 32, 32>}, {pipeline_mode = #tpu.pipeline_mode<synchronous>, transform_indices = @transform_3, window_bounds = array<i64: 8, 32>}, {pipeline_mode = #tpu.pipeline_mode<synchronous>, transform_indices = @transform_4, window_bounds = array<i64: 8, 32>}, {pipeline_mode = #tpu.pipeline_mode<synchronous>, transform_indices = @transform_5, window_bounds = array<i64: 32, 32>}, {pipeline_mode = #tpu.pipeline_mode<synchronous>, transform_indices = @transform_6, window_bounds = array<i64: 32, 32>}, {transform_indices = @transform_7, window_bounds = array<i64: 1, 8, 32>}]} {
    %c8_i32 = arith.constant 8 : i32
    %0 = arith.muli %arg1, %c8_i32 : i32
    %1 = tpu.assume_multiple %0, 8 : i32
    %2 = arith.index_cast %1 : i32 to index
    %c0 = arith.constant 0 : index
    %3 = vector.load %arg5[%2, %c0] : memref<8x32xf32, #tpu.memory_space<vmem>>, vector<8x32xf32>
    %4 = arith.index_cast %1 : i32 to index
    %c0_0 = arith.constant 0 : index
    %5 = vector.load %arg6[%4, %c0_0] : memref<8x32xf32, #tpu.memory_space<vmem>>, vector<8x32xf32>
    %c0_1 = arith.constant 0 : index
    %c0_2 = arith.constant 0 : index
    %c0_3 = arith.constant 0 : index
    %6 = vector.load %arg2[%c0_1, %c0_2, %c0_3] : memref<1x8x32xbf16, #tpu.memory_space<vmem>>, vector<1x8x32xbf16>
    %7 = vector.shape_cast %6 : vector<1x8x32xbf16> to vector<8x32xbf16>
    %8 = arith.extf %7 : vector<8x32xbf16> to vector<8x32xf32>
    %9 = tpu.iota {dimensions = array<i32: 1>} : vector<8x32xi32>
    %c2_i32 = arith.constant 2 : i32
    %c0_i32 = arith.constant 0 : i32
    %10 = arith.cmpi eq, %c2_i32, %c0_i32 : i32
    %c1_i32 = arith.constant 1 : i32
    %11 = arith.select %10, %c1_i32, %c2_i32 : i32
    %12 = vector.broadcast %11 : i32 to vector<8x32xi32>
    %13 = arith.remsi %9, %12 : vector<8x32xi32>
    %c0_i32_4 = arith.constant 0 : i32
    %14 = vector.broadcast %c0_i32_4 : i32 to vector<8x32xi32>
    %15 = arith.cmpi ne, %13, %14 : vector<8x32xi32>
    %c0_i32_5 = arith.constant 0 : i32
    %16 = vector.broadcast %c0_i32_5 : i32 to vector<8x32xi32>
    %17 = arith.cmpi slt, %13, %16 : vector<8x32xi32>
    %c0_i32_6 = arith.constant 0 : i32
    %18 = arith.cmpi slt, %11, %c0_i32_6 : i32
    %19 = vector.broadcast %18 : i1 to vector<8x32xi1>
    %20 = vector.broadcast %19 : vector<8x32xi1> to vector<8x32xi1>
    %21 = arith.xori %17, %20 : vector<8x32xi1>
    %22 = arith.andi %21, %15 : vector<8x32xi1>
    %23 = vector.broadcast %11 : i32 to vector<8x32xi32>
    %24 = arith.addi %13, %23 : vector<8x32xi32>
    %25 = arith.select %22, %24, %13 : vector<8x32xi1>, vector<8x32xi32>
    %c0_i32_7 = arith.constant 0 : i32
    %26 = vector.broadcast %c0_i32_7 : i32 to vector<8x32xi32>
    %27 = arith.cmpi eq, %25, %26 : vector<8x32xi32>
    %28 = vector.extract_strided_slice %8 {offsets = [0, 1], sizes = [8, 31], strides = [1, 1]} : vector<8x32xf32> to vector<8x31xf32>
    %29 = vector.extract_strided_slice %8 {offsets = [0, 0], sizes = [8, 1], strides = [1, 1]} : vector<8x32xf32> to vector<8x1xf32>
    %30 = tpu.concatenate %28, %29 in 1 : vector<8x31xf32>, vector<8x1xf32> -> vector<8x32xf32>
    %31 = vector.extract_strided_slice %8 {offsets = [0, 31], sizes = [8, 1], strides = [1, 1]} : vector<8x32xf32> to vector<8x1xf32>
    %32 = vector.extract_strided_slice %8 {offsets = [0, 0], sizes = [8, 31], strides = [1, 1]} : vector<8x32xf32> to vector<8x31xf32>
    %33 = tpu.concatenate %31, %32 in 1 : vector<8x1xf32>, vector<8x31xf32> -> vector<8x32xf32>
    %34 = arith.select %27, %30, %33 : vector<8x32xi1>, vector<8x32xf32>
    %35 = arith.mulf %8, %3 : vector<8x32xf32>
    %36 = arith.mulf %34, %5 : vector<8x32xf32>
    %37 = arith.addf %35, %36 : vector<8x32xf32>
    %cst = arith.constant 0.353553385 : f32
    %38 = vector.broadcast %cst : f32 to vector<8x32xf32>
    %39 = arith.mulf %37, %38 : vector<8x32xf32>
    %c0_8 = arith.constant 0 : index
    %c0_9 = arith.constant 0 : index
    %c0_10 = arith.constant 0 : index
    %40 = vector.load %arg3[%c0_8, %c0_9, %c0_10] : memref<1x32x32xbf16, #tpu.memory_space<vmem>>, vector<1x32x32xbf16>
    %41 = vector.shape_cast %40 : vector<1x32x32xbf16> to vector<32x32xbf16>
    %42 = arith.extf %41 : vector<32x32xbf16> to vector<32x32xf32>
    %c0_11 = arith.constant 0 : index
    %c0_12 = arith.constant 0 : index
    %43 = vector.load %arg7[%c0_11, %c0_12] : memref<32x32xf32, #tpu.memory_space<vmem>>, vector<32x32xf32>
    %c0_13 = arith.constant 0 : index
    %c0_14 = arith.constant 0 : index
    %44 = vector.load %arg8[%c0_13, %c0_14] : memref<32x32xf32, #tpu.memory_space<vmem>>, vector<32x32xf32>
    %45 = tpu.iota {dimensions = array<i32: 1>} : vector<32x32xi32>
    %c2_i32_15 = arith.constant 2 : i32
    %c0_i32_16 = arith.constant 0 : i32
    %46 = arith.cmpi eq, %c2_i32_15, %c0_i32_16 : i32
    %c1_i32_17 = arith.constant 1 : i32
    %47 = arith.select %46, %c1_i32_17, %c2_i32_15 : i32
    %48 = vector.broadcast %47 : i32 to vector<32x32xi32>
    %49 = arith.remsi %45, %48 : vector<32x32xi32>
    %c0_i32_18 = arith.constant 0 : i32
    %50 = vector.broadcast %c0_i32_18 : i32 to vector<32x32xi32>
    %51 = arith.cmpi ne, %49, %50 : vector<32x32xi32>
    %c0_i32_19 = arith.constant 0 : i32
    %52 = vector.broadcast %c0_i32_19 : i32 to vector<32x32xi32>
    %53 = arith.cmpi slt, %49, %52 : vector<32x32xi32>
    %c0_i32_20 = arith.constant 0 : i32
    %54 = arith.cmpi slt, %47, %c0_i32_20 : i32
    %55 = vector.broadcast %54 : i1 to vector<32x32xi1>
    %56 = vector.broadcast %55 : vector<32x32xi1> to vector<32x32xi1>
    %57 = arith.xori %53, %56 : vector<32x32xi1>
    %58 = arith.andi %57, %51 : vector<32x32xi1>
    %59 = vector.broadcast %47 : i32 to vector<32x32xi32>
    %60 = arith.addi %49, %59 : vector<32x32xi32>
    %61 = arith.select %58, %60, %49 : vector<32x32xi1>, vector<32x32xi32>
    %c0_i32_21 = arith.constant 0 : i32
    %62 = vector.broadcast %c0_i32_21 : i32 to vector<32x32xi32>
    %63 = arith.cmpi eq, %61, %62 : vector<32x32xi32>
    %64 = vector.extract_strided_slice %42 {offsets = [0, 1], sizes = [32, 31], strides = [1, 1]} : vector<32x32xf32> to vector<32x31xf32>
    %65 = vector.extract_strided_slice %42 {offsets = [0, 0], sizes = [32, 1], strides = [1, 1]} : vector<32x32xf32> to vector<32x1xf32>
    %66 = tpu.concatenate %64, %65 in 1 : vector<32x31xf32>, vector<32x1xf32> -> vector<32x32xf32>
    %67 = vector.extract_strided_slice %42 {offsets = [0, 31], sizes = [32, 1], strides = [1, 1]} : vector<32x32xf32> to vector<32x1xf32>
    %68 = vector.extract_strided_slice %42 {offsets = [0, 0], sizes = [32, 31], strides = [1, 1]} : vector<32x32xf32> to vector<32x31xf32>
    %69 = tpu.concatenate %67, %68 in 1 : vector<32x1xf32>, vector<32x31xf32> -> vector<32x32xf32>
    %70 = arith.select %63, %66, %69 : vector<32x32xi1>, vector<32x32xf32>
    %71 = arith.mulf %42, %43 : vector<32x32xf32>
    %72 = arith.mulf %70, %44 : vector<32x32xf32>
    %73 = arith.addf %71, %72 : vector<32x32xf32>
    %74 = arith.truncf %39 : vector<8x32xf32> to vector<8x32xbf16>
    %75 = arith.truncf %73 : vector<32x32xf32> to vector<32x32xbf16>
    %c0_22 = arith.constant 0 : index
    %c0_23 = arith.constant 0 : index
    %c0_24 = arith.constant 0 : index
    %76 = vector.load %arg4[%c0_22, %c0_23, %c0_24] : memref<1x32x32xbf16, #tpu.memory_space<vmem>>, vector<1x32x32xbf16>
    %77 = vector.shape_cast %76 : vector<1x32x32xbf16> to vector<32x32xbf16>
    %78 = vector.extract_strided_slice %74 {offsets = [0, 0], sizes = [8, 8], strides = [1, 1]} : vector<8x32xbf16> to vector<8x8xbf16>
    %79 = vector.extract_strided_slice %75 {offsets = [0, 0], sizes = [32, 8], strides = [1, 1]} : vector<32x32xbf16> to vector<32x8xbf16>
    %cst_25 = arith.constant dense<0.000000e+00> : vector<8x32xf32>
    %80 = tpu.matmul %78, %79, %cst_25 {dimension_numbers = #tpu.dot_dimension_numbers<[1], [1], [0], [0], [0, 0, 1, 0], [], []>} : vector<8x8xbf16>, vector<32x8xbf16>, vector<8x32xf32> -> vector<8x32xf32>
    %cst_26 = arith.constant dense<0xFF800000> : vector<8xf32>
    %81 = vector.multi_reduction <maximumf>, %80, %cst_26 [1] : vector<8x32xf32> to vector<8xf32>
    %82 = vector.shape_cast %81 : vector<8xf32> to vector<8x1xf32>
    %83 = vector.broadcast %82 : vector<8x1xf32> to vector<8x32xf32>
    %84 = arith.subf %80, %83 : vector<8x32xf32>
    %85 = math.exp %84 : vector<8x32xf32>
    %cst_27 = arith.constant dense<0.000000e+00> : vector<8xf32>
    %86 = vector.multi_reduction <add>, %85, %cst_27 [1] : vector<8x32xf32> to vector<8xf32>
    %87 = vector.shape_cast %86 : vector<8xf32> to vector<8x1xf32>
    %88 = tpu.reciprocal %87 {approx = true} : vector<8x1xf32> -> vector<8x1xf32>
    %89 = vector.broadcast %88 : vector<8x1xf32> to vector<8x32xf32>
    %90 = arith.mulf %85, %89 : vector<8x32xf32>
    %91 = arith.truncf %90 : vector<8x32xf32> to vector<8x32xbf16>
    %92 = vector.extract_strided_slice %77 {offsets = [0, 0], sizes = [32, 8], strides = [1, 1]} : vector<32x32xbf16> to vector<32x8xbf16>
    %cst_28 = arith.constant dense<0.000000e+00> : vector<8x8xf32>
    %93 = tpu.matmul %91, %92, %cst_28 {dimension_numbers = #tpu.dot_dimension_numbers<[1], [0], [0], [1], [0, 0, 1, 1], [], []>} : vector<8x32xbf16>, vector<32x8xbf16>, vector<8x8xf32> -> vector<8x8xf32>
    %94 = vector.extract_strided_slice %74 {offsets = [0, 8], sizes = [8, 8], strides = [1, 1]} : vector<8x32xbf16> to vector<8x8xbf16>
    %95 = vector.extract_strided_slice %75 {offsets = [0, 8], sizes = [32, 8], strides = [1, 1]} : vector<32x32xbf16> to vector<32x8xbf16>
    %cst_29 = arith.constant dense<0.000000e+00> : vector<8x32xf32>
    %96 = tpu.matmul %94, %95, %cst_29 {dimension_numbers = #tpu.dot_dimension_numbers<[1], [1], [0], [0], [0, 0, 1, 0], [], []>} : vector<8x8xbf16>, vector<32x8xbf16>, vector<8x32xf32> -> vector<8x32xf32>
    %cst_30 = arith.constant dense<0xFF800000> : vector<8xf32>
    %97 = vector.multi_reduction <maximumf>, %96, %cst_30 [1] : vector<8x32xf32> to vector<8xf32>
    %98 = vector.shape_cast %97 : vector<8xf32> to vector<8x1xf32>
    %99 = vector.broadcast %98 : vector<8x1xf32> to vector<8x32xf32>
    %100 = arith.subf %96, %99 : vector<8x32xf32>
    %101 = math.exp %100 : vector<8x32xf32>
    %cst_31 = arith.constant dense<0.000000e+00> : vector<8xf32>
    %102 = vector.multi_reduction <add>, %101, %cst_31 [1] : vector<8x32xf32> to vector<8xf32>
    %103 = vector.shape_cast %102 : vector<8xf32> to vector<8x1xf32>
    %104 = tpu.reciprocal %103 {approx = true} : vector<8x1xf32> -> vector<8x1xf32>
    %105 = vector.broadcast %104 : vector<8x1xf32> to vector<8x32xf32>
    %106 = arith.mulf %101, %105 : vector<8x32xf32>
    %107 = arith.truncf %106 : vector<8x32xf32> to vector<8x32xbf16>
    %108 = vector.extract_strided_slice %77 {offsets = [0, 8], sizes = [32, 8], strides = [1, 1]} : vector<32x32xbf16> to vector<32x8xbf16>
    %cst_32 = arith.constant dense<0.000000e+00> : vector<8x8xf32>
    %109 = tpu.matmul %107, %108, %cst_32 {dimension_numbers = #tpu.dot_dimension_numbers<[1], [0], [0], [1], [0, 0, 1, 1], [], []>} : vector<8x32xbf16>, vector<32x8xbf16>, vector<8x8xf32> -> vector<8x8xf32>
    %110 = tpu.concatenate %93, %109 in 1 : vector<8x8xf32>, vector<8x8xf32> -> vector<8x16xf32>
    %111 = arith.truncf %110 : vector<8x16xf32> to vector<8x16xbf16>
    %c0_33 = arith.constant 0 : index
    %c0_34 = arith.constant 0 : index
    %c0_35 = arith.constant 0 : index
    %112 = vector.load %arg9[%c0_33, %c0_34, %c0_35] : memref<1x8x32xbf16, #tpu.memory_space<vmem>>, vector<1x8x16xbf16>
    %113 = vector.shape_cast %112 : vector<1x8x16xbf16> to vector<8x16xbf16>
    %114 = vector.shape_cast %111 : vector<8x16xbf16> to vector<1x8x16xbf16>
    tpu.vector_store %arg9[%c0_33, %c0_34, %c0_35], %114 {strides = array<i32>} : memref<1x8x32xbf16, #tpu.memory_space<vmem>>, vector<1x8x16xbf16>,
    %115 = vector.extract_strided_slice %74 {offsets = [0, 16], sizes = [8, 8], strides = [1, 1]} : vector<8x32xbf16> to vector<8x8xbf16>
    %116 = vector.extract_strided_slice %75 {offsets = [0, 16], sizes = [32, 8], strides = [1, 1]} : vector<32x32xbf16> to vector<32x8xbf16>
    %cst_36 = arith.constant dense<0.000000e+00> : vector<8x32xf32>
    %117 = tpu.matmul %115, %116, %cst_36 {dimension_numbers = #tpu.dot_dimension_numbers<[1], [1], [0], [0], [0, 0, 1, 0], [], []>} : vector<8x8xbf16>, vector<32x8xbf16>, vector<8x32xf32> -> vector<8x32xf32>
    %cst_37 = arith.constant dense<0xFF800000> : vector<8xf32>
    %118 = vector.multi_reduction <maximumf>, %117, %cst_37 [1] : vector<8x32xf32> to vector<8xf32>
    %119 = vector.shape_cast %118 : vector<8xf32> to vector<8x1xf32>
    %120 = vector.broadcast %119 : vector<8x1xf32> to vector<8x32xf32>
    %121 = arith.subf %117, %120 : vector<8x32xf32>
    %122 = math.exp %121 : vector<8x32xf32>
    %cst_38 = arith.constant dense<0.000000e+00> : vector<8xf32>
    %123 = vector.multi_reduction <add>, %122, %cst_38 [1] : vector<8x32xf32> to vector<8xf32>
    %124 = vector.shape_cast %123 : vector<8xf32> to vector<8x1xf32>
    %125 = tpu.reciprocal %124 {approx = true} : vector<8x1xf32> -> vector<8x1xf32>
    %126 = vector.broadcast %125 : vector<8x1xf32> to vector<8x32xf32>
    %127 = arith.mulf %122, %126 : vector<8x32xf32>
    %128 = arith.truncf %127 : vector<8x32xf32> to vector<8x32xbf16>
    %129 = vector.extract_strided_slice %77 {offsets = [0, 16], sizes = [32, 8], strides = [1, 1]} : vector<32x32xbf16> to vector<32x8xbf16>
    %cst_39 = arith.constant dense<0.000000e+00> : vector<8x8xf32>
    %130 = tpu.matmul %128, %129, %cst_39 {dimension_numbers = #tpu.dot_dimension_numbers<[1], [0], [0], [1], [0, 0, 1, 1], [], []>} : vector<8x32xbf16>, vector<32x8xbf16>, vector<8x8xf32> -> vector<8x8xf32>
    %131 = vector.extract_strided_slice %74 {offsets = [0, 24], sizes = [8, 8], strides = [1, 1]} : vector<8x32xbf16> to vector<8x8xbf16>
    %132 = vector.extract_strided_slice %75 {offsets = [0, 24], sizes = [32, 8], strides = [1, 1]} : vector<32x32xbf16> to vector<32x8xbf16>
    %cst_40 = arith.constant dense<0.000000e+00> : vector<8x32xf32>
    %133 = tpu.matmul %131, %132, %cst_40 {dimension_numbers = #tpu.dot_dimension_numbers<[1], [1], [0], [0], [0, 0, 1, 0], [], []>} : vector<8x8xbf16>, vector<32x8xbf16>, vector<8x32xf32> -> vector<8x32xf32>
    %cst_41 = arith.constant dense<0xFF800000> : vector<8xf32>
    %134 = vector.multi_reduction <maximumf>, %133, %cst_41 [1] : vector<8x32xf32> to vector<8xf32>
    %135 = vector.shape_cast %134 : vector<8xf32> to vector<8x1xf32>
    %136 = vector.broadcast %135 : vector<8x1xf32> to vector<8x32xf32>
    %137 = arith.subf %133, %136 : vector<8x32xf32>
    %138 = math.exp %137 : vector<8x32xf32>
    %cst_42 = arith.constant dense<0.000000e+00> : vector<8xf32>
    %139 = vector.multi_reduction <add>, %138, %cst_42 [1] : vector<8x32xf32> to vector<8xf32>
    %140 = vector.shape_cast %139 : vector<8xf32> to vector<8x1xf32>
    %141 = tpu.reciprocal %140 {approx = true} : vector<8x1xf32> -> vector<8x1xf32>
    %142 = vector.broadcast %141 : vector<8x1xf32> to vector<8x32xf32>
    %143 = arith.mulf %138, %142 : vector<8x32xf32>
    %144 = arith.truncf %143 : vector<8x32xf32> to vector<8x32xbf16>
    %145 = vector.extract_strided_slice %77 {offsets = [0, 24], sizes = [32, 8], strides = [1, 1]} : vector<32x32xbf16> to vector<32x8xbf16>
    %cst_43 = arith.constant dense<0.000000e+00> : vector<8x8xf32>
    %146 = tpu.matmul %144, %145, %cst_43 {dimension_numbers = #tpu.dot_dimension_numbers<[1], [0], [0], [1], [0, 0, 1, 1], [], []>} : vector<8x32xbf16>, vector<32x8xbf16>, vector<8x8xf32> -> vector<8x8xf32>
    %147 = tpu.concatenate %130, %146 in 1 : vector<8x8xf32>, vector<8x8xf32> -> vector<8x16xf32>
    %148 = arith.truncf %147 : vector<8x16xf32> to vector<8x16xbf16>
    %c0_44 = arith.constant 0 : index
    %c0_45 = arith.constant 0 : index
    %c16 = arith.constant 16 : index
    %149 = vector.load %arg9[%c0_44, %c0_45, %c16] : memref<1x8x32xbf16, #tpu.memory_space<vmem>>, vector<1x8x16xbf16>
    %150 = vector.shape_cast %149 : vector<1x8x16xbf16> to vector<8x16xbf16>
    %151 = vector.shape_cast %148 : vector<8x16xbf16> to vector<1x8x16xbf16>
    tpu.vector_store %arg9[%c0_44, %c0_45, %c16], %151 {strides = array<i32>} : memref<1x8x32xbf16, #tpu.memory_space<vmem>>, vector<1x8x16xbf16>,
    return
  }
  func.func @transform_0(%arg0: i32, %arg1: i32) -> (i32, i32, i32) {
    %c0_i32 = arith.constant 0 : i32
    %c0_i32_0 = arith.constant 0 : i32
    return %arg0, %arg1, %c0_i32 : i32, i32, i32
  }
  func.func @transform_1(%arg0: i32, %arg1: i32) -> (i32, i32, i32) {
    %c0_i32 = arith.constant 0 : i32
    %c0_i32_0 = arith.constant 0 : i32
    %c0_i32_1 = arith.constant 0 : i32
    return %arg0, %c0_i32, %c0_i32_0 : i32, i32, i32
  }
  func.func @transform_2(%arg0: i32, %arg1: i32) -> (i32, i32, i32) {
    %c0_i32 = arith.constant 0 : i32
    %c0_i32_0 = arith.constant 0 : i32
    %c0_i32_1 = arith.constant 0 : i32
    return %arg0, %c0_i32, %c0_i32_0 : i32, i32, i32
  }
  func.func @transform_3(%arg0: i32, %arg1: i32) -> (i32, i32) {
    %c0_i32 = arith.constant 0 : i32
    %c0_i32_0 = arith.constant 0 : i32
    %c0_i32_1 = arith.constant 0 : i32
    return %c0_i32, %c0_i32_0 : i32, i32
  }
  func.func @transform_4(%arg0: i32, %arg1: i32) -> (i32, i32) {
    %c0_i32 = arith.constant 0 : i32
    %c0_i32_0 = arith.constant 0 : i32
    %c0_i32_1 = arith.constant 0 : i32
    return %c0_i32, %c0_i32_0 : i32, i32
  }
  func.func @transform_5(%arg0: i32, %arg1: i32) -> (i32, i32) {
    %c0_i32 = arith.constant 0 : i32
    %c0_i32_0 = arith.constant 0 : i32
    %c0_i32_1 = arith.constant 0 : i32
    return %c0_i32, %c0_i32_0 : i32, i32
  }
  func.func @transform_6(%arg0: i32, %arg1: i32) -> (i32, i32) {
    %c0_i32 = arith.constant 0 : i32
    %c0_i32_0 = arith.constant 0 : i32
    %c0_i32_1 = arith.constant 0 : i32
    return %c0_i32, %c0_i32_0 : i32, i32
  }
  func.func @transform_7(%arg0: i32, %arg1: i32) -> (i32, i32, i32) {
    %c0_i32 = arith.constant 0 : i32
    %c0_i32_0 = arith.constant 0 : i32
    return %arg0, %arg1, %c0_i32 : i32, i32, i32
  }
}

module attributes {stable_mosaic.version = 11 : i64} {
  func.func @_vocab_probs_kernel(%arg0: i32, %arg1: i32, %arg2: memref<16x32xf32, #tpu.memory_space<vmem>>, %arg3: memref<32x128xbf16, #tpu.memory_space<vmem>>, %arg4: memref<16x1xf32, #tpu.memory_space<vmem>>, %arg5: memref<16x128xf32, #tpu.memory_space<vmem>>) attributes {dimension_semantics = [#tpu.dimension_semantics<parallel>, #tpu.dimension_semantics<parallel>], iteration_bounds = array<i64: 1, 1>, scalar_prefetch = 0 : i64, scratch_operands = 0 : i64, tpu.core_type = #tpu.core_type<tc>, window_params = [{transform_indices = @transform_0, window_bounds = array<i64: 16, 32>}, {transform_indices = @transform_1, window_bounds = array<i64: 32, 128>}, {transform_indices = @transform_2, window_bounds = array<i64: 16, 1>}, {transform_indices = @transform_3, window_bounds = array<i64: 16, 128>}]} {
    %c0 = arith.constant 0 : index
    %c0_0 = arith.constant 0 : index
    %0 = vector.load %arg2[%c0, %c0_0] : memref<16x32xf32, #tpu.memory_space<vmem>>, vector<16x32xf32>
    %1 = arith.truncf %0 : vector<16x32xf32> to vector<16x32xbf16>
    %c0_1 = arith.constant 0 : index
    %c0_2 = arith.constant 0 : index
    %2 = vector.load %arg3[%c0_1, %c0_2] : memref<32x128xbf16, #tpu.memory_space<vmem>>, vector<32x128xbf16>
    %cst = arith.constant dense<0.000000e+00> : vector<16x128xf32>
    %3 = tpu.matmul %1, %2, %cst {dimension_numbers = #tpu.dot_dimension_numbers<[1], [0], [0], [1], [0, 0, 1, 1], [], []>} : vector<16x32xbf16>, vector<32x128xbf16>, vector<16x128xf32> -> vector<16x128xf32>
    %c0_3 = arith.constant 0 : index
    %c0_4 = arith.constant 0 : index
    %4 = vector.load %arg4[%c0_3, %c0_4] : memref<16x1xf32, #tpu.memory_space<vmem>>, vector<16x1xf32>
    %5 = vector.broadcast %4 : vector<16x1xf32> to vector<16x128xf32>
    %6 = arith.subf %3, %5 : vector<16x128xf32>
    %7 = math.exp %6 : vector<16x128xf32>
    %c0_5 = arith.constant 0 : index
    %c0_6 = arith.constant 0 : index
    %8 = vector.load %arg5[%c0_5, %c0_6] : memref<16x128xf32, #tpu.memory_space<vmem>>, vector<16x128xf32>
    tpu.vector_store %arg5[%c0_5, %c0_6], %7 {strides = array<i32>} : memref<16x128xf32, #tpu.memory_space<vmem>>, vector<16x128xf32>,
    return
  }
  func.func @transform_0(%arg0: i32, %arg1: i32) -> (i32, i32) {
    %c0_i32 = arith.constant 0 : i32
    %c0_i32_0 = arith.constant 0 : i32
    return %arg0, %c0_i32 : i32, i32
  }
  func.func @transform_1(%arg0: i32, %arg1: i32) -> (i32, i32) {
    %c0_i32 = arith.constant 0 : i32
    %c0_i32_0 = arith.constant 0 : i32
    return %c0_i32, %arg1 : i32, i32
  }
  func.func @transform_2(%arg0: i32, %arg1: i32) -> (i32, i32) {
    %c0_i32 = arith.constant 0 : i32
    %c0_i32_0 = arith.constant 0 : i32
    return %arg0, %c0_i32 : i32, i32
  }
  func.func @transform_3(%arg0: i32, %arg1: i32) -> (i32, i32) {
    %c0_i32 = arith.constant 0 : i32
    return %arg0, %arg1 : i32, i32
  }
}

</mosaic_0001>

<bundles_post_ra>
// kernel: foundation_forward.26
= control target key start
LH: loop header
LB: loop body
LE: loop exit
PB: predicated region body
PF: predicated region fallthrough
CT: control target
= control target key end

     0   :  { %vm23_vm0 = vcmask 261120   ;;  %v154_v7 = vmov 0.0   ;;  %vm155_vm1 = vmmov 0   ;;  %vm120_vm2 = vcmask 781312   ;;  %s201_s0 = inlined_call_operand.vmem [shape: f32[16,32], index: 0, kind: input, shape index: {}]   ;;  %s202_s1 = inlined_call_operand.vmem [shape: bf16[32,96], index: 1, kind: input, shape index: {}]   ;;  %s203_s2 = inlined_call_operand.vmem [shape: f32[1,32], index: 2, kind: input, shape index: {}]   ;;  %s204_s3 = inlined_call_operand.vmem [shape: bf16[16,96], index: 3, kind: output, shape index: {}]  }
   0x1   :  { %v19_v0 = vld [vmem:[%s201_s0] sm:$0xff]  ;;  %v20_v1 = vld [vmem:[%s201_s0 + $0x8] sm:$0xff]  ;;  %138 = vmatprep.subr.bf16.mxu0 %v154_v7  ;;  %142 = vmatprep.mubr.msk.bf16.mxu0 %vm155_vm1, %v154_v7 }
   0x2   :  { %v21_v2 = vmul.f32 %v19_v0, %v19_v0  ;;  %v22_v3 = vmul.f32 %v20_v1, %v20_v1  ;;  %v148_v6 = vld [vmem:[%s202_s1] sm:$0xff]   ;;  %v149_v8 = vld [vmem:[%s202_s1 + $0x8] sm:$0xff]  }
   0x3   :  { %139 = vmatpush3.bf16.msra.mxu0 %v148_v6  ;;  %v127_v18 = vld [vmem:[%s203_s2] ss:$0 sm:$0xff] }
   0x4   :  { %v24_v4 = vsel %vm23_vm0, %v21_v2, 0.0  ;;  %v27_v5 = vsel %vm23_vm0, %v22_v3, 0.0  ;;  %140 = vmatprep.subr.bf16.mxu0 %v154_v7 }
   0x5   :  { %25 = vadd.xlane.f32.xlu0 %v24_v4 }
   0x7   :  { %141 = vmatpush3.bf16.msra.mxu0 %v149_v8 }
   0x9   :  { %28 = vadd.xlane.f32.xlu0 %v27_v5 }
  0x92   :  { %v26_v9 = vpop.xlane.xlu0 %25 }
  0x93   :  { %v31_v10 = vmul.f32 0.03125, %v26_v9 }
  0x95   :  { %v33_v11 = vadd.f32 1e-06, %v31_v10 }
  0x96   :  { %v29_v12 = vpop.xlane.xlu0 %28 }
  0x97   :  { %150 = vrsqrt.f32 %v33_v11  ;;  %v32_v13 = vmul.f32 0.03125, %v29_v12 }
  0x99   :  { %v34_v14 = vadd.f32 1e-06, %v32_v13 }
  0x9b   :  { %152 = vrsqrt.f32 %v34_v14 }
  0xa1   :  { %v151_v15 = vpop.eup %150 }
  0xa2   :  { %v37_v16 = vmul.f32 %v151_v15, %v19_v0 }
  0xa4   :  { %v46_v20 = vmul.f32 %v127_v18, %v37_v16 }
  0xa5   :  { %v153_v17 = vpop.eup %152 }
  0xa6   :  { %v38_v19 = vmul.f32 %v153_v17, %v20_v1 }
  0xa8   :  { %v47_v21 = vmul.f32 %v127_v18, %v38_v19 }
  0xaa   :  { %v48_v22 = vpack.c.bf16 %v47_v21, %v46_v20 }
  0xac   :  { %49 = vst.msk [vmem:[#allocation2] sm:$0xff] %vm23_vm0, %v48_v22 }
  0xb3   :  { %v50_v23 = vld [vmem:[#allocation2] sm:$0xff] }
  0xb4   :  { %143 = vmatmul.mubr.msk.bf16.vlgmr.msra.gmra.mrb[0].mxu0 %vm23_vm0, %v50_v23 }
 0x187   :  { %v105_v24 = vpop.f32.mrb[0].mxu0 }
 0x188   :  { %v133_v25 = vpack.c.bf16 %v105_v24, %v105_v24  ;;  %v144_v26 = vpop.f32.mrb[1].mxu0 }
 0x189   :  { %v108_v27 = vpop.f32.mrb[2].mxu0 }
 0x18a   :  { %121 = vst.msk [vmem:[%s204_s3] sm:$0xf] %vm120_vm2, %v133_v25  ;;  %v134_v28 = vpack.c.bf16 %v108_v27, %v108_v27  ;;  %v145_v29 = vpop.f32.mrb[3].mxu0 }
 0x18c   :  { %122 = vst.msk [vmem:[%s204_s3 + $0x4] sm:$0xf] %vm120_vm2, %v134_v28 }

// kernel: foundation_forward.28
= control target key start
LH: loop header
LB: loop body
LE: loop exit
PB: predicated region body
PF: predicated region fallthrough
CT: control target
= control target key end

     0   :  { %v111_v0 = vmov 0.0   ;;  %vm112_vm0 = vmmov 0   ;;  %vm40_vm1 = vcmask 261120   ;;  %s154_s1 = inlined_call_operand.vmem [shape: bf16[32,32], index: 1, kind: input, shape index: {}]   ;;  %s155_s0 = inlined_call_operand.vmem [shape: bf16[16,32], index: 0, kind: input, shape index: {}]   ;;  %s156_s2 = inlined_call_operand.vmem [shape: f32[16,32], index: 2, kind: input, shape index: {}]   ;;  %s157_s3 = inlined_call_operand.vmem [shape: f32[16,32], index: 3, kind: output, shape index: {}]  }
   0x1   :  { %98 = vmatprep.subr.bf16.mxu0 %v111_v0  ;;  %v108_v1 = vld [vmem:[%s154_s1] sm:$0xff]   ;;  %102 = vmatprep.mubr.msk.bf16.mxu0 %vm112_vm0, %v111_v0  ;;  %v109_v2 = vld [vmem:[%s154_s1 + $0x8] sm:$0xff]  }
   0x2   :  { %99 = vmatpush3.bf16.msra.mxu0 %v108_v1  ;;  %v110_v3 = vld [vmem:[%s155_s0] sm:$0xff]   ;;  %v22_v6 = vld [vmem:[%s156_s2 + $0x8] sm:$0xff] }
   0x3   :  { %100 = vmatprep.subr.bf16.mxu0 %v111_v0  ;;  %v21_v4 = vld [vmem:[%s156_s2] sm:$0xff] }
   0x6   :  { %101 = vmatpush3.bf16.msra.mxu0 %v109_v2 }
   0x9   :  { %103 = vmatmul.mubr.msk.bf16.vlgmr.msra.gmra.mrb[0].mxu0 %vm40_vm1, %v110_v3 }
  0xdc   :  { %v78_v5 = vpop.f32.mrb[0].mxu0 }
  0xdd   :  { %v79_v7 = vadd.f32 %v78_v5, %v21_v4  ;;  %v104_v8 = vpop.f32.mrb[1].mxu0 }
  0xde   :  { %v81_v9 = vpop.f32.mrb[2].mxu0 }
  0xdf   :  { %85 = vst.msk [vmem:[%s157_s3] sm:$0xff] %vm40_vm1, %v79_v7  ;;  %v82_v10 = vadd.f32 %v81_v9, %v22_v6  ;;  %v105_v11 = vpop.f32.mrb[3].mxu0 }
  0xe1   :  { %86 = vst.msk [vmem:[%s157_s3 + $0x8] sm:$0xff] %vm40_vm1, %v82_v10 }

// kernel: foundation_forward.29
= control target key start
LH: loop header
LB: loop body
LE: loop exit
PB: predicated region body
PF: predicated region fallthrough
CT: control target
= control target key end

     0   :  { %vm23_vm0 = vcmask 261120   ;;  %v154_v7 = vmov 0.0   ;;  %vm155_vm1 = vmmov 0   ;;  %vm120_vm2 = vcmask 257024   ;;  %s201_s0 = inlined_call_operand.vmem [shape: f32[16,32], index: 0, kind: input, shape index: {}]   ;;  %s202_s1 = inlined_call_operand.vmem [shape: bf16[32,32], index: 1, kind: input, shape index: {}]   ;;  %s203_s2 = inlined_call_operand.vmem [shape: f32[1,32], index: 2, kind: input, shape index: {}]   ;;  %s204_s3 = inlined_call_operand.vmem [shape: bf16[16,32], index: 3, kind: output, shape index: {}]  }
   0x1   :  { %v19_v0 = vld [vmem:[%s201_s0] sm:$0xff]  ;;  %v20_v1 = vld [vmem:[%s201_s0 + $0x8] sm:$0xff]  ;;  %138 = vmatprep.subr.bf16.mxu0 %v154_v7  ;;  %142 = vmatprep.mubr.msk.bf16.mxu0 %vm155_vm1, %v154_v7 }
   0x2   :  { %v21_v2 = vmul.f32 %v19_v0, %v19_v0  ;;  %v22_v3 = vmul.f32 %v20_v1, %v20_v1  ;;  %v148_v6 = vld [vmem:[%s202_s1] sm:$0xff]   ;;  %v149_v8 = vld [vmem:[%s202_s1 + $0x8] sm:$0xff]  }
   0x3   :  { %139 = vmatpush3.bf16.msra.mxu0 %v148_v6  ;;  %v127_v18 = vld [vmem:[%s203_s2] ss:$0 sm:$0xff] }
   0x4   :  { %v24_v4 = vsel %vm23_vm0, %v21_v2, 0.0  ;;  %v27_v5 = vsel %vm23_vm0, %v22_v3, 0.0  ;;  %140 = vmatprep.subr.bf16.mxu0 %v154_v7 }
   0x5   :  { %25 = vadd.xlane.f32.xlu0 %v24_v4 }
   0x7   :  { %141 = vmatpush3.bf16.msra.mxu0 %v149_v8 }
   0x9   :  { %28 = vadd.xlane.f32.xlu0 %v27_v5 }
  0x92   :  { %v26_v9 = vpop.xlane.xlu0 %25 }
  0x93   :  { %v31_v10 = vmul.f32 0.03125, %v26_v9 }
  0x95   :  { %v33_v11 = vadd.f32 1e-06, %v31_v10 }
  0x96   :  { %v29_v12 = vpop.xlane.xlu0 %28 }
  0x97   :  { %150 = vrsqrt.f32 %v33_v11  ;;  %v32_v13 = vmul.f32 0.03125, %v29_v12 }
  0x99   :  { %v34_v14 = vadd.f32 1e-06, %v32_v13 }
  0x9b   :  { %152 = vrsqrt.f32 %v34_v14 }
  0xa1   :  { %v151_v15 = vpop.eup %150 }
  0xa2   :  { %v37_v16 = vmul.f32 %v151_v15, %v19_v0 }
  0xa4   :  { %v46_v20 = vmul.f32 %v127_v18, %v37_v16 }
  0xa5   :  { %v153_v17 = vpop.eup %152 }
  0xa6   :  { %v38_v19 = vmul.f32 %v153_v17, %v20_v1 }
  0xa8   :  { %v47_v21 = vmul.f32 %v127_v18, %v38_v19 }
  0xaa   :  { %v48_v22 = vpack.c.bf16 %v47_v21, %v46_v20 }
  0xac   :  { %49 = vst.msk [vmem:[#allocation2] sm:$0xff] %vm23_vm0, %v48_v22 }
  0xb3   :  { %v50_v23 = vld [vmem:[#allocation2] sm:$0xff] }
  0xb4   :  { %143 = vmatmul.mubr.msk.bf16.vlgmr.msra.gmra.mrb[0].mxu0 %vm23_vm0, %v50_v23 }
 0x187   :  { %v105_v24 = vpop.f32.mrb[0].mxu0 }
 0x188   :  { %v133_v25 = vpack.c.bf16 %v105_v24, %v105_v24  ;;  %v144_v26 = vpop.f32.mrb[1].mxu0 }
 0x189   :  { %v108_v27 = vpop.f32.mrb[2].mxu0 }
 0x18a   :  { %121 = vst.msk [vmem:[%s204_s3] sm:$0xf] %vm120_vm2, %v133_v25  ;;  %v134_v28 = vpack.c.bf16 %v108_v27, %v108_v27  ;;  %v145_v29 = vpop.f32.mrb[3].mxu0 }
 0x18c   :  { %122 = vst.msk [vmem:[%s204_s3 + $0x4] sm:$0xf] %vm120_vm2, %v134_v28 }

// kernel: foundation_forward.27
= control target key start
LH: loop header
LB: loop body
LE: loop exit
PB: predicated region body
PF: predicated region fallthrough
CT: control target
= control target key end

     0   :  { %s1137_s18 = smov 0   ;;  %s1139_s19 = smov 0   ;;  %s1274_s0 = inlined_call_operand.vmem [shape: bf16[2,8,32], index: 0, kind: input, shape index: {}]   ;;  %s1275_s1 = inlined_call_operand.vmem [shape: bf16[2,8,32], index: 1, kind: input, shape index: {}]   ;;  %s1276_s2 = inlined_call_operand.vmem [shape: bf16[2,8,32], index: 2, kind: input, shape index: {}]   ;;  %s1277_s3 = inlined_call_operand.vmem [shape: f32[8,32], index: 3, kind: input, shape index: {}]   ;;  %s1278_s4 = inlined_call_operand.vmem [shape: f32[8,32], index: 4, kind: input, shape index: {}]   ;;  %s1279_s5 = inlined_call_operand.vmem [shape: bf16[2,8,32], index: 5, kind: output, shape index: {}]  }
   0x1   :  { %s1141_s20 = smov 0  }
   0x2 LB: > { %s27_s21 = sadd.s32 1, %s1089_s19  ;;  %p931_p0 = scmp.ge.s32.totalorder %s1093_s20, 1  ;;  %s1093_s20 = sphi %s1141_s20, %s15_s20   ;;  %s1089_s19 = sphi %s1139_s19, %s1283_s19   ;;  %s1085_s18 = sphi %s1137_s18, %s1282_s18  }
   0x3   : > { %p29_p1 = scmp.ge.s32.totalorder %s27_s21, 2  ;;  %p223_p2 = scmp.lt.s32.totalorder %s1093_s20, 3 }
   0x5   : > { %s1285_s21 = smov (%p29_p1, %s27_s21), 0  ;;  %p224_p3 = pnand %p931_p0, %p223_p2 }
   0x6   : > { %p263_p4 = scmp.lt.s32.totalorder (!%p224_p3), %s1085_s18, 1  ;;  %s1095_s29 = smov (!%p224_p3), 97   ;;  %v1096_v5 = vmov (!%p224_p3), 0.0   ;;  %v293_v6 = vlaneseq (!%p224_p3)  ;;  %vm1100_vm0 = vmmov (!%p224_p3), 0   ;;  %vm323_vm2 = vcmask (!%p224_p3), 7168   ;;  %v332_v13 = vld [vmem:[%s1277_s3] sm:$0xff] (!%p224_p3) }
   0x7   : > { %227 = sbr.rel (%p224_p3) target bundleno = 1727 (0x6bf), region = 40  ;;  %965 = vmatprep.subr.bf16.mxu0 (!%p224_p3), %v1096_v5  ;;  %971 = vmatprep.subr.bf16.mxu1 (!%p224_p3), %v1096_v5  ;;  %s1097_s30 = smov (!%p224_p3), 127   ;;  %vm315_vm3 = vcmask (!%p224_p3), 252928   ;;  %v333_v16 = vld [vmem:[%s1278_s4] sm:$0xff] (!%p224_p3)  ;;  %vm362_vm5 = vcmask (!%p224_p3), 64512   ;;  %vm424_vm6 = vcmask (!%p224_p3), 1043456  }
   0x8   : > { %s1098_s6 = smov (!%p224_p3), 1   ;;  %s1099_s7 = smov (!%p224_p3), 31   ;;  %967 = vmatprep.mubr.msk.bf16.mxu0 (!%p224_p3), %vm1100_vm0, %v1096_v5  ;;  %973 = vmatprep.mubr.msk.bf16.mxu1 (!%p224_p3), %vm1100_vm0, %v1096_v5  ;;  %v294_v7 = vand.u32 (!%p224_p3), 127, %v293_v6  ;;  %v357_v8 = vshrl.u32 (!%p224_p3), %v293_v6, 7  ;;  %v1101_v38 = vmov (!%p224_p3), -1e+30  }
   0x9   : > { %s1102_s12 = smov (!%p224_p3), 120   ;;  %s1103_s13 = smov (!%p224_p3), 112   ;;  %vm589_vm7 = vcmask (!%p224_p3), 125952   ;;  %vm823_vm8 = vcmask (!%p224_p3), 257152  }
   0xa   : > { %vm360_vm1 = vcmp.ge.s32.totalorder (!%p224_p3), %v357_v8, %v294_v7  ;;  %v299_v10 = vand.u32 (!%p224_p3), 1, %v294_v7  ;;  %s1104_s14 = smov (!%p224_p3), 104   ;;  %s1106_s26 = smov (!%p224_p3), 16  }
   0xb   : > { %v1195_v39 = vsel (!%p224_p3), %vm360_vm1, 0.0, %v1101_v38 }
   0xc   : > { %vm1174_vm4 = vcmp.eq.s32.totalorder (!%p224_p3), %v299_v10, 0 }
   0xe   : > { %s1287_s18 = smov (!%p263_p4, %s1085_s18), 1 }
   0xf   : > { %s1155_s22 = sshll.u32 %s1287_s18, 2  ;;  %s1105_s18 = smov 8  }
  0x10   : > { %s273_s25 = scalar_lea.vmem %s1275_s1, %s1155_s22  ;;  %s269_s28 = scalar_lea.vmem %s1274_s0, %s1155_s22 }
  0x11   : > { %v330_v0 = vld [vmem:[%s273_s25] sm:$0xf]  ;;  %s277_s17 = scalar_lea.vmem %s1276_s2, %s1155_s22  ;;  %s284_s25 = scalar_lea.vmem %s1279_s5, %s1155_s22 }
  0x12   : > { %v291_v1 = vld [vmem:[%s269_s28] sm:$0xf]  ;;  %v331_v2 = vunpack.c.l.bf16 %v330_v0 }
  0x13   : > { %v292_v3 = vunpack.c.l.bf16 %v291_v1  ;;  %v1207_v51 = vld [vmem:[%s277_s17] sm:$0xf] }
  0x14   : > { %342 = vrot.lane.b32.xlu1 %v331_v2, %s1095_s29  ;;  %v350_v19 = vmul.f32 %v332_v13, %v331_v2  ;;  %v426_v52 = vsel %vm424_vm6, %v1207_v51, 0 }
  0x15   : > { %v1049_v4 = vpack.i.bf16 %v292_v3, %v331_v2  ;;  %v326_v31 = vmul.f32 %v332_v13, %v292_v3  ;;  %972 = vmatpush3.bf16.msra.mxu1 %v426_v52 }
  0x16   : > { %977 = vmatprep.subr.bf16.mxu1 %v1096_v5 }
  0x17   : > { %1050 = vrot.lane.b32.xlu0 %v1049_v4, %s1097_s30 }
  0x18   : > { %345 = vrot.lane.b32.xlu1 %v331_v2, %s1098_s6 }
  0x1b   : > { %338 = vrot.lane.b32.xlu0 %v331_v2, %s1099_s7 }
  0x1c   : > { %317 = vrot.lane.b32.xlu1 %v292_v3, %s1095_s29 }
  0x1f   : > { %312 = vrot.lane.b32.xlu0 %v292_v3, %s1099_s7 }
  0x23   : > { %320 = vrot.lane.b32.xlu0 %v292_v3, %s1098_s6 }
  0x86   : > { %v343_v9 = vpop.permute.xlu1 %342 }
  0x89   : > { %v1051_v11 = vpop.permute.xlu0 %1050 }
  0x8a   : > { %v346_v12 = vpop.permute.xlu1 %345  ;;  %v1052_v14 = vunpack.i.l.bf16 %v1051_v11  ;;  %v1053_v26 = vunpack.i.h.bf16 %v1051_v11 }
  0x8b   : > { %v348_v18 = vsel %vm323_vm2, %v343_v9, %v346_v12 }
  0x8d   : > { %v339_v17 = vpop.permute.xlu0 %338 }
  0x8e   : > { %v341_v20 = vsel %vm315_vm3, %v1052_v14, %v339_v17  ;;  %v318_v25 = vpop.permute.xlu1 %317 }
  0x8f   : > { %v349_v21 = vsel %vm1174_vm4, %v341_v20, %v348_v18 }
  0x90   : > { %v351_v22 = vmul.f32 %v349_v21, %v333_v16 }
  0x91   : > { %v313_v23 = vpop.permute.xlu0 %312 }
  0x92   : > { %v352_v24 = vadd.f32 %v351_v22, %v350_v19  ;;  %v316_v29 = vsel %vm315_vm3, %v1053_v26, %v313_v23 }
  0x94   : > { %v354_v27 = vpack.c.bf16 %v352_v24, %v352_v24 }
  0x95   : > { %v321_v28 = vpop.permute.xlu0 %320 }
  0x96   : > { %v324_v30 = vsel %vm323_vm2, %v318_v25, %v321_v28  ;;  %v367_v32 = vsel %vm362_vm5, %v354_v27, 0 }
  0x97   : > { %v325_v33 = vsel %vm1174_vm4, %v316_v29, %v324_v30  ;;  %966 = vmatpush3.bf16.xpose.msra.mxu0 %v367_v32 }
  0x98   : > { %v327_v34 = vmul.f32 %v333_v16, %v325_v33  ;;  %983 = vmatprep.subr.bf16.mxu0 %v1096_v5 }
  0x9a   : > { %v328_v35 = vadd.f32 %v327_v34, %v326_v31 }
  0x9c   : > { %v329_v36 = vmul.f32 0.35355338, %v328_v35  ;;  %v939_v35 = vcombine.low %v1207_v51, %v1207_v51 }
  0x9e   : > { %v353_v37 = vpack.c.bf16 %v329_v36, %v329_v36 }
  0xa0   : > { %968 = vmatmul.mubr.msk.bf16.vlgmr.msra.gmra.mrb[0].mxu0 %vm362_vm5, %v353_v37 }
  0xa1   : > { %985 = vmatprep.mubr.msk.bf16.mxu0 %vm1100_vm0, %v1096_v5 }
 0x173   : > { %v403_v40 = vpop.f32.mrb[0].mxu0 }
 0x174   : > { %v404_v41 = vadd.f32 %v403_v40, %v1195_v39  ;;  %v969_v42 = vpop.f32.mrb[1].mxu0 }
 0x175   : > { %v406_v43 = vpop.f32.mrb[2].mxu0 }
 0x176   : > { %v970_v44 = vpop.f32.mrb[3].mxu0  ;;  %v409_v45 = vsel %vm362_vm5, %v404_v41, -inf }
 0x177   : > { %410 = vmax.xlane.f32.xlu1 %v409_v45 }
 0x188   : > { %469 = vrot.lane.b32.xlu1 %v353_v37, %s1102_s12 }
 0x18c   : > { %593 = vrot.lane.b32.xlu1 %v354_v27, %s1103_s13 }
 0x190   : > { %703 = vrot.lane.b32.xlu1 %v354_v27, %s1104_s14 }
 0x204   : > { %v411_v46 = vpop.xlane.xlu1 %410 }
 0x205   : > { %v412_v47 = vsub.f32 %v404_v41, %v411_v46 }
 0x207   : > { %v413_v48 = vmul.f32 1.442695, %v412_v47 }
 0x208   : > { %v470_v58 = vpop.permute.xlu1 %469 }
 0x209   : > { %1055 = vpow2.f32 %v413_v48 }
 0x20c   : > { %v594_v60 = vpop.permute.xlu1 %593 }
 0x20d   : > { %v599_v61 = vsel %vm362_vm5, %v594_v60, 0 }
 0x210   : > { %v704_v62 = vpop.permute.xlu1 %703 }
 0x211   : > { %v709_v0 = vsel %vm362_vm5, %v704_v62, 0 }
 0x213   : > { %v1056_v49 = vpop.eup %1055 }
 0x214   : > { %v415_v50 = vsel %vm362_vm5, %v1056_v49, 0.0 }
 0x215   : > { %416 = vadd.xlane.f32.xlu0 %v415_v50 }
 0x22b   : > { %472 = vrot.lane.b32.xlu0 %v354_v27, %s1102_s12 }
 0x22f   : > { %591 = vrot.lane.b32.xlu0 %v353_v37, %s1103_s13 }
 0x233   : > { %701 = vrot.lane.b32.xlu0 %v353_v37, %s1104_s14 }
 0x2a2   : > { %v417_v53 = vpop.xlane.xlu0 %416 }
 0x2a3   : > { %1057 = vrcp.f32 %v417_v53 }
 0x2a6   : > { %v473_v56 = vpop.permute.xlu0 %472 }
 0x2a7   : > { %v478_v59 = vsel %vm362_vm5, %v473_v56, 0 }
 0x2aa   : > { %v592_v63 = vpop.permute.xlu0 %591 }
 0x2ad   : > { %v1058_v54 = vpop.eup %1057 }
 0x2ae   : > { %v419_v55 = vmul.f32 %v1058_v54, %v1056_v49  ;;  %v702_v1 = vpop.permute.xlu0 %701 }
 0x2b0   : > { %v420_v57 = vpack.c.bf16 %v419_v55, %v419_v55 }
 0x2b2   : > { %974 = vmatmul.mubr.msk.bf16.vlgmr.msra.gmra.mrb[0].mxu1 %vm362_vm5, %v420_v57 }
 0x2b3   : > { %978 = vmatpush3.bf16.xpose.msra.mxu1 %v478_v59  ;;  %979 = vmatprep.mubr.msk.bf16.mxu1 %vm1100_vm0, %v1096_v5 }
 0x2b4   : > { %989 = vmatprep.subr.bf16.mxu1 %v1096_v5 }
 0x2ba   : > { %980 = vmatmul.mubr.msk.bf16.vlgmr.msra.gmra.mrb[4].mxu1 %vm362_vm5, %v470_v58 }
 0x2bb   : > { %990 = vmatpush3.bf16.xpose.msra.mxu1 %v599_v61  ;;  %991 = vmatprep.mubr.msk.bf16.mxu1 %vm1100_vm0, %v1096_v5 }
 0x2bc   : > { %1001 = vmatprep.subr.bf16.mxu1 %v1096_v5 }
 0x2c2   : > { %992 = vmatmul.mubr.msk.bf16.vlgmr.msra.gmra.mrb[8].mxu1 %vm362_vm5, %v592_v63 }
 0x2c3   : > { %1002 = vmatpush3.bf16.xpose.msra.mxu1 %v709_v0  ;;  %1003 = vmatprep.mubr.msk.bf16.mxu1 %vm1100_vm0, %v1096_v5 }
 0x2ca   : > { %1004 = vmatmul.mubr.msk.bf16.vlgmr.msra.gmra.mrb[12].mxu1 %vm362_vm5, %v702_v1 }
 0x385   : > { %v1230_v2 = vpop.f32.mrb[0].mxu1 }
 0x386   : > { %v975_v3 = vpop.f32.mrb[1].mxu1 }
 0x387   : > { %v465_v4 = vpop.f32.mrb[2].mxu1 }
 0x388   : > { %v976_v6 = vpop.f32.mrb[3].mxu1 }
 0x38d   : > { %v514_v7 = vpop.f32.mrb[4].mxu1 }
 0x38e   : > { %v515_v8 = vadd.f32 %v514_v7, %v1195_v39  ;;  %v981_v9 = vpop.f32.mrb[5].mxu1 }
 0x38f   : > { %v517_v10 = vpop.f32.mrb[6].mxu1 }
 0x390   : > { %v982_v11 = vpop.f32.mrb[7].mxu1  ;;  %v520_v12 = vsel %vm362_vm5, %v515_v8, -inf }
 0x391   : > { %521 = vmax.xlane.f32.xlu1 %v520_v12 }
 0x395   : > { %v635_v13 = vpop.f32.mrb[8].mxu1 }
 0x396   : > { %v636_v14 = vadd.f32 %v635_v13, %v1195_v39  ;;  %v993_v15 = vpop.f32.mrb[9].mxu1 }
 0x397   : > { %v638_v16 = vpop.f32.mrb[10].mxu1 }
 0x398   : > { %v994_v17 = vpop.f32.mrb[11].mxu1  ;;  %v641_v18 = vsel %vm362_vm5, %v636_v14, -inf }
 0x399   : > { %642 = vmax.xlane.f32.xlu0 %v641_v18 }
 0x39d   : > { %v745_v19 = vpop.f32.mrb[12].mxu1 }
 0x39e   : > { %v746_v20 = vadd.f32 %v745_v19, %v1195_v39  ;;  %v1005_v21 = vpop.f32.mrb[13].mxu1 }
 0x39f   : > { %v748_v22 = vpop.f32.mrb[14].mxu1 }
 0x3a0   : > { %v1006_v23 = vpop.f32.mrb[15].mxu1  ;;  %v751_v24 = vsel %vm362_vm5, %v746_v20, -inf }
 0x3a1   : > { %752 = vmax.xlane.f32.xlu0 %v751_v24 }
 0x41e   : > { %v522_v25 = vpop.xlane.xlu1 %521 }
 0x41f   : > { %v523_v26 = vsub.f32 %v515_v8, %v522_v25 }
 0x421   : > { %v524_v27 = vmul.f32 1.442695, %v523_v26 }
 0x423   : > { %1059 = vpow2.f32 %v524_v27 }
 0x426   : > { %v643_v28 = vpop.xlane.xlu0 %642 }
 0x427   : > { %v644_v29 = vsub.f32 %v636_v14, %v643_v28 }
 0x429   : > { %v645_v30 = vmul.f32 1.442695, %v644_v29 }
 0x42b   : > { %1061 = vpow2.f32 %v645_v30 }
 0x42d   : > { %v1060_v31 = vpop.eup %1059 }
 0x42e   : > { %v526_v32 = vsel %vm362_vm5, %v1060_v31, 0.0  ;;  %v753_v36 = vpop.xlane.xlu0 %752 }
 0x42f   : > { %527 = vadd.xlane.f32.xlu1 %v526_v32  ;;  %v754_v37 = vsub.f32 %v746_v20, %v753_v36 }
 0x431   : > { %v755_v38 = vmul.f32 1.442695, %v754_v37 }
 0x433   : > { %1063 = vpow2.f32 %v755_v38 }
 0x435   : > { %v1062_v33 = vpop.eup %1061 }
 0x436   : > { %v647_v34 = vsel %vm362_vm5, %v1062_v33, 0.0 }
 0x437   : > { %648 = vadd.xlane.f32.xlu0 %v647_v34 }
 0x43d   : > { %v1064_v39 = vpop.eup %1063 }
 0x43e   : > { %v757_v40 = vsel %vm362_vm5, %v1064_v39, 0.0 }
 0x440   : > { %653 = vrot.lane.b32.xlu1 %v939_v35, %s1103_s13 }
 0x44d   : > { %535 = vrot.lane.b32.xlu0 %v939_v35, %s1102_s12 }
 0x464   : > { %758 = vadd.xlane.f32.xlu1 %v757_v40 }
 0x475   : > { %763 = vrot.lane.b32.xlu1 %v939_v35, %s1104_s14 }
 0x4bc   : > { %v528_v41 = vpop.xlane.xlu1 %527 }
 0x4bd   : > { %1065 = vrcp.f32 %v528_v41 }
 0x4c0   : > { %v654_v47 = vpop.permute.xlu1 %653 }
 0x4c1   : > { %v659_v49 = vsel %vm424_vm6, %v654_v47, 0 }
 0x4c4   : > { %v649_v42 = vpop.xlane.xlu0 %648 }
 0x4c5   : > { %1067 = vrcp.f32 %v649_v42 }
 0x4c7   : > { %v1066_v43 = vpop.eup %1065 }
 0x4c8   : > { %v530_v44 = vmul.f32 %v1066_v43, %v1060_v31  ;;  %v536_v45 = vpop.permute.xlu0 %535 }
 0x4c9   : > { %v541_v46 = vsel %vm424_vm6, %v536_v45, 0 }
 0x4ca   : > { %984 = vmatpush3.bf16.msra.mxu0 %v541_v46  ;;  %v531_v48 = vpack.c.bf16 %v530_v44, %v530_v44 }
 0x4cb   : > { %995 = vmatprep.subr.bf16.mxu0 %v1096_v5 }
 0x4cd   : > { %986 = vmatmul.mubr.msk.bf16.vlgmr.msra.gmra.mrb[4].mxu0 %vm362_vm5, %v531_v48 }
 0x4ce   : > { %996 = vmatpush3.bf16.msra.mxu0 %v659_v49  ;;  %997 = vmatprep.mubr.msk.bf16.mxu0 %vm1100_vm0, %v1096_v5 }
 0x4cf   : > { %v1068_v50 = vpop.eup %1067  ;;  %1007 = vmatprep.subr.bf16.mxu0 %v1096_v5 }
 0x4d0   : > { %v651_v51 = vmul.f32 %v1068_v50, %v1062_v33 }
 0x4d2   : > { %v652_v52 = vpack.c.bf16 %v651_v51, %v651_v51 }
 0x4d5   : > { %998 = vmatmul.mubr.msk.bf16.vlgmr.msra.gmra.mrb[8].mxu0 %vm362_vm5, %v652_v52 }
 0x4d6   : > { %1009 = vmatprep.mubr.msk.bf16.mxu0 %vm1100_vm0, %v1096_v5 }
 0x4f1   : > { %v759_v53 = vpop.xlane.xlu1 %758 }
 0x4f2   : > { %1069 = vrcp.f32 %v759_v53 }
 0x4f5   : > { %v764_v54 = vpop.permute.xlu1 %763 }
 0x4f6   : > { %v769_v55 = vsel %vm424_vm6, %v764_v54, 0 }
 0x4f7   : > { %1008 = vmatpush3.bf16.msra.mxu0 %v769_v55 }
 0x4fc   : > { %v1070_v56 = vpop.eup %1069 }
 0x4fd   : > { %v761_v57 = vmul.f32 %v1070_v56, %v1064_v39 }
 0x4ff   : > { %v762_v58 = vpack.c.bf16 %v761_v57, %v761_v57 }
 0x501   : > { %1010 = vmatmul.mubr.msk.bf16.vlgmr.msra.gmra.mrb[12].mxu0 %vm362_vm5, %v762_v58 }
 0x5a0   : > { %v577_v59 = vpop.f32.mrb[4].mxu0 }
 0x5a1   : > { %584 = vrot.lane.b32.xlu1 %v577_v59, %s1105_s18  ;;  %v987_v60 = vpop.f32.mrb[5].mxu0 }
 0x5a2   : > { %v580_v61 = vpop.f32.mrb[6].mxu0 }
 0x5a3   : > { %v988_v62 = vpop.f32.mrb[7].mxu0 }
 0x5a8   : > { %v695_v63 = vpop.f32.mrb[8].mxu0 }
 0x5a9   : > { %v999_v5 = vpop.f32.mrb[9].mxu0 }
 0x5aa   : > { %v698_v0 = vpop.f32.mrb[10].mxu0 }
 0x5ab   : > { %v1000_v1 = vpop.f32.mrb[11].mxu0 }
 0x5d4   : > { %v805_v3 = vpop.f32.mrb[12].mxu0 }
 0x5d5   : > { %812 = vrot.lane.b32.xlu0 %v805_v3, %s1105_s18  ;;  %v1011_v4 = vpop.f32.mrb[13].mxu0 }
 0x5d6   : > { %v808_v6 = vpop.f32.mrb[14].mxu0 }
 0x5d7   : > { %v1012_v7 = vpop.f32.mrb[15].mxu0 }
 0x613   : > { %v585_v8 = vpop.permute.xlu1 %584 }
 0x614   : > { %v587_v9 = vsel %vm362_vm5, %v1230_v2, %v585_v8 }
 0x615   : > { %v588_v10 = vpack.c.bf16 %v587_v9, %v587_v9 }
 0x617   : > { %590 = vst.msk [vmem:[%s284_s25] sm:$0xf] %vm589_vm7, %v588_v10 }
 0x647   : > { %v813_v11 = vpop.permute.xlu0 %812 }
 0x648   : > { %v815_v12 = vsel %vm362_vm5, %v695_v63, %v813_v11 }
 0x649   : > { %v948_v13 = vpack.c.bf16 %v815_v12, %v815_v12 }
 0x64b   : > { %820 = vrot.lane.b32.xlu0 %v948_v13, %s1106_s26 }
 0x6bd   : > { %v821_v14 = vpop.permute.xlu0 %820 }
 0x6be   : > { %824 = vst.msk [vmem:[%s284_s25] sm:$0xf] %vm823_vm8, %v821_v14 }
 0x6bf PF: > { %s15_s20 = sadd.s32 1, %s1093_s20   ;;  %s1282_s18 = smov %s1089_s19 }
 0x6c0   : > { %p12_p5 = scmp.ge.s32.totalorder %s15_s20, 4   ;;  %s1283_s19 = smov %s1285_s21 }
 0x6c2   :  { %14 = sbr.rel (!%p12_p5) target bundleno = 2 (0x2), region = 78 }

// kernel: foundation_forward.24
= control target key start
LH: loop header
LB: loop body
LE: loop exit
PB: predicated region body
PF: predicated region fallthrough
CT: control target
= control target key end

     0   :  { %vm60_vm0 = vcmask 523264   ;;  %vm132_vm1 = vcmask 257024   ;;  %s237_s1 = inlined_call_operand.vmem [shape: bf16[64,32], index: 1, kind: input, shape index: {}]   ;;  %s238_s0 = inlined_call_operand.vmem [shape: f32[32,64], index: 0, kind: input, shape index: {}]   ;;  %s239_s2 = inlined_call_operand.vmem [shape: f32[1,32], index: 2, kind: input, shape index: {}]   ;;  %s240_s3 = inlined_call_operand.vmem [shape: bf16[32,32], index: 3, kind: output, shape index: {}]  }
   0x1   :  { %v174_v0 = vld [vmem:[%s237_s1] sm:$0xff]   ;;  %v175_v1 = vld [vmem:[%s237_s1 + $0x8] sm:$0xff]   ;;  %v176_v2 = vld [vmem:[%s237_s1 + $0x10] sm:$0xff]  }
   0x2   :  { %162 = vmatprep.subr.bf16.mxu0 %v174_v0  ;;  %v15_v3 = vld [vmem:[%s238_s0] sm:$0xff]  ;;  %v16_v4 = vld [vmem:[%s238_s0 + $0x8] sm:$0xff]  ;;  %v177_v6 = vld [vmem:[%s237_s1 + $0x18] sm:$0xff]  }
   0x3   :  { %163 = vmatpush3.bf16.msra.mxu0 %v174_v0  ;;  %v19_v5 = vpack.c.bf16 %v16_v4, %v15_v3  ;;  %v17_v7 = vld [vmem:[%s238_s0 + $0x10] sm:$0xff]  ;;  %v18_v8 = vld [vmem:[%s238_s0 + $0x18] sm:$0xff]  ;;  %v141_v10 = vld [vmem:[%s239_s2] ss:$0 sm:$0xff] }
   0x4   :  { %164 = vmatprep.subr.bf16.mxu0 %v175_v1  ;;  %v20_v9 = vpack.c.bf16 %v18_v8, %v17_v7 }
   0x5   :  { %170 = vmatprep.mubr.msk.bf16.mxu0 %vm60_vm0, %v19_v5 }
   0x7   :  { %165 = vmatpush3.bf16.msra.mxu0 %v175_v1 }
   0x8   :  { %166 = vmatprep.subr.bf16.mxu0 %v176_v2 }
   0xb   :  { %167 = vmatpush3.bf16.msra.mxu0 %v176_v2 }
   0xc   :  { %168 = vmatprep.subr.bf16.mxu0 %v177_v6 }
   0xf   :  { %169 = vmatpush3.bf16.msra.mxu0 %v177_v6 }
  0x12   :  { %171 = vmatmul.mubr.msk.bf16.vlgmr.msra.gmra.mrb[0].mxu0 %vm60_vm0, %v20_v9 }
  0xe5   :  { %v172_v11 = vpop.f32.mrb[0].mxu0 }
  0xe6   :  { %v110_v12 = vadd.f32 %v172_v11, %v141_v10  ;;  %v101_v13 = vpop.f32.mrb[1].mxu0 }
  0xe7   :  { %v102_v14 = vadd.f32 %v141_v10, %v101_v13  ;;  %v173_v15 = vpop.f32.mrb[2].mxu0 }
  0xe8   :  { %v154_v16 = vpack.c.bf16 %v110_v12, %v110_v12  ;;  %v113_v17 = vadd.f32 %v173_v15, %v141_v10  ;;  %v104_v18 = vpop.f32.mrb[3].mxu0 }
  0xe9   :  { %v152_v19 = vpack.c.bf16 %v102_v14, %v102_v14  ;;  %v105_v20 = vadd.f32 %v141_v10, %v104_v18 }
  0xea   :  { %135 = vst.msk [vmem:[%s240_s3 + $0x8] sm:$0xf] %vm132_vm1, %v154_v16  ;;  %v155_v21 = vpack.c.bf16 %v113_v17, %v113_v17 }
  0xeb   :  { %133 = vst.msk [vmem:[%s240_s3] sm:$0xf] %vm132_vm1, %v152_v19  ;;  %v153_v22 = vpack.c.bf16 %v105_v20, %v105_v20 }
  0xec   :  { %136 = vst.msk [vmem:[%s240_s3 + $0xc] sm:$0xf] %vm132_vm1, %v155_v21 }
  0xed   :  { %134 = vst.msk [vmem:[%s240_s3 + $0x4] sm:$0xf] %vm132_vm1, %v153_v22 }

// kernel: foundation_forward.30
= control target key start
LH: loop header
LB: loop body
LE: loop exit
PB: predicated region body
PF: predicated region fallthrough
CT: control target
= control target key end

     0   :  { %vm56_vm0 = vcmask 261120   ;;  %vm166_vm1 = vcmask 257024   ;;  %s298_s1 = inlined_call_operand.vmem [shape: bf16[32,32], index: 1, kind: input, shape index: {}]   ;;  %s299_s0 = inlined_call_operand.vmem [shape: bf16[64,32], index: 0, kind: input, shape index: {}]   ;;  %s300_s2 = inlined_call_operand.vmem [shape: bf16[64,32], index: 2, kind: output, shape index: {}]  }
   0x1   :  { %v227_v0 = vld [vmem:[%s298_s1] sm:$0xff]   ;;  %v228_v1 = vld [vmem:[%s298_s1 + $0x8] sm:$0xff]   ;;  %v230_v3 = vld [vmem:[%s299_s0 + $0x10] sm:$0xff]  }
   0x2   :  { %211 = vmatprep.subr.bf16.mxu0 %v227_v0  ;;  %223 = vmatprep.subr.bf16.mxu1 %v227_v0  ;;  %v229_v2 = vld [vmem:[%s299_s0] sm:$0xff]   ;;  %v231_v4 = vld [vmem:[%s299_s0 + $0x8] sm:$0xff]   ;;  %v232_v5 = vld [vmem:[%s299_s0 + $0x18] sm:$0xff]  }
   0x3   :  { %212 = vmatpush3.bf16.msra.mxu0 %v227_v0  ;;  %225 = vmatpush3.bf16.msra.mxu1 %v227_v0 }
   0x4   :  { %213 = vmatprep.subr.bf16.mxu0 %v228_v1  ;;  %224 = vmatprep.subr.bf16.mxu1 %v228_v1 }
   0x5   :  { %215 = vmatprep.mubr.msk.bf16.mxu0 %vm56_vm0, %v229_v2  ;;  %219 = vmatprep.mubr.msk.bf16.mxu1 %vm56_vm0, %v230_v3 }
   0x7   :  { %214 = vmatpush3.bf16.msra.mxu0 %v228_v1  ;;  %226 = vmatpush3.bf16.msra.mxu1 %v228_v1 }
   0xa   :  { %216 = vmatmul.mubr.msk.bf16.vlgmr.msra.gmra.mrb[0].mxu0 %vm56_vm0, %v231_v4  ;;  %220 = vmatmul.mubr.msk.bf16.vlgmr.msra.gmra.mrb[0].mxu1 %vm56_vm0, %v232_v5 }
  0xdd   :  { %v217_v6 = vpop.f32.mrb[0].mxu0  ;;  %v221_v7 = vpop.f32.mrb[0].mxu1 }
  0xde   :  { %v199_v8 = vpack.c.bf16 %v217_v6, %v217_v6  ;;  %v203_v9 = vpack.c.bf16 %v221_v7, %v221_v7  ;;  %v103_v10 = vpop.f32.mrb[1].mxu0  ;;  %v119_v11 = vpop.f32.mrb[1].mxu1 }
  0xdf   :  { %v197_v12 = vpack.c.bf16 %v103_v10, %v103_v10  ;;  %v201_v13 = vpack.c.bf16 %v119_v11, %v119_v11  ;;  %v218_v14 = vpop.f32.mrb[2].mxu0  ;;  %v222_v15 = vpop.f32.mrb[2].mxu1 }
  0xe0   :  { %169 = vst.msk [vmem:[%s300_s2 + $0x8] sm:$0xf] %vm166_vm1, %v199_v8  ;;  %173 = vst.msk [vmem:[%s300_s2 + $0x18] sm:$0xf] %vm166_vm1, %v203_v9  ;;  %v200_v16 = vpack.c.bf16 %v218_v14, %v218_v14  ;;  %v204_v17 = vpack.c.bf16 %v222_v15, %v222_v15  ;;  %v106_v18 = vpop.f32.mrb[3].mxu0  ;;  %v122_v19 = vpop.f32.mrb[3].mxu1 }
  0xe1   :  { %167 = vst.msk [vmem:[%s300_s2] sm:$0xf] %vm166_vm1, %v197_v12  ;;  %171 = vst.msk [vmem:[%s300_s2 + $0x10] sm:$0xf] %vm166_vm1, %v201_v13  ;;  %v198_v20 = vpack.c.bf16 %v106_v18, %v106_v18  ;;  %v202_v21 = vpack.c.bf16 %v122_v19, %v122_v19 }
  0xe2   :  { %170 = vst.msk [vmem:[%s300_s2 + $0xc] sm:$0xf] %vm166_vm1, %v200_v16  ;;  %174 = vst.msk [vmem:[%s300_s2 + $0x1c] sm:$0xf] %vm166_vm1, %v204_v17 }
  0xe3   :  { %168 = vst.msk [vmem:[%s300_s2 + $0x4] sm:$0xf] %vm166_vm1, %v198_v20  ;;  %172 = vst.msk [vmem:[%s300_s2 + $0x14] sm:$0xf] %vm166_vm1, %v202_v21 }

// kernel: foundation_forward.25
= control target key start
LH: loop header
LB: loop body
LE: loop exit
PB: predicated region body
PF: predicated region fallthrough
CT: control target
= control target key end

     0   :  { %vm58_vm0 = vcmask 130048   ;;  %vm168_vm1 = vcmask 257024   ;;  %s299_s1 = inlined_call_operand.vmem [shape: bf16[16,32], index: 1, kind: input, shape index: {}]   ;;  %s300_s0 = inlined_call_operand.vmem [shape: bf16[64,16], index: 0, kind: input, shape index: {}]   ;;  %s301_s2 = inlined_call_operand.vmem [shape: f32[1,32], index: 2, kind: input, shape index: {}]   ;;  %s302_s3 = inlined_call_operand.vmem [shape: bf16[64,32], index: 3, kind: output, shape index: {}]  }
   0x1   :  { %v224_v0 = vld [vmem:[%s299_s1] sm:$0xff]   ;;  %v226_v2 = vld [vmem:[%s300_s0 + $0x10] sm:$0xff]   ;;  %v227_v3 = vld [vmem:[%s300_s0 + $0x8] sm:$0xff]  }
   0x2   :  { %v225_v1 = vld [vmem:[%s300_s0] sm:$0xff]   ;;  %212 = vmatprep.subr.bf16.mxu0 %v224_v0  ;;  %222 = vmatprep.subr.bf16.mxu1 %v224_v0  ;;  %v228_v4 = vld [vmem:[%s300_s0 + $0x18] sm:$0xff]  }
   0x3   :  { %213 = vmatpush3.bf16.msra.mxu0 %v224_v0  ;;  %223 = vmatpush3.bf16.msra.mxu1 %v224_v0  ;;  %v181_v5 = vld [vmem:[%s301_s2] ss:$0 sm:$0xff] }
   0x4   :  { %214 = vmatprep.mubr.msk.bf16.mxu0 %vm58_vm0, %v225_v1  ;;  %218 = vmatprep.mubr.msk.bf16.mxu1 %vm58_vm0, %v226_v2 }
   0x6   :  { %215 = vmatmul.mubr.msk.bf16.vlgmr.msra.gmra.mrb[0].mxu0 %vm58_vm0, %v227_v3  ;;  %219 = vmatmul.mubr.msk.bf16.vlgmr.msra.gmra.mrb[0].mxu1 %vm58_vm0, %v228_v4 }
  0xd9   :  { %v216_v6 = vpop.f32.mrb[0].mxu0  ;;  %v220_v7 = vpop.f32.mrb[0].mxu1 }
  0xda   :  { %v114_v8 = vadd.f32 %v216_v6, %v181_v5  ;;  %v130_v9 = vadd.f32 %v220_v7, %v181_v5  ;;  %v105_v10 = vpop.f32.mrb[1].mxu0  ;;  %v121_v11 = vpop.f32.mrb[1].mxu1 }
  0xdb   :  { %v106_v12 = vadd.f32 %v181_v5, %v105_v10  ;;  %v122_v13 = vadd.f32 %v181_v5, %v121_v11  ;;  %v217_v14 = vpop.f32.mrb[2].mxu0  ;;  %v221_v15 = vpop.f32.mrb[2].mxu1 }
  0xdc   :  { %v201_v16 = vpack.c.bf16 %v114_v8, %v114_v8  ;;  %v205_v17 = vpack.c.bf16 %v130_v9, %v130_v9  ;;  %v117_v18 = vadd.f32 %v217_v14, %v181_v5  ;;  %v133_v19 = vadd.f32 %v221_v15, %v181_v5  ;;  %v108_v20 = vpop.f32.mrb[3].mxu0  ;;  %v124_v21 = vpop.f32.mrb[3].mxu1 }
  0xdd   :  { %v199_v22 = vpack.c.bf16 %v106_v12, %v106_v12  ;;  %v203_v23 = vpack.c.bf16 %v122_v13, %v122_v13  ;;  %v109_v24 = vadd.f32 %v181_v5, %v108_v20  ;;  %v125_v25 = vadd.f32 %v181_v5, %v124_v21 }
  0xde   :  { %171 = vst.msk [vmem:[%s302_s3 + $0x8] sm:$0xf] %vm168_vm1, %v201_v16  ;;  %175 = vst.msk [vmem:[%s302_s3 + $0x18] sm:$0xf] %vm168_vm1, %v205_v17  ;;  %v202_v26 = vpack.c.bf16 %v117_v18, %v117_v18  ;;  %v206_v27 = vpack.c.bf16 %v133_v19, %v133_v19 }
  0xdf   :  { %169 = vst.msk [vmem:[%s302_s3] sm:$0xf] %vm168_vm1, %v199_v22  ;;  %173 = vst.msk [vmem:[%s302_s3 + $0x10] sm:$0xf] %vm168_vm1, %v203_v23  ;;  %v200_v28 = vpack.c.bf16 %v109_v24, %v109_v24  ;;  %v204_v29 = vpack.c.bf16 %v125_v25, %v125_v25 }
  0xe0   :  { %172 = vst.msk [vmem:[%s302_s3 + $0xc] sm:$0xf] %vm168_vm1, %v202_v26  ;;  %176 = vst.msk [vmem:[%s302_s3 + $0x1c] sm:$0xf] %vm168_vm1, %v206_v27 }
  0xe1   :  { %170 = vst.msk [vmem:[%s302_s3 + $0x4] sm:$0xf] %vm168_vm1, %v200_v28  ;;  %174 = vst.msk [vmem:[%s302_s3 + $0x14] sm:$0xf] %vm168_vm1, %v204_v29 }

// kernel: foundation_forward.35
= control target key start
LH: loop header
LB: loop body
LE: loop exit
PB: predicated region body
PF: predicated region fallthrough
CT: control target
= control target key end

     0   :  { %v164_v0 = vmov 0.0   ;;  %vm165_vm0 = vmmov 0   ;;  %vm54_vm1 = vcmask 523264   ;;  %vm117_vm2 = vcmask 261120   ;;  %s213_s1 = inlined_call_operand.vmem [shape: bf16[64,32], index: 1, kind: input, shape index: {}]   ;;  %s214_s0 = inlined_call_operand.vmem [shape: bf16[16,64], index: 0, kind: input, shape index: {}]   ;;  %s215_s2 = inlined_call_operand.vmem [shape: f32[16,32], index: 2, kind: input, shape index: {}]   ;;  %s216_s3 = inlined_call_operand.vmem [shape: f32[16,32], index: 3, kind: output, shape index: {}]  }
   0x1   :  { %137 = vmatprep.subr.bf16.mxu0 %v164_v0  ;;  %v151_v1 = vld [vmem:[%s213_s1] sm:$0xff]   ;;  %145 = vmatprep.mubr.msk.bf16.mxu0 %vm165_vm0, %v164_v0  ;;  %v152_v2 = vld [vmem:[%s213_s1 + $0x8] sm:$0xff]   ;;  %v153_v3 = vld [vmem:[%s213_s1 + $0x10] sm:$0xff]  }
   0x2   :  { %138 = vmatpush3.bf16.msra.mxu0 %v151_v1  ;;  %v154_v4 = vld [vmem:[%s213_s1 + $0x18] sm:$0xff]   ;;  %v155_v5 = vld [vmem:[%s214_s0] sm:$0xff]   ;;  %v114_v20 = vld [vmem:[%s215_s2 + $0x8] sm:$0xff] }
   0x3   :  { %139 = vmatprep.subr.bf16.mxu0 %v164_v0  ;;  %v113_v17 = vld [vmem:[%s215_s2] sm:$0xff] }
   0x6   :  { %140 = vmatpush3.bf16.msra.mxu0 %v152_v2 }
   0x7   :  { %141 = vmatprep.subr.bf16.mxu0 %v164_v0 }
   0xa   :  { %142 = vmatpush3.bf16.msra.mxu0 %v153_v3 }
   0xb   :  { %143 = vmatprep.subr.bf16.mxu0 %v164_v0 }
   0xe   :  { %144 = vmatpush3.bf16.msra.mxu0 %v154_v4 }
  0x11   :  { %146 = vmatmul.mubr.msk.bf16.vlgmr.msra.gmra.mrb[0].mxu0 %vm54_vm1, %v155_v5 }
  0xe4   :  { %v92_v6 = vpop.f32.mrb[0].mxu0 }
  0xe5   :  { %v130_v7 = vmul.f32 -1.442695, %v92_v6  ;;  %v147_v8 = vpop.f32.mrb[1].mxu0 }
  0xe6   :  { %v95_v9 = vpop.f32.mrb[2].mxu0 }
  0xe7   :  { %156 = vpow2.f32 %v130_v7  ;;  %v131_v10 = vmul.f32 -1.442695, %v95_v9  ;;  %v148_v11 = vpop.f32.mrb[3].mxu0 }
  0xe9   :  { %158 = vpow2.f32 %v131_v10 }
  0xf1   :  { %v157_v12 = vpop.eup %156 }
  0xf2   :  { %v105_v13 = vadd.f32 1.0, %v157_v12 }
  0xf3   :  { %v159_v14 = vpop.eup %158 }
  0xf4   :  { %160 = vrcp.f32 %v105_v13  ;;  %v106_v15 = vadd.f32 1.0, %v159_v14 }
  0xf6   :  { %162 = vrcp.f32 %v106_v15 }
  0xfe   :  { %v161_v16 = vpop.eup %160 }
  0xff   :  { %v111_v18 = vmul.f32 %v161_v16, %v92_v6 }
 0x100   :  { %v163_v19 = vpop.eup %162 }
 0x101   :  { %v115_v21 = vadd.f32 %v113_v17, %v111_v18  ;;  %v112_v22 = vmul.f32 %v163_v19, %v95_v9 }
 0x103   :  { %118 = vst.msk [vmem:[%s216_s3] sm:$0xff] %vm117_vm2, %v115_v21  ;;  %v116_v23 = vadd.f32 %v114_v20, %v112_v22 }
 0x105   :  { %119 = vst.msk [vmem:[%s216_s3 + $0x8] sm:$0xff] %vm117_vm2, %v116_v23 }

// kernel: foundation_forward.34
= control target key start
LH: loop header
LB: loop body
LE: loop exit
PB: predicated region body
PF: predicated region fallthrough
CT: control target
= control target key end

     0   :  { %vm23_vm0 = vcmask 261120   ;;  %v178_v7 = vmov 0.0   ;;  %vm179_vm1 = vmmov 0   ;;  %vm134_vm2 = vcmask 519168   ;;  %s225_s0 = inlined_call_operand.vmem [shape: f32[16,32], index: 0, kind: input, shape index: {}]   ;;  %s226_s1 = inlined_call_operand.vmem [shape: bf16[32,64], index: 1, kind: input, shape index: {}]   ;;  %s227_s2 = inlined_call_operand.vmem [shape: f32[1,32], index: 2, kind: input, shape index: {}]   ;;  %s228_s3 = inlined_call_operand.vmem [shape: bf16[16,64], index: 3, kind: output, shape index: {}]  }
   0x1   :  { %v19_v0 = vld [vmem:[%s225_s0] sm:$0xff]  ;;  %v20_v1 = vld [vmem:[%s225_s0 + $0x8] sm:$0xff]  ;;  %154 = vmatprep.subr.bf16.mxu0 %v178_v7  ;;  %158 = vmatprep.mubr.msk.bf16.mxu0 %vm179_vm1, %v178_v7 }
   0x2   :  { %v21_v2 = vmul.f32 %v19_v0, %v19_v0  ;;  %v22_v3 = vmul.f32 %v20_v1, %v20_v1  ;;  %v164_v6 = vld [vmem:[%s226_s1] sm:$0xff]   ;;  %v165_v8 = vld [vmem:[%s226_s1 + $0x8] sm:$0xff]  }
   0x3   :  { %155 = vmatpush3.bf16.msra.mxu0 %v164_v6  ;;  %v141_v18 = vld [vmem:[%s227_s2] ss:$0 sm:$0xff] }
   0x4   :  { %v24_v4 = vsel %vm23_vm0, %v21_v2, 0.0  ;;  %v27_v5 = vsel %vm23_vm0, %v22_v3, 0.0  ;;  %156 = vmatprep.subr.bf16.mxu0 %v178_v7 }
   0x5   :  { %25 = vadd.xlane.f32.xlu0 %v24_v4 }
   0x7   :  { %157 = vmatpush3.bf16.msra.mxu0 %v165_v8 }
   0x9   :  { %28 = vadd.xlane.f32.xlu0 %v27_v5 }
  0x92   :  { %v26_v9 = vpop.xlane.xlu0 %25 }
  0x93   :  { %v31_v10 = vmul.f32 0.03125, %v26_v9 }
  0x95   :  { %v33_v11 = vadd.f32 1e-06, %v31_v10 }
  0x96   :  { %v29_v12 = vpop.xlane.xlu0 %28 }
  0x97   :  { %166 = vrsqrt.f32 %v33_v11  ;;  %v32_v13 = vmul.f32 0.03125, %v29_v12 }
  0x99   :  { %v34_v14 = vadd.f32 1e-06, %v32_v13 }
  0x9b   :  { %168 = vrsqrt.f32 %v34_v14 }
  0xa1   :  { %v167_v15 = vpop.eup %166 }
  0xa2   :  { %v37_v16 = vmul.f32 %v167_v15, %v19_v0 }
  0xa4   :  { %v46_v20 = vmul.f32 %v141_v18, %v37_v16 }
  0xa5   :  { %v169_v17 = vpop.eup %168 }
  0xa6   :  { %v38_v19 = vmul.f32 %v169_v17, %v20_v1 }
  0xa8   :  { %v47_v21 = vmul.f32 %v141_v18, %v38_v19 }
  0xaa   :  { %v48_v22 = vpack.c.bf16 %v47_v21, %v46_v20 }
  0xac   :  { %49 = vst.msk [vmem:[#allocation2] sm:$0xff] %vm23_vm0, %v48_v22 }
  0xb3   :  { %v50_v23 = vld [vmem:[#allocation2] sm:$0xff] }
  0xb4   :  { %159 = vmatmul.mubr.msk.bf16.vlgmr.msra.gmra.mrb[0].mxu0 %vm23_vm0, %v50_v23 }
 0x187   :  { %v105_v24 = vpop.f32.mrb[0].mxu0 }
 0x188   :  { %v145_v25 = vmul.f32 -1.442695, %v105_v24  ;;  %v160_v26 = vpop.f32.mrb[1].mxu0 }
 0x189   :  { %v108_v27 = vpop.f32.mrb[2].mxu0 }
 0x18a   :  { %170 = vpow2.f32 %v145_v25  ;;  %v146_v28 = vmul.f32 -1.442695, %v108_v27  ;;  %v161_v29 = vpop.f32.mrb[3].mxu0 }
 0x18c   :  { %172 = vpow2.f32 %v146_v28 }
 0x194   :  { %v171_v30 = vpop.eup %170 }
 0x195   :  { %v118_v31 = vadd.f32 1.0, %v171_v30 }
 0x196   :  { %v173_v32 = vpop.eup %172 }
 0x197   :  { %174 = vrcp.f32 %v118_v31  ;;  %v119_v33 = vadd.f32 1.0, %v173_v32 }
 0x199   :  { %176 = vrcp.f32 %v119_v33 }
 0x1a1   :  { %v175_v34 = vpop.eup %174 }
 0x1a2   :  { %v124_v35 = vmul.f32 %v175_v34, %v105_v24 }
 0x1a3   :  { %v177_v36 = vpop.eup %176 }
 0x1a4   :  { %v149_v37 = vpack.c.bf16 %v124_v35, %v124_v35  ;;  %v125_v38 = vmul.f32 %v177_v36, %v108_v27 }
 0x1a6   :  { %135 = vst.msk [vmem:[%s228_s3] sm:$0xf] %vm134_vm2, %v149_v37  ;;  %v150_v39 = vpack.c.bf16 %v125_v38, %v125_v38 }
 0x1a8   :  { %136 = vst.msk [vmem:[%s228_s3 + $0x4] sm:$0xf] %vm134_vm2, %v150_v39 }

// kernel: foundation_forward.46
= control target key start
LH: loop header
LB: loop body
LE: loop exit
PB: predicated region body
PF: predicated region fallthrough
CT: control target
= control target key end

     0   :  { %v183_v0 = vmov 0.0   ;;  %vm184_vm0 = vmmov 0   ;;  %vm40_vm1 = vcmask 261120   ;;  %vm16_vm2 = vcmask 7168   ;;  %s230_s1 = inlined_call_operand.vmem [shape: bf16[32,128], index: 1, kind: input, shape index: {}]   ;;  %s231_s0 = inlined_call_operand.vmem [shape: f32[16,32], index: 0, kind: input, shape index: {}]   ;;  %s232_s2 = inlined_call_operand.vmem [shape: f32[16,1], index: 2, kind: output, shape index: {}]  }
   0x1   :  { %155 = vmatprep.subr.bf16.mxu0 %v183_v0  ;;  %v169_v1 = vld [vmem:[%s230_s1] sm:$0xff]   ;;  %159 = vmatprep.mubr.msk.bf16.mxu0 %vm184_vm0, %v183_v0  ;;  %v170_v2 = vld [vmem:[%s230_s1 + $0x8] sm:$0xff]   ;;  %v185_v6 = vmov -inf   ;;  %19 = vst.msk [vmem:[#allocation3] sm:$0xff] %vm16_vm2, %v183_v0  ;;  %20 = vst.msk [vmem:[#allocation3 + $0x8] sm:$0xff] %vm16_vm2, %v183_v0  ;;  %v186_v11 = vmov 0  }
   0x2   :  { %156 = vmatpush3.bf16.msra.mxu0 %v169_v1  ;;  %v21_v3 = vld [vmem:[%s231_s0] sm:$0xff]  ;;  %v22_v4 = vld [vmem:[%s231_s0 + $0x8] sm:$0xff]  ;;  %17 = vst.msk [vmem:[#allocation2] sm:$0xff] %vm16_vm2, %v185_v6  ;;  %18 = vst.msk [vmem:[#allocation2 + $0x8] sm:$0xff] %vm16_vm2, %v185_v6  ;;  %167 = vset.pattern.permute.xlu1 %v186_v11 }
   0x3   :  { %157 = vmatprep.subr.bf16.mxu0 %v183_v0  ;;  %v23_v5 = vpack.c.bf16 %v22_v4, %v21_v3  ;;  %168 = vset.pattern.permute.xlu0 %v186_v11 }
   0x6   :  { %158 = vmatpush3.bf16.msra.mxu0 %v170_v2 }
   0x8   :  { %v93_v31 = vld [vmem:[#allocation3] sm:$0xff]  ;;  %v94_v35 = vld [vmem:[#allocation3 + $0x8] sm:$0xff] }
   0x9   :  { %160 = vmatmul.mubr.msk.bf16.vlgmr.msra.gmra.mrb[0].mxu0 %vm40_vm1, %v23_v5  ;;  %v85_v12 = vld [vmem:[#allocation2] sm:$0xff]  ;;  %v86_v15 = vld [vmem:[#allocation2 + $0x8] sm:$0xff] }
  0xdc   :  { %v78_v7 = vpop.f32.mrb[0].mxu0 }
  0xdd   :  { %87 = vmax.xlane.f32.xlu0 %v78_v7  ;;  %v161_v8 = vpop.f32.mrb[1].mxu0 }
  0xde   :  { %v81_v9 = vpop.f32.mrb[2].mxu0 }
  0xdf   :  { %v162_v10 = vpop.f32.mrb[3].mxu0 }
  0xe1   :  { %89 = vmax.xlane.f32.xlu0 %v81_v9 }
 0x16a   :  { %v88_v13 = vpop.xlane.xlu0 %87 }
 0x16b   :  { %v91_v14 = vmax.f32 %v85_v12, %v88_v13 }
 0x16d   :  { %v95_v16 = vsub.f32 %v85_v12, %v91_v14  ;;  %128 = vst.msk [vmem:[#allocation2] sm:$0xff] %vm16_vm2, %v91_v14  ;;  %105 = vperm.xlu1 %167, %v91_v14  }
 0x16e   :  { %v90_v17 = vpop.xlane.xlu0 %89 }
 0x16f   :  { %v92_v18 = vmax.f32 %v86_v15, %v90_v17  ;;  %v97_v28 = vmul.f32 1.442695, %v95_v16 }
 0x171   :  { %v96_v19 = vsub.f32 %v86_v15, %v92_v18  ;;  %129 = vst.msk [vmem:[#allocation2 + $0x8] sm:$0xff] %vm16_vm2, %v92_v18  ;;  %110 = vperm.xlu1 %167, %v92_v18  }
 0x173   :  { %v99_v29 = vmul.f32 1.442695, %v96_v19 }
 0x174   :  { %v133_v44 = vld [vmem:[#allocation2] sm:$0xff] }
 0x178   :  { %v134_v48 = vld [vmem:[#allocation2 + $0x8] sm:$0xff] }
 0x1ec   :  { %v106_v20 = vpop.permute.xlu1 %105 }
 0x1ed   :  { %v113_v21 = vsub.f32 %v78_v7, %v106_v20 }
 0x1ef   :  { %v115_v22 = vmul.f32 1.442695, %v113_v21 }
 0x1f0   :  { %v111_v23 = vpop.permute.xlu1 %110 }
 0x1f1   :  { %171 = vpow2.f32 %v115_v22  ;;  %v114_v24 = vsub.f32 %v81_v9, %v111_v23 }
 0x1f3   :  { %v117_v25 = vmul.f32 1.442695, %v114_v24 }
 0x1f5   :  { %173 = vpow2.f32 %v117_v25 }
 0x1f6   :  { %175 = vpow2.f32 %v97_v28 }
 0x1f7   :  { %177 = vpow2.f32 %v99_v29 }
 0x1fb   :  { %v172_v26 = vpop.eup %171 }
 0x1fc   :  { %119 = vadd.xlane.f32.xlu0 %v172_v26 }
 0x1ff   :  { %v174_v27 = vpop.eup %173 }
 0x200   :  { %121 = vadd.xlane.f32.xlu1 %v174_v27  ;;  %v176_v30 = vpop.eup %175 }
 0x201   :  { %v101_v32 = vmul.f32 %v176_v30, %v93_v31  ;;  %v178_v33 = vpop.eup %177 }
 0x202   :  { %v102_v37 = vmul.f32 %v178_v33, %v94_v35 }
 0x289   :  { %v120_v34 = vpop.xlane.xlu0 %119 }
 0x28a   :  { %v123_v36 = vadd.f32 %v120_v34, %v101_v32 }
 0x28c   :  { %126 = vst.msk [vmem:[#allocation3] sm:$0xff] %vm16_vm2, %v123_v36 }
 0x28d   :  { %v122_v38 = vpop.xlane.xlu1 %121 }
 0x28e   :  { %v124_v39 = vadd.f32 %v122_v38, %v102_v37 }
 0x290   :  { %127 = vst.msk [vmem:[#allocation3 + $0x8] sm:$0xff] %vm16_vm2, %v124_v39 }
 0x293   :  { %v135_v40 = vld [vmem:[#allocation3] sm:$0xff] }
 0x294   :  { %179 = vlog2.f32 %v135_v40 }
 0x297   :  { %v136_v41 = vld [vmem:[#allocation3 + $0x8] sm:$0xff] }
 0x298   :  { %181 = vlog2.f32 %v136_v41 }
 0x29e   :  { %v180_v42 = vpop.eup %179 }
 0x29f   :  { %v138_v43 = vmul.f32 0.6931472, %v180_v42 }
 0x2a1   :  { %v141_v45 = vadd.f32 %v138_v43, %v133_v44 }
 0x2a2   :  { %v182_v46 = vpop.eup %181 }
 0x2a3   :  { %143 = vst.msk [vmem:[%s232_s2] sm:$0xff] %vm16_vm2, %v141_v45  ;;  %v140_v47 = vmul.f32 0.6931472, %v182_v46 }
 0x2a5   :  { %v142_v49 = vadd.f32 %v140_v47, %v134_v48 }
 0x2a7   :  { %144 = vst.msk [vmem:[%s232_s2 + $0x8] sm:$0xff] %vm16_vm2, %v142_v49 }

// kernel: foundation_forward.47
= control target key start
LH: loop header
LB: loop body
LE: loop exit
PB: predicated region body
PF: predicated region fallthrough
CT: control target
= control target key end

     0   :  { %v167_v1 = vmov 0.0   ;;  %vm168_vm0 = vmmov 0   ;;  %v169_v6 = vmov 0   ;;  %s223_s0 = inlined_call_operand.vmem [shape: f32[16,32], index: 0, kind: input, shape index: {}]   ;;  %s224_s1 = inlined_call_operand.vmem [shape: bf16[32,128], index: 1, kind: input, shape index: {}]   ;;  %s225_s2 = inlined_call_operand.vmem [shape: f32[16,1], index: 2, kind: input, shape index: {}]   ;;  %s226_s3 = inlined_call_operand.hbm [shape: f32[16,128], index: 3, kind: output, shape index: {}]  }
   0x1   :  { %v137_v0 = vld [vmem:[%s224_s1] sm:$0xff]   ;;  %122 = vmatprep.subr.bf16.mxu0 %v167_v1  ;;  %v138_v2 = vld [vmem:[%s224_s1 + $0x8] sm:$0xff]   ;;  %126 = vmatprep.mubr.msk.bf16.mxu0 %vm168_vm0, %v167_v1 }
   0x2   :  { %123 = vmatpush3.bf16.msra.mxu0 %v137_v0  ;;  %v16_v3 = vld [vmem:[%s223_s0] sm:$0xff]  ;;  %v17_v4 = vld [vmem:[%s223_s0 + $0x8] sm:$0xff]  ;;  %136 = vset.pattern.permute.xlu0 %v169_v6 }
   0x3   :  { %v80_v5 = vld [vmem:[%s225_s2] sm:$0xff]  ;;  %124 = vmatprep.subr.bf16.mxu0 %v167_v1 }
   0x4   :  { %8 = vsyncpa [#allocation3], 0  ;;  %84 = vperm.xlu0 %136, %v80_v5   ;;  %v18_v7 = vpack.c.bf16 %v17_v4, %v16_v3  ;;  %v81_v8 = vld [vmem:[%s225_s2 + $0x8] sm:$0xff]  ;;  %vm35_vm1 = vcmask 261120   ;;  %s170_s0 = smov [#allocation2]  }
   0x5   :  { %s105_s23 = sshll.u32 %s170_s0, 4  ;;  %s106_s23 = int_to_ptr.vmem [resolvable:$true] %s105_s23 }
   0x6   :  { %125 = vmatpush3.bf16.msra.mxu0 %v138_v2  ;;  %s143_s2 = scalar_lea.vmem %s106_s23, 256  ;;  %p148_p1 = scmp.lt.s32.totalorder %s106_s23, %s106_s23 }
   0x7   :  { %p144_p0 = scmp.ne.s32.totalorder %s106_s23, %s143_s2  ;;  %p149_p2 = scmp.lt.s32.totalorder %s143_s2, %s143_s2 }
   0x8   :  { %89 = vperm.xlu0 %136, %v81_v8  }
   0x9   :  { %127 = vmatmul.mubr.msk.bf16.vlgmr.msra.gmra.mrb[0].mxu0 %vm35_vm1, %v18_v7  ;;  %p150_p3 = por %p149_p2, %p148_p1 }
   0xb   :  { %p151_p4 = pnand %p150_p3, %p144_p0 }
  0x83   :  { %v85_v9 = vpop.permute.xlu0 %84 }
  0x87   :  { %v90_v13 = vpop.permute.xlu0 %89 }
  0xdc   :  { %v73_v10 = vpop.f32.mrb[0].mxu0 }
  0xdd   :  { %v92_v11 = vsub.f32 %v73_v10, %v85_v9  ;;  %v128_v12 = vpop.f32.mrb[1].mxu0 }
  0xde   :  { %v76_v14 = vpop.f32.mrb[2].mxu0 }
  0xdf   :  { %v94_v15 = vmul.f32 1.442695, %v92_v11  ;;  %v93_v16 = vsub.f32 %v76_v14, %v90_v13  ;;  %v129_v17 = vpop.f32.mrb[3].mxu0 }
  0xe1   :  { %139 = vpow2.f32 %v94_v15  ;;  %v96_v18 = vmul.f32 1.442695, %v93_v16 }
  0xe3   :  { %141 = vpow2.f32 %v96_v18 }
  0xeb   :  { %v140_v19 = vpop.eup %139 }
  0xec   :  { %98 = vst [vmem:[#allocation2] sm:$0xff] %v140_v19 }
  0xed   :  { %v142_v20 = vpop.eup %141 }
  0xee   :  { %99 = vst [vmem:[#allocation2 + $0x8] sm:$0xff] %v142_v20 }
  0xef   :  { %154 = shalt.err (!%p151_p4)
}
  0xf0   :  { %s155_s26 = scalar_lea.hbm %s226_s3, 256 }
  0xf1   :  { %p156_p5 = scmp.ne.s32.totalorder %s226_s3, %s155_s26  ;;  %p159_p6 = scmp.lt.u32.totalorder %s155_s26, %s226_s3 }
  0xf3   :  { %p161_p7 = pnand %p159_p6, %p156_p5 }
  0xf5   :  { %164 = shalt.err (!%p161_p7)
}
  0xf6   :  { %s171_s4 = smov 128   ;;  %s172_s5 = smov 8  }
  0xf7   :  { %111 = dma.vmem_to_hbm [thread:$0]  %s106_s23, 256, %s226_s3, [#allocation3], %s171_s4, %s171_s4, %s172_s5  }
  0xf8   :  { %165 = dma.done.wait [#allocation3], 256  }
  0xf9   :  { %166 = vsyncadd [#allocation3], 4294967040 }
  0xfa   :  { %115 = vsyncpa [#allocation3], 1 }

// kernel: foundation_forward.32
= control target key start
LH: loop header
LB: loop body
LE: loop exit
PB: predicated region body
PF: predicated region fallthrough
CT: control target
= control target key end

     0   :  { %s1374_s24 = smov 0   ;;  %s1376_s25 = smov 0   ;;  %s1607_s0 = inlined_call_operand.vmem [shape: bf16[2,8,32], index: 0, kind: input, shape index: {}]   ;;  %s1608_s1 = inlined_call_operand.vmem [shape: bf16[2,32,32], index: 1, kind: input, shape index: {}]   ;;  %s1609_s2 = inlined_call_operand.vmem [shape: bf16[2,32,32], index: 2, kind: input, shape index: {}]   ;;  %s1610_s3 = inlined_call_operand.vmem [shape: f32[8,32], index: 3, kind: input, shape index: {}]   ;;  %s1611_s4 = inlined_call_operand.vmem [shape: f32[8,32], index: 4, kind: input, shape index: {}]   ;;  %s1612_s5 = inlined_call_operand.vmem [shape: f32[32,32], index: 5, kind: input, shape index: {}]   ;;  %s1613_s6 = inlined_call_operand.vmem [shape: f32[32,32], index: 6, kind: input, shape index: {}]   ;;  %s1614_s7 = inlined_call_operand.vmem [shape: bf16[2,8,32], index: 7, kind: output, shape index: {}]  }
   0x1   :  { %s1378_s26 = smov 0  }
   0x2 LB: > { %s29_s27 = sadd.s32 1, %s1317_s25  ;;  %p1086_p0 = scmp.ge.s32.totalorder %s1321_s26, 1  ;;  %s1321_s26 = sphi %s1378_s26, %s17_s26   ;;  %s1317_s25 = sphi %s1376_s25, %s1618_s25   ;;  %s1313_s24 = sphi %s1374_s24, %s1617_s24  }
   0x3   : > { %p31_p1 = scmp.ge.s32.totalorder %s29_s27, 2  ;;  %p275_p2 = scmp.lt.s32.totalorder %s1321_s26, 3 }
   0x5   : > { %s1620_s27 = smov (%p31_p1, %s29_s27), 0  ;;  %p276_p3 = pnand %p1086_p0, %p275_p2 }
   0x6   : > { %p321_p4 = scmp.lt.s32.totalorder (!%p276_p3), %s1313_s24, 1  ;;  %s1323_s9 = smov (!%p276_p3), 97   ;;  %v1325_v7 = vmov (!%p276_p3), 0.0   ;;  %vm1328_vm0 = vmmov (!%p276_p3), 0   ;;  %v353_v11 = vlaneseq (!%p276_p3)  ;;  %vm383_vm1 = vcmask (!%p276_p3), 7168   ;;  %v398_v17 = vld [vmem:[%s1612_s5] sm:$0xff] (!%p276_p3) }
   0x7   : > { %279 = sbr.rel (%p276_p3) target bundleno = 2775 (0xad7), region = 48  ;;  %s1324_s10 = smov (!%p276_p3), 127   ;;  %1142 = vmatprep.subr.bf16.mxu0 (!%p276_p3), %v1325_v7  ;;  %1150 = vmatprep.subr.bf16.mxu1 (!%p276_p3), %v1325_v7  ;;  %vm375_vm3 = vcmask (!%p276_p3), 252928   ;;  %v399_v18 = vld [vmem:[%s1612_s5 + $0x8] sm:$0xff] (!%p276_p3)  ;;  %v402_v29 = vld [vmem:[%s1613_s6] sm:$0xff] (!%p276_p3)  ;;  %v400_v47 = vld [vmem:[%s1612_s5 + $0x10] sm:$0xff] (!%p276_p3) }
   0x8   : > { %s1326_s12 = smov (!%p276_p3), 1   ;;  %s1327_s13 = smov (!%p276_p3), 31   ;;  %1146 = vmatprep.mubr.msk.bf16.mxu0 (!%p276_p3), %vm1328_vm0, %v1325_v7  ;;  %1154 = vmatprep.mubr.msk.bf16.mxu1 (!%p276_p3), %vm1328_vm0, %v1325_v7  ;;  %v354_v12 = vand.u32 (!%p276_p3), 127, %v353_v11  ;;  %v403_v30 = vld [vmem:[%s1613_s6 + $0x8] sm:$0xff] (!%p276_p3)  ;;  %v401_v48 = vld [vmem:[%s1612_s5 + $0x18] sm:$0xff] (!%p276_p3)  ;;  %vm489_vm4 = vcmask (!%p276_p3), 64512  }
   0x9   : > { %v404_v57 = vld [vmem:[%s1613_s6 + $0x10] sm:$0xff] (!%p276_p3)  ;;  %v405_v58 = vld [vmem:[%s1613_s6 + $0x18] sm:$0xff] (!%p276_p3)  ;;  %v348_v11 = vld [vmem:[%s1610_s3] sm:$0xff] (!%p276_p3)  ;;  %vm539_vm5 = vcmask (!%p276_p3), 261120   ;;  %s1329_s20 = smov (!%p276_p3), 120   ;;  %s1331_s29 = smov (!%p276_p3), 104  }
   0xa   : > { %v359_v13 = vand.u32 (!%p276_p3), 1, %v354_v12  ;;  %s1332_s30 = smov (!%p276_p3), 8   ;;  %vm732_vm6 = vcmask (!%p276_p3), 125952   ;;  %vm978_vm7 = vcmask (!%p276_p3), 257152  }
   0xc   : > { %vm1426_vm2 = vcmp.eq.s32.totalorder (!%p276_p3), %v359_v13, 0 }
   0xe   : > { %s1622_s24 = smov (!%p321_p4, %s1313_s24), 1 }
   0xf   : > { %s1106_s28 = sshll.u32 %s1622_s24, 4  ;;  %s1087_s11 = sshll.u32 %s1622_s24, 2 }
  0x10   : > { %s332_s8 = scalar_lea.vmem %s1608_s1, %s1106_s28  ;;  %s327_s16 = scalar_lea.vmem %s1607_s0, %s1087_s11 }
  0x11   : > { %v1110_v0 = vld [vmem:[%s332_s8] sm:$0xff]   ;;  %v1400_v3 = vld [vmem:[%s332_s8 + $0x8] sm:$0xff]   ;;  %s337_s23 = scalar_lea.vmem %s1609_s2, %s1106_s28  ;;  %s1330_s28 = smov 112  }
  0x12   : > { %v1111_v1 = vunpack.c.l.bf16 %v1110_v0  ;;  %v1112_v2 = vunpack.c.h.bf16 %v1110_v0  ;;  %v1115_v5 = vunpack.c.l.bf16 %v1400_v3  ;;  %v1116_v6 = vunpack.c.h.bf16 %v1400_v3  ;;  %v351_v9 = vld [vmem:[%s327_s16] sm:$0xf]  ;;  %s1333_s24 = smov 16  }
  0x13   : > { %v1416_v10 = vunpack.c.l.bf16 %v351_v9 }
  0x14   : > { %v1251_v4 = vpack.i.bf16 %v1112_v2, %v1111_v1  ;;  %v1266_v8 = vpack.i.bf16 %v1116_v6, %v1115_v5  ;;  %v470_v31 = vmul.f32 %v1111_v1, %v398_v17  ;;  %v471_v32 = vmul.f32 %v1112_v2, %v399_v18 }
  0x15   : > { %v472_v59 = vmul.f32 %v1115_v5, %v400_v47  ;;  %v473_v60 = vmul.f32 %v1116_v6, %v401_v48 }
  0x16   : > { %1252 = vrot.lane.b32.xlu1 %v1251_v4, %s1323_s9  ;;  %1242 = vrot.lane.b32.xlu0 %v1251_v4, %s1324_s10 }
  0x1a   : > { %1257 = vrot.lane.b32.xlu1 %v1251_v4, %s1326_s12  ;;  %1247 = vrot.lane.b32.xlu0 %v1251_v4, %s1327_s13 }
  0x1e   : > { %1267 = vrot.lane.b32.xlu1 %v1266_v8, %s1327_s13  ;;  %1262 = vrot.lane.b32.xlu0 %v1266_v8, %s1324_s10 }
  0x22   : > { %1277 = vrot.lane.b32.xlu1 %v1266_v8, %s1326_s12  ;;  %1272 = vrot.lane.b32.xlu0 %v1266_v8, %s1323_s9 }
  0x26   : > { %372 = vrot.lane.b32.xlu1 %v1416_v10, %s1327_s13  ;;  %369 = vrot.lane.b32.xlu0 %v1416_v10, %s1324_s10  ;;  %s344_s10 = scalar_lea.vmem %s1614_s7, %s1087_s11 }
  0x2a   : > { %380 = vrot.lane.b32.xlu1 %v1416_v10, %s1326_s12  ;;  %377 = vrot.lane.b32.xlu0 %v1416_v10, %s1323_s9 }
  0x88   : > { %v1253_v14 = vpop.permute.xlu1 %1252  ;;  %v1243_v15 = vpop.permute.xlu0 %1242 }
  0x89   : > { %v1255_v19 = vunpack.i.h.bf16 %v1253_v14  ;;  %v1254_v20 = vunpack.i.l.bf16 %v1253_v14  ;;  %v1245_v21 = vunpack.i.h.bf16 %v1243_v15  ;;  %v1244_v22 = vunpack.i.l.bf16 %v1243_v15  ;;  %v350_v15 = vld [vmem:[%s1611_s4] sm:$0xff] }
  0x8c   : > { %v1258_v23 = vpop.permute.xlu1 %1257  ;;  %v1248_v24 = vpop.permute.xlu0 %1247 }
  0x8d   : > { %v1260_v25 = vunpack.i.h.bf16 %v1258_v23  ;;  %v1259_v26 = vunpack.i.l.bf16 %v1258_v23  ;;  %v1250_v27 = vunpack.i.h.bf16 %v1248_v24  ;;  %v1249_v28 = vunpack.i.l.bf16 %v1248_v24 }
  0x8f   : > { %v462_v33 = vsel %vm383_vm1, %v1254_v20, %v1259_v26  ;;  %v463_v34 = vsel %vm383_vm1, %v1255_v19, %v1260_v25  ;;  %v434_v35 = vsel %vm375_vm3, %v1244_v22, %v1249_v28  ;;  %v435_v36 = vsel %vm375_vm3, %v1245_v21, %v1250_v27 }
  0x90   : > { %v466_v37 = vsel %vm1426_vm2, %v434_v35, %v462_v33  ;;  %v467_v38 = vsel %vm1426_vm2, %v435_v36, %v463_v34  ;;  %v1268_v39 = vpop.permute.xlu1 %1267  ;;  %v1263_v40 = vpop.permute.xlu0 %1262  ;;  %v386_v20 = vmul.f32 %v1416_v10, %v348_v11  ;;  %v1512_v36 = vld [vmem:[%s337_s23] sm:$0xff]  }
  0x91   : > { %v474_v41 = vmul.f32 %v466_v37, %v402_v29  ;;  %v475_v42 = vmul.f32 %v467_v38, %v403_v30  ;;  %v1270_v43 = vunpack.i.h.bf16 %v1268_v39  ;;  %v1269_v44 = vunpack.i.l.bf16 %v1268_v39  ;;  %1151 = vmatpush3.bf16.msra.mxu1 %v1512_v36  ;;  %v1518_v37 = vld [vmem:[%s337_s23 + $0x8] sm:$0xff]  }
  0x92   : > { %v1265_v45 = vunpack.i.h.bf16 %v1263_v40  ;;  %v1264_v46 = vunpack.i.l.bf16 %v1263_v40  ;;  %1152 = vmatprep.subr.bf16.mxu1 %v1325_v7 }
  0x93   : > { %v478_v49 = vadd.f32 %v474_v41, %v470_v31  ;;  %v479_v50 = vadd.f32 %v475_v42, %v471_v32 }
  0x94   : > { %v1278_v51 = vpop.permute.xlu1 %1277  ;;  %v1273_v52 = vpop.permute.xlu0 %1272  ;;  %v437_v62 = vsel %vm375_vm3, %v1265_v45, %v1270_v43  ;;  %v436_v63 = vsel %vm375_vm3, %v1264_v46, %v1269_v44 }
  0x95   : > { %v1280_v53 = vunpack.i.h.bf16 %v1278_v51  ;;  %v1279_v54 = vunpack.i.l.bf16 %v1278_v51  ;;  %v1275_v55 = vunpack.i.h.bf16 %v1273_v52  ;;  %v1274_v56 = vunpack.i.l.bf16 %v1273_v52  ;;  %1153 = vmatpush3.bf16.msra.mxu1 %v1518_v37 }
  0x96   : > { %v1466_v61 = vpack.c.bf16 %v479_v50, %v478_v49  ;;  %1158 = vmatprep.subr.bf16.mxu1 %v1325_v7 }
  0x97   : > { %v465_v0 = vsel %vm383_vm1, %v1275_v55, %v1280_v53  ;;  %v464_v1 = vsel %vm383_vm1, %v1274_v56, %v1279_v54 }
  0x98   : > { %v468_v2 = vsel %vm1426_vm2, %v436_v63, %v464_v1  ;;  %v469_v4 = vsel %vm1426_vm2, %v437_v62, %v465_v0  ;;  %v494_v3 = vsel %vm489_vm4, %v1466_v61, 0  ;;  %v373_v5 = vpop.permute.xlu1 %372  ;;  %v370_v6 = vpop.permute.xlu0 %369 }
  0x99   : > { %v476_v8 = vmul.f32 %v468_v2, %v404_v57  ;;  %v477_v9 = vmul.f32 %v469_v4, %v405_v58  ;;  %1143 = vmatpush3.bf16.xpose.msra.mxu0 %v494_v3  ;;  %v376_v18 = vsel %vm375_vm3, %v370_v6, %v373_v5 }
  0x9a   : > { %1144 = vmatprep.subr.bf16.mxu0 %v1325_v7 }
  0x9b   : > { %v480_v12 = vadd.f32 %v476_v8, %v472_v59  ;;  %v481_v13 = vadd.f32 %v477_v9, %v473_v60 }
  0x9c   : > { %v381_v14 = vpop.permute.xlu1 %380  ;;  %v378_v17 = vpop.permute.xlu0 %377 }
  0x9d   : > { %v384_v19 = vsel %vm383_vm1, %v378_v17, %v381_v14  ;;  %v1488_v21 = vpack.c.bf16 %v481_v13, %v480_v12 }
  0x9e   : > { %v385_v22 = vsel %vm1426_vm2, %v376_v18, %v384_v19 }
  0x9f   : > { %v387_v23 = vmul.f32 %v385_v22, %v350_v15  ;;  %v497_v24 = vsel %vm489_vm4, %v1488_v21, 0 }
  0xa1   : > { %v388_v25 = vadd.f32 %v387_v23, %v386_v20  ;;  %1145 = vmatpush3.bf16.xpose.msra.mxu0 %v497_v24 }
  0xa2   : > { %1166 = vmatprep.subr.bf16.mxu0 %v1325_v7 }
  0xa3   : > { %v389_v26 = vmul.f32 0.35355338, %v388_v25 }
  0xa5   : > { %v1495_v27 = vpack.c.bf16 %v389_v26, %v389_v26 }
  0xa8   : > { %1147 = vmatmul.mubr.msk.bf16.vlgmr.msra.gmra.mrb[0].mxu0 %vm489_vm4, %v1495_v27 }
  0xa9   : > { %1170 = vmatprep.mubr.msk.bf16.mxu0 %vm1328_vm0, %v1325_v7 }
 0x17b   : > { %v533_v10 = vpop.f32.mrb[0].mxu0 }
 0x17c   : > { %v1148_v16 = vpop.f32.mrb[1].mxu0  ;;  %v540_v28 = vsel %vm539_vm5, %v533_v10, -inf }
 0x17d   : > { %541 = vmax.xlane.f32.xlu0 %v540_v28  ;;  %v536_v29 = vpop.f32.mrb[2].mxu0 }
 0x17e   : > { %v1149_v30 = vpop.f32.mrb[3].mxu0 }
 0x193   : > { %612 = vrot.lane.b32.xlu0 %v1466_v61, %s1329_s20 }
 0x197   : > { %608 = vrot.lane.b32.xlu0 %v1495_v27, %s1329_s20 }
 0x20a   : > { %v542_v31 = vpop.xlane.xlu0 %541 }
 0x20b   : > { %v543_v32 = vsub.f32 %v533_v10, %v542_v31 }
 0x20d   : > { %v544_v33 = vmul.f32 1.442695, %v543_v32 }
 0x20e   : > { %v613_v41 = vpop.permute.xlu0 %612 }
 0x20f   : > { %1283 = vpow2.f32 %v544_v33  ;;  %v620_v43 = vsel %vm489_vm4, %v613_v41, 0 }
 0x212   : > { %v609_v46 = vpop.permute.xlu0 %608 }
 0x219   : > { %v1284_v34 = vpop.eup %1283 }
 0x21a   : > { %v546_v35 = vsel %vm539_vm5, %v1284_v34, 0.0 }
 0x21b   : > { %547 = vadd.xlane.f32.xlu1 %v546_v35 }
 0x22c   : > { %614 = vrot.lane.b32.xlu1 %v1488_v21, %s1329_s20 }
 0x2a8   : > { %v548_v38 = vpop.xlane.xlu1 %547 }
 0x2a9   : > { %1285 = vrcp.f32 %v548_v38 }
 0x2ac   : > { %v615_v44 = vpop.permute.xlu1 %614 }
 0x2ad   : > { %v623_v45 = vsel %vm489_vm4, %v615_v44, 0 }
 0x2b3   : > { %v1286_v39 = vpop.eup %1285 }
 0x2b4   : > { %v550_v40 = vmul.f32 %v1286_v39, %v1284_v34 }
 0x2b6   : > { %v551_v42 = vpack.c.bf16 %v550_v40, %v550_v40 }
 0x2b8   : > { %1155 = vmatmul.mubr.msk.bf16.vlgmr.msra.gmra.mrb[0].mxu1 %vm539_vm5, %v551_v42 }
 0x2b9   : > { %1159 = vmatpush3.bf16.xpose.msra.mxu1 %v620_v43  ;;  %1162 = vmatprep.mubr.msk.bf16.mxu1 %vm1328_vm0, %v1325_v7 }
 0x2ba   : > { %1160 = vmatprep.subr.bf16.mxu1 %v1325_v7 }
 0x2c1   : > { %1161 = vmatpush3.bf16.xpose.msra.mxu1 %v623_v45 }
 0x2c2   : > { %1182 = vmatprep.subr.bf16.mxu1 %v1325_v7 }
 0x2c8   : > { %1163 = vmatmul.mubr.msk.bf16.vlgmr.msra.gmra.mrb[4].mxu1 %vm489_vm4, %v609_v46 }
 0x2c9   : > { %1186 = vmatprep.mubr.msk.bf16.mxu1 %vm1328_vm0, %v1325_v7 }
 0x38b   : > { %v1532_v47 = vpop.f32.mrb[0].mxu1 }
 0x38c   : > { %v1156_v48 = vpop.f32.mrb[1].mxu1 }
 0x38d   : > { %v604_v49 = vpop.f32.mrb[2].mxu1 }
 0x38e   : > { %v1157_v50 = vpop.f32.mrb[3].mxu1 }
 0x39b   : > { %v659_v51 = vpop.f32.mrb[4].mxu1 }
 0x39c   : > { %v1164_v52 = vpop.f32.mrb[5].mxu1  ;;  %v665_v53 = vsel %vm539_vm5, %v659_v51, -inf }
 0x39d   : > { %666 = vmax.xlane.f32.xlu1 %v665_v53  ;;  %v662_v54 = vpop.f32.mrb[6].mxu1 }
 0x39e   : > { %v1165_v55 = vpop.f32.mrb[7].mxu1 }
 0x3ae   : > { %679 = vrot.lane.b32.xlu1 %v1518_v37, %s1329_s20 }
 0x3b2   : > { %736 = vrot.lane.b32.xlu1 %v1466_v61, %s1330_s28 }
 0x3b6   : > { %734 = vrot.lane.b32.xlu1 %v1495_v27, %s1330_s28 }
 0x3ba   : > { %803 = vrot.lane.b32.xlu1 %v1518_v37, %s1330_s28 }
 0x42a   : > { %v667_v56 = vpop.xlane.xlu1 %666 }
 0x42b   : > { %v668_v57 = vsub.f32 %v659_v51, %v667_v56 }
 0x42d   : > { %v669_v58 = vmul.f32 1.442695, %v668_v57 }
 0x42e   : > { %v680_v0 = vpop.permute.xlu1 %679 }
 0x42f   : > { %1287 = vpow2.f32 %v669_v58 }
 0x432   : > { %v737_v4 = vpop.permute.xlu1 %736 }
 0x433   : > { %v744_v5 = vsel %vm489_vm4, %v737_v4, 0 }
 0x436   : > { %v735_v9 = vpop.permute.xlu1 %734 }
 0x439   : > { %v1288_v59 = vpop.eup %1287 }
 0x43a   : > { %v671_v60 = vsel %vm539_vm5, %v1288_v59, 0.0  ;;  %v804_v26 = vpop.permute.xlu1 %803 }
 0x43b   : > { %672 = vadd.xlane.f32.xlu0 %v671_v60 }
 0x451   : > { %677 = vrot.lane.b32.xlu0 %v1512_v36, %s1329_s20 }
 0x455   : > { %738 = vrot.lane.b32.xlu0 %v1488_v21, %s1330_s28 }
 0x4c8   : > { %v673_v62 = vpop.xlane.xlu0 %672 }
 0x4c9   : > { %1289 = vrcp.f32 %v673_v62 }
 0x4cc   : > { %v678_v63 = vpop.permute.xlu0 %677 }
 0x4cd   : > { %1167 = vmatpush3.bf16.msra.mxu0 %v678_v63 }
 0x4ce   : > { %1168 = vmatprep.subr.bf16.mxu0 %v1325_v7 }
 0x4d0   : > { %v739_v6 = vpop.permute.xlu0 %738 }
 0x4d1   : > { %1169 = vmatpush3.bf16.msra.mxu0 %v680_v0  ;;  %v747_v8 = vsel %vm489_vm4, %v739_v6, 0 }
 0x4d2   : > { %1174 = vmatprep.subr.bf16.mxu0 %v1325_v7 }
 0x4d3   : > { %v1290_v1 = vpop.eup %1289 }
 0x4d4   : > { %v675_v2 = vmul.f32 %v1290_v1, %v1288_v59 }
 0x4d6   : > { %v676_v3 = vpack.c.bf16 %v675_v2, %v675_v2 }
 0x4d8   : > { %1171 = vmatmul.mubr.msk.bf16.vlgmr.msra.gmra.mrb[4].mxu0 %vm539_vm5, %v676_v3 }
 0x4d9   : > { %1178 = vmatprep.mubr.msk.bf16.mxu0 %vm1328_vm0, %v1325_v7 }
 0x4da   : > { %1175 = vmatpush3.bf16.xpose.msra.mxu0 %v744_v5 }
 0x4db   : > { %1176 = vmatprep.subr.bf16.mxu0 %v1325_v7 }
 0x4e2   : > { %1177 = vmatpush3.bf16.xpose.msra.mxu0 %v747_v8 }
 0x4e3   : > { %1198 = vmatprep.subr.bf16.mxu0 %v1325_v7 }
 0x4e9   : > { %1179 = vmatmul.mubr.msk.bf16.vlgmr.msra.gmra.mrb[8].mxu0 %vm489_vm4, %v735_v9 }
 0x4ea   : > { %1202 = vmatprep.mubr.msk.bf16.mxu0 %vm1328_vm0, %v1325_v7 }
 0x5ab   : > { %v1560_v11 = vpop.f32.mrb[4].mxu0 }
 0x5ac   : > { %v1172_v12 = vpop.f32.mrb[5].mxu0 }
 0x5ad   : > { %v723_v13 = vpop.f32.mrb[6].mxu0 }
 0x5ae   : > { %v1173_v14 = vpop.f32.mrb[7].mxu0 }
 0x5bc   : > { %v783_v15 = vpop.f32.mrb[8].mxu0 }
 0x5bd   : > { %v1180_v17 = vpop.f32.mrb[9].mxu0  ;;  %v789_v18 = vsel %vm539_vm5, %v783_v15, -inf }
 0x5be   : > { %790 = vmax.xlane.f32.xlu0 %v789_v18  ;;  %v786_v19 = vpop.f32.mrb[10].mxu0 }
 0x5bf   : > { %v1181_v20 = vpop.f32.mrb[11].mxu0 }
 0x5d4   : > { %801 = vrot.lane.b32.xlu0 %v1512_v36, %s1330_s28 }
 0x5d8   : > { %852 = vrot.lane.b32.xlu0 %v1466_v61, %s1331_s29 }
 0x5dc   : > { %850 = vrot.lane.b32.xlu0 %v1495_v27, %s1331_s29 }
 0x64b   : > { %v791_v22 = vpop.xlane.xlu0 %790 }
 0x64c   : > { %v792_v23 = vsub.f32 %v783_v15, %v791_v22 }
 0x64e   : > { %v793_v24 = vmul.f32 1.442695, %v792_v23 }
 0x64f   : > { %v802_v25 = vpop.permute.xlu0 %801 }
 0x650   : > { %1291 = vpow2.f32 %v793_v24  ;;  %1183 = vmatpush3.bf16.msra.mxu1 %v802_v25 }
 0x651   : > { %1184 = vmatprep.subr.bf16.mxu1 %v1325_v7 }
 0x653   : > { %v853_v29 = vpop.permute.xlu0 %852 }
 0x654   : > { %1185 = vmatpush3.bf16.msra.mxu1 %v804_v26  ;;  %v860_v31 = vsel %vm489_vm4, %v853_v29, 0 }
 0x655   : > { %1190 = vmatprep.subr.bf16.mxu1 %v1325_v7 }
 0x65a   : > { %v1292_v10 = vpop.eup %1291 }
 0x65b   : > { %v795_v16 = vsel %vm539_vm5, %v1292_v10, 0.0 }
 0x65c   : > { %796 = vadd.xlane.f32.xlu1 %v795_v16 }
 0x66d   : > { %854 = vrot.lane.b32.xlu1 %v1488_v21, %s1331_s29  ;;  %v851_v21 = vpop.permute.xlu0 %850 }
 0x6e9   : > { %v797_v61 = vpop.xlane.xlu1 %796 }
 0x6ea   : > { %1293 = vrcp.f32 %v797_v61 }
 0x6ed   : > { %v855_v32 = vpop.permute.xlu1 %854 }
 0x6ee   : > { %v863_v33 = vsel %vm489_vm4, %v855_v32, 0 }
 0x6f4   : > { %v1294_v27 = vpop.eup %1293 }
 0x6f5   : > { %v799_v28 = vmul.f32 %v1294_v27, %v1292_v10 }
 0x6f7   : > { %v800_v30 = vpack.c.bf16 %v799_v28, %v799_v28 }
 0x6f9   : > { %1187 = vmatmul.mubr.msk.bf16.vlgmr.msra.gmra.mrb[8].mxu1 %vm539_vm5, %v800_v30 }
 0x6fa   : > { %1191 = vmatpush3.bf16.xpose.msra.mxu1 %v860_v31  ;;  %1194 = vmatprep.mubr.msk.bf16.mxu1 %vm1328_vm0, %v1325_v7 }
 0x6fb   : > { %1192 = vmatprep.subr.bf16.mxu1 %v1325_v7 }
 0x702   : > { %1193 = vmatpush3.bf16.xpose.msra.mxu1 %v863_v33 }
 0x709   : > { %1195 = vmatmul.mubr.msk.bf16.vlgmr.msra.gmra.mrb[12].mxu1 %vm489_vm4, %v851_v21 }
 0x7cc   : > { %v844_v34 = vpop.f32.mrb[8].mxu1 }
 0x7cd   : > { %v1188_v35 = vpop.f32.mrb[9].mxu1 }
 0x7ce   : > { %v847_v38 = vpop.f32.mrb[10].mxu1 }
 0x7cf   : > { %v1189_v39 = vpop.f32.mrb[11].mxu1 }
 0x7dc   : > { %v899_v40 = vpop.f32.mrb[12].mxu1 }
 0x7dd   : > { %v1196_v41 = vpop.f32.mrb[13].mxu1  ;;  %v905_v42 = vsel %vm539_vm5, %v899_v40, -inf }
 0x7de   : > { %906 = vmax.xlane.f32.xlu1 %v905_v42  ;;  %v902_v43 = vpop.f32.mrb[14].mxu1 }
 0x7df   : > { %v1197_v44 = vpop.f32.mrb[15].mxu1 }
 0x7ef   : > { %919 = vrot.lane.b32.xlu1 %v1518_v37, %s1331_s29 }
 0x86b   : > { %v907_v45 = vpop.xlane.xlu1 %906 }
 0x86c   : > { %v908_v46 = vsub.f32 %v899_v40, %v907_v45 }
 0x86e   : > { %v909_v48 = vmul.f32 1.442695, %v908_v46 }
 0x86f   : > { %v920_v37 = vpop.permute.xlu1 %919 }
 0x870   : > { %1295 = vpow2.f32 %v909_v48 }
 0x87a   : > { %v1296_v49 = vpop.eup %1295 }
 0x87b   : > { %v911_v50 = vsel %vm539_vm5, %v1296_v49, 0.0 }
 0x87c   : > { %912 = vadd.xlane.f32.xlu0 %v911_v50 }
 0x892   : > { %917 = vrot.lane.b32.xlu0 %v1512_v36, %s1331_s29 }
 0x896   : > { %727 = vrot.lane.b32.xlu0 %v1560_v11, %s1332_s30 }
 0x909   : > { %v913_v51 = vpop.xlane.xlu0 %912 }
 0x90a   : > { %1297 = vrcp.f32 %v913_v51 }
 0x90d   : > { %v918_v52 = vpop.permute.xlu0 %917 }
 0x90e   : > { %1199 = vmatpush3.bf16.msra.mxu0 %v918_v52 }
 0x90f   : > { %1200 = vmatprep.subr.bf16.mxu0 %v1325_v7 }
 0x911   : > { %v728_v53 = vpop.permute.xlu0 %727 }
 0x912   : > { %v730_v36 = vsel %vm489_vm4, %v1532_v47, %v728_v53  ;;  %1201 = vmatpush3.bf16.msra.mxu0 %v920_v37 }
 0x913   : > { %v731_v54 = vpack.c.bf16 %v730_v36, %v730_v36 }
 0x914   : > { %v1298_v55 = vpop.eup %1297 }
 0x915   : > { %v915_v56 = vmul.f32 %v1298_v55, %v1296_v49  ;;  %733 = vst.msk [vmem:[%s344_s10] sm:$0xf] %vm732_vm6, %v731_v54 }
 0x917   : > { %v916_v57 = vpack.c.bf16 %v915_v56, %v915_v56 }
 0x919   : > { %1203 = vmatmul.mubr.msk.bf16.vlgmr.msra.gmra.mrb[12].mxu0 %vm539_vm5, %v916_v57 }
 0x9ec   : > { %v960_v7 = vpop.f32.mrb[12].mxu0 }
 0x9ed   : > { %967 = vrot.lane.b32.xlu1 %v960_v7, %s1332_s30  ;;  %v1204_v58 = vpop.f32.mrb[13].mxu0 }
 0x9ee   : > { %v963_v59 = vpop.f32.mrb[14].mxu0 }
 0x9ef   : > { %v1205_v60 = vpop.f32.mrb[15].mxu0 }
 0xa5f   : > { %v968_v62 = vpop.permute.xlu1 %967 }
 0xa60   : > { %v970_v63 = vsel %vm489_vm4, %v844_v34, %v968_v62 }
 0xa61   : > { %v1108_v0 = vpack.c.bf16 %v970_v63, %v970_v63 }
 0xa63   : > { %975 = vrot.lane.b32.xlu1 %v1108_v0, %s1333_s24 }
 0xad5   : > { %v976_v47 = vpop.permute.xlu1 %975 }
 0xad6   : > { %979 = vst.msk [vmem:[%s344_s10] sm:$0xf] %vm978_vm7, %v976_v47 }
 0xad7 PF: > { %s17_s26 = sadd.s32 1, %s1321_s26   ;;  %s1617_s24 = smov %s1317_s25 }
 0xad8   : > { %p14_p5 = scmp.ge.s32.totalorder %s17_s26, 4   ;;  %s1618_s25 = smov %s1620_s27 }
 0xada   :  { %16 = sbr.rel (!%p14_p5) target bundleno = 2 (0x2), region = 86 }

</bundles_post_ra>
